<compile_context>
chip_gen: v5e
topology: v5e:2x2
jax: 0.10.0
libtpu: 0.0.40
codegen_flags: <defaults>
</compile_context>

<pallas_src>
import functools

import jax
import jax.numpy as jnp
from jax.experimental import pallas as pl
from jax.experimental.pallas import tpu as pltpu


# ----------------------------------------------------------------------------
# Small synthetic config (mirrors the LlavaConfig fields the forward touches)
# ----------------------------------------------------------------------------
CFG = dict(
    # vision tower (CLIP-like)
    image_size=16, patch_size=8, num_channels=3,
    v_hidden=128, v_layers=2, v_heads=4, v_intermediate=256,
    vision_feature_layer=-2,                    # HF/vLLM default
    vision_feature_select_strategy="default",   # drop CLS token
    # language model (Llama-like)
    t_hidden=128, t_layers=2, t_heads=4, t_intermediate=256,
    vocab_size=256, image_token_id=200,
    rope_theta=10000.0, rms_eps=1e-6, ln_eps=1e-5,
)

_NEG_INF = -1e30   # plain Python float; becomes a trace-time constant


def _bcast_spec(shape):
    """BlockSpec for a whole-array operand shared by every grid step."""
    ndim = len(shape)
    return pl.BlockSpec(shape, lambda *_, n=ndim: (0,) * n)


# ----------------------------------------------------------------------------
# Simple fused Pallas kernels (run once per forward)
# ----------------------------------------------------------------------------
def _matmul_kernel(x_ref, w_ref, o_ref):
    o_ref[...] = jnp.dot(x_ref[...].astype(jnp.bfloat16), w_ref[...],
                         preferred_element_type=jnp.float32)


def pallas_patch_embed(patches, w):
    """patches: (M, C*p*p) f32; w: (C*p*p, Dv) bf16 (pre-transposed)."""
    M, K = patches.shape
    N = w.shape[1]
    return pl.pallas_call(
        _matmul_kernel,
        out_shape=jax.ShapeDtypeStruct((M, N), jnp.float32),
        grid=(1,),
        in_specs=[_bcast_spec((M, K)), _bcast_spec((K, N))],
        out_specs=_bcast_spec((M, N)),
        compiler_params=pltpu.CompilerParams(
            dimension_semantics=("arbitrary",)),
    )(patches, w)


def _layernorm_kernel(x_ref, g_ref, b_ref, o_ref, *, eps):
    x = x_ref[...]
    mu = jnp.mean(x, axis=-1, keepdims=True)
    xc = x - mu
    var = jnp.mean(xc * xc, axis=-1, keepdims=True)
    o_ref[...] = xc * jax.lax.rsqrt(var + eps) * g_ref[...] + b_ref[...]


def pallas_layernorm(x, g, b, eps):
    M, D = x.shape
    return pl.pallas_call(
        functools.partial(_layernorm_kernel, eps=eps),
        out_shape=jax.ShapeDtypeStruct((M, D), jnp.float32),
        grid=(1,),
        in_specs=[_bcast_spec((M, D)), _bcast_spec((1, D)), _bcast_spec((1, D))],
        out_specs=_bcast_spec((M, D)),
        compiler_params=pltpu.CompilerParams(
            dimension_semantics=("arbitrary",)),
    )(x, g, b)


def _rmsnorm_kernel(x_ref, g_ref, o_ref, *, eps):
    x = x_ref[...]
    ms = jnp.mean(x * x, axis=-1, keepdims=True)
    o_ref[...] = x * jax.lax.rsqrt(ms + eps) * g_ref[...]


def pallas_rmsnorm(x, g, eps):
    M, D = x.shape
    return pl.pallas_call(
        functools.partial(_rmsnorm_kernel, eps=eps),
        out_shape=jax.ShapeDtypeStruct((M, D), jnp.float32),
        grid=(1,),
        in_specs=[_bcast_spec((M, D)), _bcast_spec((1, D))],
        out_specs=_bcast_spec((M, D)),
        compiler_params=pltpu.CompilerParams(
            dimension_semantics=("arbitrary",)),
    )(x, g)


# ----------------------------------------------------------------------------
# CLIP encoder layer: ONE fused kernel (attention block + MLP block)
# ----------------------------------------------------------------------------
def _clip_layer_kernel(x_ref, g1_ref, b1_ref, wqkv_ref, bqkv_ref, wo_ref,
                       bo_ref, g2_ref, b2_ref, w1_ref, bf1_ref, w2_ref,
                       bf2_ref, o_ref, *, heads, eps):
    x = x_ref[0]                                     # (S, D) f32
    S, D = x.shape
    Dh = D // heads
    scale = 1.0 / (Dh ** 0.5)

    # --- attention sub-block: LayerNorm (f32)
    mu = jnp.mean(x, axis=-1, keepdims=True)
    xc = x - mu
    var = jnp.mean(xc * xc, axis=-1, keepdims=True)
    h = xc * jax.lax.rsqrt(var + eps) * g1_ref[...] + b1_ref[...]

    # Fused QKV projection (bf16 MXU, f32 accumulate)
    qkv = jnp.dot(h.astype(jnp.bfloat16), wqkv_ref[...],
                  preferred_element_type=jnp.float32) + bqkv_ref[...]
    q, k, v = qkv[:, :D], qkv[:, D:2 * D], qkv[:, 2 * D:]

    wo = wo_ref[...]
    acc = jnp.zeros((S, D), jnp.float32)
    for hd in range(heads):                          # unrolled at trace time
        sl = slice(hd * Dh, (hd + 1) * Dh)
        qh = (q[:, sl] * scale).astype(jnp.bfloat16)
        kh = k[:, sl].astype(jnp.bfloat16)
        vh = v[:, sl].astype(jnp.bfloat16)
        s = jax.lax.dot_general(qh, kh, (((1,), (1,)), ((), ())),
                                preferred_element_type=jnp.float32)
        s = s - jnp.max(s, axis=-1, keepdims=True)
        p = jnp.exp(s)
        p = p * pl.reciprocal(jnp.sum(p, axis=-1, keepdims=True), approx=True)
        oh = jnp.dot(p.astype(jnp.bfloat16), vh,
                     preferred_element_type=jnp.float32)
        # per-head slice of the output projection -> no concat needed
        acc = acc + jnp.dot(oh.astype(jnp.bfloat16), wo[sl, :],
                            preferred_element_type=jnp.float32)
    x = x + acc + bo_ref[...]                        # residual fused

    # --- MLP sub-block: LayerNorm + fc1 + quick_gelu + fc2 + residual
    mu = jnp.mean(x, axis=-1, keepdims=True)
    xc = x - mu
    var = jnp.mean(xc * xc, axis=-1, keepdims=True)
    h = xc * jax.lax.rsqrt(var + eps) * g2_ref[...] + b2_ref[...]
    h = jnp.dot(h.astype(jnp.bfloat16), w1_ref[...],
                preferred_element_type=jnp.float32) + bf1_ref[...]
    h = h * jax.nn.sigmoid(1.702 * h)                # quick_gelu (f32)
    y = jnp.dot(h.astype(jnp.bfloat16), w2_ref[...],
                preferred_element_type=jnp.float32) + bf2_ref[...]
    o_ref[0] = x + y                                 # residual fused


def clip_layer(x, lp, cfg):
    B, S, D = x.shape
    inter = cfg["v_intermediate"]
    kern = functools.partial(_clip_layer_kernel, heads=cfg["v_heads"],
                             eps=cfg["ln_eps"])
    tok_spec = pl.BlockSpec((1, S, D), lambda b: (b, 0, 0))
    return pl.pallas_call(
        kern,
        out_shape=jax.ShapeDtypeStruct((B, S, D), jnp.float32),
        grid=(B,),
        in_specs=[tok_spec,
                  _bcast_spec((1, D)), _bcast_spec((1, D)),
                  _bcast_spec((D, 3 * D)), _bcast_spec((1, 3 * D)),
                  _bcast_spec((D, D)), _bcast_spec((1, D)),
                  _bcast_spec((1, D)), _bcast_spec((1, D)),
                  _bcast_spec((D, inter)), _bcast_spec((1, inter)),
                  _bcast_spec((inter, D)), _bcast_spec((1, D))],
        out_specs=tok_spec,
        compiler_params=pltpu.CompilerParams(
            dimension_semantics=("parallel",)),
    )(x, lp["ln1_g"], lp["ln1_b"], lp["wqkv"], lp["bqkv"], lp["wo"], lp["bo"],
      lp["ln2_g"], lp["ln2_b"], lp["w_fc1"], lp["b_fc1"], lp["w_fc2"],
      lp["b_fc2"])


# ----------------------------------------------------------------------------
# Llama decoder layer: ONE fused kernel
#   RMSNorm + QKV + RoPE + causal attention + O-proj + residual +
#   RMSNorm + gate/up + SiLU*up + down + residual
# ----------------------------------------------------------------------------
def _llama_layer_kernel(x_ref, g1_ref, wqkv_ref, wo_ref, cos_ref, sin_ref,
                        g2_ref, wgu_ref, wdown_ref, o_ref, *, heads, eps,
                        inter):
    x = x_ref[0]                                     # (S, D) f32
    S, D = x.shape
    Dh = D // heads
    half = Dh // 2
    scale = 1.0 / (Dh ** 0.5)

    # --- attention sub-block: RMSNorm (f32)
    ms = jnp.mean(x * x, axis=-1, keepdims=True)
    h = x * jax.lax.rsqrt(ms + eps) * g1_ref[...]

    # Fused QKV projection (bf16 MXU, f32 accumulate)
    qkv = jnp.dot(h.astype(jnp.bfloat16), wqkv_ref[...],
                  preferred_element_type=jnp.float32)
    q, k, v = qkv[:, :D], qkv[:, D:2 * D], qkv[:, 2 * D:]

    cos = cos_ref[0]                                 # (S, half) f32
    sin = sin_ref[0]
    row = jax.lax.broadcasted_iota(jnp.int32, (S, S), 0)
    col = jax.lax.broadcasted_iota(jnp.int32, (S, S), 1)
    causal = col <= row

    wo = wo_ref[...]
    acc = jnp.zeros((S, D), jnp.float32)
    for hd in range(heads):                          # unrolled at trace time
        sl = slice(hd * Dh, (hd + 1) * Dh)
        qh, kh, vh = q[:, sl], k[:, sl], v[:, sl]
        q1, q2 = qh[:, :half], qh[:, half:]
        k1, k2 = kh[:, :half], kh[:, half:]
        # NeoX RoPE (rotate_half) fused; the rotated dot product is split over
        # the two halves so no in-kernel concatenate is required.
        qr1 = ((q1 * cos - q2 * sin) * scale).astype(jnp.bfloat16)
        qr2 = ((q2 * cos + q1 * sin) * scale).astype(jnp.bfloat16)
        kr1 = (k1 * cos - k2 * sin).astype(jnp.bfloat16)
        kr2 = (k2 * cos + k1 * sin).astype(jnp.bfloat16)
        s = (jax.lax.dot_general(qr1, kr1, (((1,), (1,)), ((), ())),
                                 preferred_element_type=jnp.float32) +
             jax.lax.dot_general(qr2, kr2, (((1,), (1,)), ((), ())),
                                 preferred_element_type=jnp.float32))
        s = jnp.where(causal, s, _NEG_INF)
        s = s - jnp.max(s, axis=-1, keepdims=True)
        p = jnp.exp(s)
        p = p * pl.reciprocal(jnp.sum(p, axis=-1, keepdims=True), approx=True)
        oh = jnp.dot(p.astype(jnp.bfloat16), vh.astype(jnp.bfloat16),
                     preferred_element_type=jnp.float32)
        acc = acc + jnp.dot(oh.astype(jnp.bfloat16), wo[sl, :],
                            preferred_element_type=jnp.float32)
    x = x + acc                                      # residual fused

    # --- MLP sub-block: RMSNorm + gate/up + SiLU*up + down + residual
    ms = jnp.mean(x * x, axis=-1, keepdims=True)
    h = x * jax.lax.rsqrt(ms + eps) * g2_ref[...]
    gu = jnp.dot(h.astype(jnp.bfloat16), wgu_ref[...],
                 preferred_element_type=jnp.float32)
    gate, up = gu[:, :inter], gu[:, inter:]
    a = gate * jax.nn.sigmoid(gate) * up             # SiLU * up (f32)
    y = jnp.dot(a.astype(jnp.bfloat16), wdown_ref[...],
                preferred_element_type=jnp.float32)
    o_ref[0] = x + y                                 # residual fused


def llama_layer(x, lp, cos, sin, cfg):
    B, S, D = x.shape
    inter = cfg["t_intermediate"]
    half = (D // cfg["t_heads"]) // 2
    kern = functools.partial(_llama_layer_kernel, heads=cfg["t_heads"],
                             eps=cfg["rms_eps"], inter=inter)
    tok_spec = pl.BlockSpec((1, S, D), lambda b: (b, 0, 0))
    rope_spec = pl.BlockSpec((1, S, half), lambda b: (b, 0, 0))
    return pl.pallas_call(
        kern,
        out_shape=jax.ShapeDtypeStruct((B, S, D), jnp.float32),
        grid=(B,),
        in_specs=[tok_spec, _bcast_spec((1, D)),
                  _bcast_spec((D, 3 * D)), _bcast_spec((D, D)),
                  rope_spec, rope_spec,
                  _bcast_spec((1, D)),
                  _bcast_spec((D, 2 * inter)), _bcast_spec((inter, D))],
        out_specs=tok_spec,
        compiler_params=pltpu.CompilerParams(
            dimension_semantics=("parallel",)),
    )(x, lp["in_ln_g"], lp["wqkv"], lp["wo"], cos, sin,
      lp["post_ln_g"], lp["w_gate_up"], lp["w_down"])


# --- Multimodal projector (linear + GELU + linear fused) ----------------------
def _projector_kernel(x_ref, w1_ref, b1_ref, w2_ref, b2_ref, o_ref):
    x = x_ref[...]                                   # (M, Dv) f32
    h = jnp.dot(x.astype(jnp.bfloat16), w1_ref[...],
                preferred_element_type=jnp.float32) + b1_ref[...]
    # TODO(synk): HF projector uses exact erf-GELU; tanh approximation used to
    # avoid erf, which has no guaranteed Mosaic lowering.
    h = 0.5 * h * (1.0 + jnp.tanh(0.7978845608028654 *
                                  (h + 0.044715 * h * h * h)))
    y = jnp.dot(h.astype(jnp.bfloat16), w2_ref[...],
                preferred_element_type=jnp.float32) + b2_ref[...]
    o_ref[...] = y


def multi_modal_projector(params, feats):
    B, N, Dv = feats.shape
    Dt = params["w2"].shape[1]
    out = pl.pallas_call(
        _projector_kernel,
        out_shape=jax.ShapeDtypeStruct((B * N, Dt), jnp.float32),
        grid=(1,),
        in_specs=[_bcast_spec((B * N, Dv)),
                  _bcast_spec((Dv, Dt)), _bcast_spec((1, Dt)),
                  _bcast_spec((Dt, Dt)), _bcast_spec((1, Dt))],
        out_specs=_bcast_spec((B * N, Dt)),
        compiler_params=pltpu.CompilerParams(
            dimension_semantics=("arbitrary",)),
    )(feats.reshape(B * N, Dv), params["w1"], params["b1"],
      params["w2"], params["b2"])
    return out.reshape(B, N, Dt)


# ----------------------------------------------------------------------------
# Model glue (reshapes / gathers / RoPE tables are plain JAX; compute = Pallas)
# ----------------------------------------------------------------------------
def clip_vision_tower(params, pixel_values, cfg):
    """CLIPVisionModel up to `vision_feature_layer`. pixel_values: NCHW."""
    B, C, H, W = pixel_values.shape
    p = cfg["patch_size"]
    gh, gw = H // p, W // p
    Dv = cfg["v_hidden"]
    # im2col for the non-overlapping patch conv (stride == kernel == p, no bias)
    patches = jnp.transpose(
        pixel_values.reshape(B, C, gh, p, gw, p), (0, 2, 4, 1, 3, 5)
    ).reshape(B * gh * gw, C * p * p)
    x = pallas_patch_embed(patches, params["patch_w"]).reshape(B, gh * gw, Dv)

    cls = jnp.broadcast_to(params["class_emb"].reshape(1, 1, Dv), (B, 1, Dv))
    x = jnp.concatenate([cls, x], axis=1) + params["pos_emb"][None]
    S = x.shape[1]

    x = pallas_layernorm(x.reshape(B * S, Dv), params["pre_ln_g"],
                         params["pre_ln_b"], cfg["ln_eps"]).reshape(B, S, Dv)

    # hidden_states = [emb, l0, l1, ...]; vision_feature_layer=-2 -> run L-1
    n_run = cfg["v_layers"] + 1 + cfg["vision_feature_layer"]
    for li in range(n_run):
        x = clip_layer(x, params["v_layers"][li], cfg)
    return x                                         # (B, S, Dv)


def merge_vision_embeddings(input_ids, inputs_embeds, vision_embeddings,
                            image_token_id):
    """Functional equivalent of the in-place scatter in the reference code."""
    # TODO(synk): the PyTorch reference raises if mask.sum() != nvis*per; the
    # prompt here is constructed so the counts always match.
    mask = input_ids == image_token_id
    nvis, per, D = vision_embeddings.shape
    flat_vis = vision_embeddings.reshape(nvis * per, D)
    idx = jnp.cumsum(mask.astype(jnp.int32)) - 1
    gathered = flat_vis[jnp.clip(idx, 0, flat_vis.shape[0] - 1)]
    return jnp.where(mask[:, None], gathered, inputs_embeds)


def rope_cos_sin(positions, head_dim, theta):
    half = head_dim // 2
    inv = 1.0 / (theta ** (jnp.arange(half, dtype=jnp.float32) * 2.0 / head_dim))
    ang = positions.astype(jnp.float32)[..., None] * inv        # (B, S, half)
    return jnp.cos(ang), jnp.sin(ang)


def llama_model(params, inputs_embeds, positions, cfg):
    """Prefill-only Llama decoder (per-sequence causal attention).
    TODO(synk): paged kv_caches / attn_metadata plumbing has no clean Pallas
    equivalent in this synthetic setting; full causal prefill is computed."""
    B, S, D = inputs_embeds.shape
    Dh = D // cfg["t_heads"]
    cos, sin = rope_cos_sin(positions, Dh, cfg["rope_theta"])
    x = inputs_embeds
    for li in range(cfg["t_layers"]):
        x = llama_layer(x, params["t_layers"][li], cos, sin, cfg)
    x = pallas_rmsnorm(x.reshape(B * S, D), params["final_ln_g"],
                       cfg["rms_eps"]).reshape(B, S, D)
    return x


def llava_forward(params, input_ids, positions, pixel_values, cfg):
    """LlavaForConditionalGeneration.forward: returns decoder hidden states."""
    # _process_image_input
    feats = clip_vision_tower(params["vision"], pixel_values, cfg)
    if cfg["vision_feature_select_strategy"] == "default":
        feats = feats[:, 1:]                                     # drop CLS
    vision_embeddings = multi_modal_projector(params["projector"], feats)

    # language_model.get_input_embeddings + merge_vision_embeddings
    flat_ids = input_ids.reshape(-1)
    inputs_embeds = params["text"]["embed_tokens"][flat_ids]
    inputs_embeds = merge_vision_embeddings(flat_ids, inputs_embeds,
                                            vision_embeddings,
                                            cfg["image_token_id"])

    B = pixel_values.shape[0]
    L = flat_ids.shape[0] // B
    hidden = llama_model(params["text"], inputs_embeds.reshape(B, L, -1),
                         positions.reshape(B, L), cfg)
    return hidden.reshape(B * L, -1)                 # flattened, vLLM-style


# ----------------------------------------------------------------------------
# Deterministic parameter init (matmul weights pre-transposed (K, N), bf16)
# ----------------------------------------------------------------------------
def init_params(key, cfg):
    keys = iter(jax.random.split(key, 512))

    def nrm(shape, scale=0.02, dtype=jnp.float32):
        return (jax.random.normal(next(keys), shape, jnp.float32)
                * scale).astype(dtype)

    def w(k_dim, n_dim):       # pre-transposed (K, N) bf16 matmul weight
        return nrm((k_dim, n_dim), dtype=jnp.bfloat16)

    p, C = cfg["patch_size"], cfg["num_channels"]
    Dv, Dt = cfg["v_hidden"], cfg["t_hidden"]
    Iv, It = cfg["v_intermediate"], cfg["t_intermediate"]
    npatch = (cfg["image_size"] // p) ** 2

    vision = dict(
        patch_w=w(C * p * p, Dv),
        class_emb=nrm((Dv,)),
        pos_emb=nrm((npatch + 1, Dv)),
        pre_ln_g=jnp.ones((1, Dv), jnp.float32),
        pre_ln_b=jnp.zeros((1, Dv), jnp.float32),
        v_layers=[],
    )
    for _ in range(cfg["v_layers"]):
        vision["v_layers"].append(dict(
            ln1_g=jnp.ones((1, Dv), jnp.float32),
            ln1_b=jnp.zeros((1, Dv), jnp.float32),
            wqkv=w(Dv, 3 * Dv), bqkv=nrm((1, 3 * Dv)),
            wo=w(Dv, Dv), bo=nrm((1, Dv)),
            ln2_g=jnp.ones((1, Dv), jnp.float32),
            ln2_b=jnp.zeros((1, Dv), jnp.float32),
            w_fc1=w(Dv, Iv), b_fc1=nrm((1, Iv)),
            w_fc2=w(Iv, Dv), b_fc2=nrm((1, Dv)),
        ))

    projector = dict(
        w1=w(Dv, Dt), b1=nrm((1, Dt)),
        w2=w(Dt, Dt), b2=nrm((1, Dt)),
    )

    text = dict(
        embed_tokens=nrm((cfg["vocab_size"], Dt)),
        t_layers=[],
        final_ln_g=jnp.ones((1, Dt), jnp.float32),
    )
    for _ in range(cfg["t_layers"]):
        text["t_layers"].append(dict(
            in_ln_g=jnp.ones((1, Dt), jnp.float32),
            wqkv=w(Dt, 3 * Dt),
            wo=w(Dt, Dt),
            post_ln_g=jnp.ones((1, Dt), jnp.float32),
            w_gate_up=w(Dt, 2 * It),
            w_down=w(It, Dt),
        ))

    return dict(vision=vision, projector=projector, text=text)


# ----------------------------------------------------------------------------
if __name__ == "__main__":
    cfg = CFG
    key = jax.random.PRNGKey(0)
    pkey, k1, k2 = jax.random.split(key, 3)
    params = init_params(pkey, cfg)

    B = 2
    pixel_values = jax.random.normal(
        k1, (B, cfg["num_channels"], cfg["image_size"], cfg["image_size"]),
        jnp.float32)

    num_img_tokens = (cfg["image_size"] // cfg["patch_size"]) ** 2   # 4 / image
    L = 8
    # per-sequence ids: [bos, <image>*4, 3 text tokens]; the image token id
    # never appears among random text ids so mask.sum() == B * num_img_tokens.
    text_ids = jax.random.randint(k2, (B, L), 1, cfg["image_token_id"],
                                  jnp.int32)
    img_block = jnp.full((B, num_img_tokens), cfg["image_token_id"], jnp.int32)
    input_ids = jnp.concatenate(
        [text_ids[:, :1], img_block, text_ids[:, 1:L - num_img_tokens]], axis=1)
    positions = jnp.broadcast_to(jnp.arange(L, dtype=jnp.int32), (B, L))

    fwd = jax.jit(functools.partial(llava_forward, cfg=cfg))
    hidden_states = fwd(params, input_ids.reshape(-1), positions.reshape(-1),
                        pixel_values)
    jax.block_until_ready(hidden_states)
    assert hidden_states.shape == (B * L, cfg["t_hidden"])
    assert bool(jnp.all(jnp.isfinite(hidden_states)))
    print("KERNEL_OK")
</pallas_src>

<mosaic_0001>
module attributes {stable_mosaic.version = 11 : i64} {
  func.func @_matmul_kernel(%arg0: i32, %arg1: memref<8x192xf32, #tpu.memory_space<vmem>>, %arg2: memref<192x128xbf16, #tpu.memory_space<vmem>>, %arg3: memref<8x128xf32, #tpu.memory_space<vmem>>) attributes {dimension_semantics = [#tpu.dimension_semantics<arbitrary>], iteration_bounds = array<i64: 1>, scalar_prefetch = 0 : i64, scratch_operands = 0 : i64, tpu.core_type = #tpu.core_type<tc>, window_params = [{pipeline_mode = #tpu.pipeline_mode<synchronous>, transform_indices = @transform_0, window_bounds = array<i64: 8, 192>}, {pipeline_mode = #tpu.pipeline_mode<synchronous>, transform_indices = @transform_1, window_bounds = array<i64: 192, 128>}, {pipeline_mode = #tpu.pipeline_mode<synchronous>, transform_indices = @transform_2, window_bounds = array<i64: 8, 128>}]} {
    %c0 = arith.constant 0 : index
    %c0_0 = arith.constant 0 : index
    %0 = vector.load %arg1[%c0, %c0_0] : memref<8x192xf32, #tpu.memory_space<vmem>>, vector<8x192xf32>
    %1 = arith.truncf %0 : vector<8x192xf32> to vector<8x192xbf16>
    %c0_1 = arith.constant 0 : index
    %c0_2 = arith.constant 0 : index
    %2 = vector.load %arg2[%c0_1, %c0_2] : memref<192x128xbf16, #tpu.memory_space<vmem>>, vector<192x128xbf16>
    %cst = arith.constant dense<0.000000e+00> : vector<8x128xf32>
    %3 = tpu.matmul %1, %2, %cst {dimension_numbers = #tpu.dot_dimension_numbers<[1], [0], [0], [1], [0, 0, 1, 1], [], []>} : vector<8x192xbf16>, vector<192x128xbf16>, vector<8x128xf32> -> vector<8x128xf32>
    %c0_3 = arith.constant 0 : index
    %c0_4 = arith.constant 0 : index
    %4 = vector.load %arg3[%c0_3, %c0_4] : memref<8x128xf32, #tpu.memory_space<vmem>>, vector<8x128xf32>
    tpu.vector_store %arg3[%c0_3, %c0_4], %3 {strides = array<i32>} : memref<8x128xf32, #tpu.memory_space<vmem>>, vector<8x128xf32>,
    return
  }
  func.func @transform_0(%arg0: i32) -> (i32, i32) {
    %c0_i32 = arith.constant 0 : i32
    %c0_i32_0 = arith.constant 0 : i32
    %c0_i32_1 = arith.constant 0 : i32
    return %c0_i32, %c0_i32_0 : i32, i32
  }
  func.func @transform_1(%arg0: i32) -> (i32, i32) {
    %c0_i32 = arith.constant 0 : i32
    %c0_i32_0 = arith.constant 0 : i32
    %c0_i32_1 = arith.constant 0 : i32
    return %c0_i32, %c0_i32_0 : i32, i32
  }
  func.func @transform_2(%arg0: i32) -> (i32, i32) {
    %c0_i32 = arith.constant 0 : i32
    %c0_i32_0 = arith.constant 0 : i32
    %c0_i32_1 = arith.constant 0 : i32
    return %c0_i32, %c0_i32_0 : i32, i32
  }
}

module attributes {stable_mosaic.version = 11 : i64} {
  func.func @_layernorm_kernel(%arg0: i32, %arg1: memref<10x128xf32, #tpu.memory_space<vmem>>, %arg2: memref<1x128xf32, #tpu.memory_space<vmem>>, %arg3: memref<1x128xf32, #tpu.memory_space<vmem>>, %arg4: memref<10x128xf32, #tpu.memory_space<vmem>>) attributes {dimension_semantics = [#tpu.dimension_semantics<arbitrary>], iteration_bounds = array<i64: 1>, scalar_prefetch = 0 : i64, scratch_operands = 0 : i64, tpu.core_type = #tpu.core_type<tc>, window_params = [{pipeline_mode = #tpu.pipeline_mode<synchronous>, transform_indices = @transform_0, window_bounds = array<i64: 10, 128>}, {pipeline_mode = #tpu.pipeline_mode<synchronous>, transform_indices = @transform_1, window_bounds = array<i64: 1, 128>}, {pipeline_mode = #tpu.pipeline_mode<synchronous>, transform_indices = @transform_2, window_bounds = array<i64: 1, 128>}, {pipeline_mode = #tpu.pipeline_mode<synchronous>, transform_indices = @transform_3, window_bounds = array<i64: 10, 128>}]} {
    %c0 = arith.constant 0 : index
    %c0_0 = arith.constant 0 : index
    %0 = vector.load %arg1[%c0, %c0_0] : memref<10x128xf32, #tpu.memory_space<vmem>>, vector<10x128xf32>
    %cst = arith.constant dense<0.000000e+00> : vector<10xf32>
    %1 = vector.multi_reduction <add>, %0, %cst [1] : vector<10x128xf32> to vector<10xf32>
    %2 = vector.shape_cast %1 : vector<10xf32> to vector<10x1xf32>
    %cst_1 = arith.constant 1.280000e+02 : f32
    %3 = vector.broadcast %cst_1 : f32 to vector<10x1xf32>
    %4 = arith.divf %2, %3 : vector<10x1xf32>
    %5 = vector.broadcast %4 : vector<10x1xf32> to vector<10x128xf32>
    %6 = arith.subf %0, %5 : vector<10x128xf32>
    %7 = arith.mulf %6, %6 : vector<10x128xf32>
    %cst_2 = arith.constant dense<0.000000e+00> : vector<10xf32>
    %8 = vector.multi_reduction <add>, %7, %cst_2 [1] : vector<10x128xf32> to vector<10xf32>
    %9 = vector.shape_cast %8 : vector<10xf32> to vector<10x1xf32>
    %cst_3 = arith.constant 1.280000e+02 : f32
    %10 = vector.broadcast %cst_3 : f32 to vector<10x1xf32>
    %11 = arith.divf %9, %10 : vector<10x1xf32>
    %cst_4 = arith.constant 9.99999974E-6 : f32
    %12 = vector.broadcast %cst_4 : f32 to vector<10x1xf32>
    %13 = arith.addf %11, %12 : vector<10x1xf32>
    %14 = math.rsqrt %13 : vector<10x1xf32>
    %15 = vector.broadcast %14 : vector<10x1xf32> to vector<10x128xf32>
    %16 = arith.mulf %6, %15 : vector<10x128xf32>
    %c0_5 = arith.constant 0 : index
    %c0_6 = arith.constant 0 : index
    %17 = vector.load %arg2[%c0_5, %c0_6] : memref<1x128xf32, #tpu.memory_space<vmem>>, vector<1x128xf32>
    %18 = vector.broadcast %17 : vector<1x128xf32> to vector<10x128xf32>
    %19 = arith.mulf %16, %18 : vector<10x128xf32>
    %c0_7 = arith.constant 0 : index
    %c0_8 = arith.constant 0 : index
    %20 = vector.load %arg3[%c0_7, %c0_8] : memref<1x128xf32, #tpu.memory_space<vmem>>, vector<1x128xf32>
    %21 = vector.broadcast %20 : vector<1x128xf32> to vector<10x128xf32>
    %22 = arith.addf %19, %21 : vector<10x128xf32>
    %c0_9 = arith.constant 0 : index
    %c0_10 = arith.constant 0 : index
    %23 = vector.load %arg4[%c0_9, %c0_10] : memref<10x128xf32, #tpu.memory_space<vmem>>, vector<10x128xf32>
    tpu.vector_store %arg4[%c0_9, %c0_10], %22 {strides = array<i32>} : memref<10x128xf32, #tpu.memory_space<vmem>>, vector<10x128xf32>,
    return
  }
  func.func @transform_0(%arg0: i32) -> (i32, i32) {
    %c0_i32 = arith.constant 0 : i32
    %c0_i32_0 = arith.constant 0 : i32
    %c0_i32_1 = arith.constant 0 : i32
    return %c0_i32, %c0_i32_0 : i32, i32
  }
  func.func @transform_1(%arg0: i32) -> (i32, i32) {
    %c0_i32 = arith.constant 0 : i32
    %c0_i32_0 = arith.constant 0 : i32
    %c0_i32_1 = arith.constant 0 : i32
    return %c0_i32, %c0_i32_0 : i32, i32
  }
  func.func @transform_2(%arg0: i32) -> (i32, i32) {
    %c0_i32 = arith.constant 0 : i32
    %c0_i32_0 = arith.constant 0 : i32
    %c0_i32_1 = arith.constant 0 : i32
    return %c0_i32, %c0_i32_0 : i32, i32
  }
  func.func @transform_3(%arg0: i32) -> (i32, i32) {
    %c0_i32 = arith.constant 0 : i32
    %c0_i32_0 = arith.constant 0 : i32
    %c0_i32_1 = arith.constant 0 : i32
    return %c0_i32, %c0_i32_0 : i32, i32
  }
}

module attributes {stable_mosaic.version = 11 : i64} {
  func.func @_projector_kernel(%arg0: i32, %arg1: memref<8x128xf32, #tpu.memory_space<vmem>>, %arg2: memref<128x128xbf16, #tpu.memory_space<vmem>>, %arg3: memref<1x128xf32, #tpu.memory_space<vmem>>, %arg4: memref<128x128xbf16, #tpu.memory_space<vmem>>, %arg5: memref<1x128xf32, #tpu.memory_space<vmem>>, %arg6: memref<8x128xf32, #tpu.memory_space<vmem>>) attributes {dimension_semantics = [#tpu.dimension_semantics<arbitrary>], iteration_bounds = array<i64: 1>, scalar_prefetch = 0 : i64, scratch_operands = 0 : i64, tpu.core_type = #tpu.core_type<tc>, window_params = [{pipeline_mode = #tpu.pipeline_mode<synchronous>, transform_indices = @transform_0, window_bounds = array<i64: 8, 128>}, {pipeline_mode = #tpu.pipeline_mode<synchronous>, transform_indices = @transform_1, window_bounds = array<i64: 128, 128>}, {pipeline_mode = #tpu.pipeline_mode<synchronous>, transform_indices = @transform_2, window_bounds = array<i64: 1, 128>}, {pipeline_mode = #tpu.pipeline_mode<synchronous>, transform_indices = @transform_3, window_bounds = array<i64: 128, 128>}, {pipeline_mode = #tpu.pipeline_mode<synchronous>, transform_indices = @transform_4, window_bounds = array<i64: 1, 128>}, {pipeline_mode = #tpu.pipeline_mode<synchronous>, transform_indices = @transform_5, window_bounds = array<i64: 8, 128>}]} {
    %c0 = arith.constant 0 : index
    %c0_0 = arith.constant 0 : index
    %0 = vector.load %arg1[%c0, %c0_0] : memref<8x128xf32, #tpu.memory_space<vmem>>, vector<8x128xf32>
    %1 = arith.truncf %0 : vector<8x128xf32> to vector<8x128xbf16>
    %c0_1 = arith.constant 0 : index
    %c0_2 = arith.constant 0 : index
    %2 = vector.load %arg2[%c0_1, %c0_2] : memref<128x128xbf16, #tpu.memory_space<vmem>>, vector<128x128xbf16>
    %cst = arith.constant dense<0.000000e+00> : vector<8x128xf32>
    %3 = tpu.matmul %1, %2, %cst {dimension_numbers = #tpu.dot_dimension_numbers<[1], [0], [0], [1], [0, 0, 1, 1], [], []>} : vector<8x128xbf16>, vector<128x128xbf16>, vector<8x128xf32> -> vector<8x128xf32>
    %c0_3 = arith.constant 0 : index
    %c0_4 = arith.constant 0 : index
    %4 = vector.load %arg3[%c0_3, %c0_4] : memref<1x128xf32, #tpu.memory_space<vmem>>, vector<1x128xf32>
    %5 = vector.broadcast %4 : vector<1x128xf32> to vector<8x128xf32>
    %6 = arith.addf %3, %5 : vector<8x128xf32>
    %cst_5 = arith.constant 5.000000e-01 : f32
    %7 = vector.broadcast %cst_5 : f32 to vector<8x128xf32>
    %8 = arith.mulf %7, %6 : vector<8x128xf32>
    %cst_6 = arith.constant 4.471500e-02 : f32
    %9 = vector.broadcast %cst_6 : f32 to vector<8x128xf32>
    %10 = arith.mulf %9, %6 : vector<8x128xf32>
    %11 = arith.mulf %10, %6 : vector<8x128xf32>
    %12 = arith.mulf %11, %6 : vector<8x128xf32>
    %13 = arith.addf %6, %12 : vector<8x128xf32>
    %cst_7 = arith.constant 0.797884583 : f32
    %14 = vector.broadcast %cst_7 : f32 to vector<8x128xf32>
    %15 = arith.mulf %14, %13 : vector<8x128xf32>
    %16 = math.tanh %15 : vector<8x128xf32>
    %cst_8 = arith.constant 1.000000e+00 : f32
    %17 = vector.broadcast %cst_8 : f32 to vector<8x128xf32>
    %18 = arith.addf %17, %16 : vector<8x128xf32>
    %19 = arith.mulf %8, %18 : vector<8x128xf32>
    %20 = arith.truncf %19 : vector<8x128xf32> to vector<8x128xbf16>
    %c0_9 = arith.constant 0 : index
    %c0_10 = arith.constant 0 : index
    %21 = vector.load %arg4[%c0_9, %c0_10] : memref<128x128xbf16, #tpu.memory_space<vmem>>, vector<128x128xbf16>
    %cst_11 = arith.constant dense<0.000000e+00> : vector<8x128xf32>
    %22 = tpu.matmul %20, %21, %cst_11 {dimension_numbers = #tpu.dot_dimension_numbers<[1], [0], [0], [1], [0, 0, 1, 1], [], []>} : vector<8x128xbf16>, vector<128x128xbf16>, vector<8x128xf32> -> vector<8x128xf32>
    %c0_12 = arith.constant 0 : index
    %c0_13 = arith.constant 0 : index
    %23 = vector.load %arg5[%c0_12, %c0_13] : memref<1x128xf32, #tpu.memory_space<vmem>>, vector<1x128xf32>
    %24 = vector.broadcast %23 : vector<1x128xf32> to vector<8x128xf32>
    %25 = arith.addf %22, %24 : vector<8x128xf32>
    %c0_14 = arith.constant 0 : index
    %c0_15 = arith.constant 0 : index
    %26 = vector.load %arg6[%c0_14, %c0_15] : memref<8x128xf32, #tpu.memory_space<vmem>>, vector<8x128xf32>
    tpu.vector_store %arg6[%c0_14, %c0_15], %25 {strides = array<i32>} : memref<8x128xf32, #tpu.memory_space<vmem>>, vector<8x128xf32>,
    return
  }
  func.func @transform_0(%arg0: i32) -> (i32, i32) {
    %c0_i32 = arith.constant 0 : i32
    %c0_i32_0 = arith.constant 0 : i32
    %c0_i32_1 = arith.constant 0 : i32
    return %c0_i32, %c0_i32_0 : i32, i32
  }
  func.func @transform_1(%arg0: i32) -> (i32, i32) {
    %c0_i32 = arith.constant 0 : i32
    %c0_i32_0 = arith.constant 0 : i32
    %c0_i32_1 = arith.constant 0 : i32
    return %c0_i32, %c0_i32_0 : i32, i32
  }
  func.func @transform_2(%arg0: i32) -> (i32, i32) {
    %c0_i32 = arith.constant 0 : i32
    %c0_i32_0 = arith.constant 0 : i32
    %c0_i32_1 = arith.constant 0 : i32
    return %c0_i32, %c0_i32_0 : i32, i32
  }
  func.func @transform_3(%arg0: i32) -> (i32, i32) {
    %c0_i32 = arith.constant 0 : i32
    %c0_i32_0 = arith.constant 0 : i32
    %c0_i32_1 = arith.constant 0 : i32
    return %c0_i32, %c0_i32_0 : i32, i32
  }
  func.func @transform_4(%arg0: i32) -> (i32, i32) {
    %c0_i32 = arith.constant 0 : i32
    %c0_i32_0 = arith.constant 0 : i32
    %c0_i32_1 = arith.constant 0 : i32
    return %c0_i32, %c0_i32_0 : i32, i32
  }
  func.func @transform_5(%arg0: i32) -> (i32, i32) {
    %c0_i32 = arith.constant 0 : i32
    %c0_i32_0 = arith.constant 0 : i32
    %c0_i32_1 = arith.constant 0 : i32
    return %c0_i32, %c0_i32_0 : i32, i32
  }
}

module attributes {stable_mosaic.version = 11 : i64} {
  func.func @_clip_layer_kernel(%arg0: i32, %arg1: memref<1x5x128xf32, #tpu.memory_space<vmem>>, %arg2: memref<1x128xf32, #tpu.memory_space<vmem>>, %arg3: memref<1x128xf32, #tpu.memory_space<vmem>>, %arg4: memref<128x384xbf16, #tpu.memory_space<vmem>>, %arg5: memref<1x384xf32, #tpu.memory_space<vmem>>, %arg6: memref<128x128xbf16, #tpu.memory_space<vmem>>, %arg7: memref<1x128xf32, #tpu.memory_space<vmem>>, %arg8: memref<1x128xf32, #tpu.memory_space<vmem>>, %arg9: memref<1x128xf32, #tpu.memory_space<vmem>>, %arg10: memref<128x256xbf16, #tpu.memory_space<vmem>>, %arg11: memref<1x256xf32, #tpu.memory_space<vmem>>, %arg12: memref<256x128xbf16, #tpu.memory_space<vmem>>, %arg13: memref<1x128xf32, #tpu.memory_space<vmem>>, %arg14: memref<1x5x128xf32, #tpu.memory_space<vmem>>) attributes {dimension_semantics = [#tpu.dimension_semantics<parallel>], iteration_bounds = array<i64: 2>, scalar_prefetch = 0 : i64, scratch_operands = 0 : i64, tpu.core_type = #tpu.core_type<tc>, window_params = [{transform_indices = @transform_0, window_bounds = array<i64: 1, 5, 128>}, {pipeline_mode = #tpu.pipeline_mode<synchronous>, transform_indices = @transform_1, window_bounds = array<i64: 1, 128>}, {pipeline_mode = #tpu.pipeline_mode<synchronous>, transform_indices = @transform_2, window_bounds = array<i64: 1, 128>}, {pipeline_mode = #tpu.pipeline_mode<synchronous>, transform_indices = @transform_3, window_bounds = array<i64: 128, 384>}, {pipeline_mode = #tpu.pipeline_mode<synchronous>, transform_indices = @transform_4, window_bounds = array<i64: 1, 384>}, {pipeline_mode = #tpu.pipeline_mode<synchronous>, transform_indices = @transform_5, window_bounds = array<i64: 128, 128>}, {pipeline_mode = #tpu.pipeline_mode<synchronous>, transform_indices = @transform_6, window_bounds = array<i64: 1, 128>}, {pipeline_mode = #tpu.pipeline_mode<synchronous>, transform_indices = @transform_7, window_bounds = array<i64: 1, 128>}, {pipeline_mode = #tpu.pipeline_mode<synchronous>, transform_indices = @transform_8, window_bounds = array<i64: 1, 128>}, {pipeline_mode = #tpu.pipeline_mode<synchronous>, transform_indices = @transform_9, window_bounds = array<i64: 128, 256>}, {pipeline_mode = #tpu.pipeline_mode<synchronous>, transform_indices = @transform_10, window_bounds = array<i64: 1, 256>}, {pipeline_mode = #tpu.pipeline_mode<synchronous>, transform_indices = @transform_11, window_bounds = array<i64: 256, 128>}, {pipeline_mode = #tpu.pipeline_mode<synchronous>, transform_indices = @transform_12, window_bounds = array<i64: 1, 128>}, {transform_indices = @transform_13, window_bounds = array<i64: 1, 5, 128>}]} {
    %c0 = arith.constant 0 : index
    %c0_0 = arith.constant 0 : index
    %c0_1 = arith.constant 0 : index
    %0 = vector.load %arg1[%c0, %c0_0, %c0_1] : memref<1x5x128xf32, #tpu.memory_space<vmem>>, vector<1x5x128xf32>
    %1 = vector.shape_cast %0 : vector<1x5x128xf32> to vector<5x128xf32>
    %cst = arith.constant dense<0.000000e+00> : vector<5xf32>
    %2 = vector.multi_reduction <add>, %1, %cst [1] : vector<5x128xf32> to vector<5xf32>
    %3 = vector.shape_cast %2 : vector<5xf32> to vector<5x1xf32>
    %cst_2 = arith.constant 1.280000e+02 : f32
    %4 = vector.broadcast %cst_2 : f32 to vector<5x1xf32>
    %5 = arith.divf %3, %4 : vector<5x1xf32>
    %6 = vector.broadcast %5 : vector<5x1xf32> to vector<5x128xf32>
    %7 = arith.subf %1, %6 : vector<5x128xf32>
    %8 = arith.mulf %7, %7 : vector<5x128xf32>
    %cst_3 = arith.constant dense<0.000000e+00> : vector<5xf32>
    %9 = vector.multi_reduction <add>, %8, %cst_3 [1] : vector<5x128xf32> to vector<5xf32>
    %10 = vector.shape_cast %9 : vector<5xf32> to vector<5x1xf32>
    %cst_4 = arith.constant 1.280000e+02 : f32
    %11 = vector.broadcast %cst_4 : f32 to vector<5x1xf32>
    %12 = arith.divf %10, %11 : vector<5x1xf32>
    %cst_5 = arith.constant 9.99999974E-6 : f32
    %13 = vector.broadcast %cst_5 : f32 to vector<5x1xf32>
    %14 = arith.addf %12, %13 : vector<5x1xf32>
    %15 = math.rsqrt %14 : vector<5x1xf32>
    %16 = vector.broadcast %15 : vector<5x1xf32> to vector<5x128xf32>
    %17 = arith.mulf %7, %16 : vector<5x128xf32>
    %c0_6 = arith.constant 0 : index
    %c0_7 = arith.constant 0 : index
    %18 = vector.load %arg2[%c0_6, %c0_7] : memref<1x128xf32, #tpu.memory_space<vmem>>, vector<1x128xf32>
    %19 = vector.broadcast %18 : vector<1x128xf32> to vector<5x128xf32>
    %20 = arith.mulf %17, %19 : vector<5x128xf32>
    %c0_8 = arith.constant 0 : index
    %c0_9 = arith.constant 0 : index
    %21 = vector.load %arg3[%c0_8, %c0_9] : memref<1x128xf32, #tpu.memory_space<vmem>>, vector<1x128xf32>
    %22 = vector.broadcast %21 : vector<1x128xf32> to vector<5x128xf32>
    %23 = arith.addf %20, %22 : vector<5x128xf32>
    %24 = arith.truncf %23 : vector<5x128xf32> to vector<5x128xbf16>
    %c0_10 = arith.constant 0 : index
    %c0_11 = arith.constant 0 : index
    %25 = vector.load %arg4[%c0_10, %c0_11] : memref<128x384xbf16, #tpu.memory_space<vmem>>, vector<128x384xbf16>
    %cst_12 = arith.constant dense<0.000000e+00> : vector<5x384xf32>
    %26 = tpu.matmul %24, %25, %cst_12 {dimension_numbers = #tpu.dot_dimension_numbers<[1], [0], [0], [1], [0, 0, 1, 1], [], []>} : vector<5x128xbf16>, vector<128x384xbf16>, vector<5x384xf32> -> vector<5x384xf32>
    %c0_13 = arith.constant 0 : index
    %c0_14 = arith.constant 0 : index
    %27 = vector.load %arg5[%c0_13, %c0_14] : memref<1x384xf32, #tpu.memory_space<vmem>>, vector<1x384xf32>
    %28 = vector.broadcast %27 : vector<1x384xf32> to vector<5x384xf32>
    %29 = arith.addf %26, %28 : vector<5x384xf32>
    %30 = vector.extract_strided_slice %29 {offsets = [0, 0], sizes = [5, 128], strides = [1, 1]} : vector<5x384xf32> to vector<5x128xf32>
    %31 = vector.extract_strided_slice %29 {offsets = [0, 128], sizes = [5, 128], strides = [1, 1]} : vector<5x384xf32> to vector<5x128xf32>
    %32 = vector.extract_strided_slice %29 {offsets = [0, 256], sizes = [5, 128], strides = [1, 1]} : vector<5x384xf32> to vector<5x128xf32>
    %c0_15 = arith.constant 0 : index
    %c0_16 = arith.constant 0 : index
    %33 = vector.load %arg6[%c0_15, %c0_16] : memref<128x128xbf16, #tpu.memory_space<vmem>>, vector<128x128xbf16>
    %cst_17 = arith.constant 0.000000e+00 : f32
    %34 = vector.broadcast %cst_17 : f32 to vector<5x128xf32>
    %35 = vector.extract_strided_slice %30 {offsets = [0, 0], sizes = [5, 32], strides = [1, 1]} : vector<5x128xf32> to vector<5x32xf32>
    %cst_18 = arith.constant 0.176776692 : f32
    %36 = vector.broadcast %cst_18 : f32 to vector<5x32xf32>
    %37 = arith.mulf %35, %36 : vector<5x32xf32>
    %38 = arith.truncf %37 : vector<5x32xf32> to vector<5x32xbf16>
    %39 = vector.extract_strided_slice %31 {offsets = [0, 0], sizes = [5, 32], strides = [1, 1]} : vector<5x128xf32> to vector<5x32xf32>
    %40 = arith.truncf %39 : vector<5x32xf32> to vector<5x32xbf16>
    %41 = vector.extract_strided_slice %32 {offsets = [0, 0], sizes = [5, 32], strides = [1, 1]} : vector<5x128xf32> to vector<5x32xf32>
    %42 = arith.truncf %41 : vector<5x32xf32> to vector<5x32xbf16>
    %cst_19 = arith.constant dense<0.000000e+00> : vector<5x5xf32>
    %43 = tpu.matmul %38, %40, %cst_19 {dimension_numbers = #tpu.dot_dimension_numbers<[1], [1], [0], [0], [0, 0, 1, 0], [], []>} : vector<5x32xbf16>, vector<5x32xbf16>, vector<5x5xf32> -> vector<5x5xf32>
    %cst_20 = arith.constant dense<0xFF800000> : vector<5xf32>
    %44 = vector.multi_reduction <maximumf>, %43, %cst_20 [1] : vector<5x5xf32> to vector<5xf32>
    %45 = vector.shape_cast %44 : vector<5xf32> to vector<5x1xf32>
    %46 = vector.broadcast %45 : vector<5x1xf32> to vector<5x5xf32>
    %47 = arith.subf %43, %46 : vector<5x5xf32>
    %48 = math.exp %47 : vector<5x5xf32>
    %cst_21 = arith.constant dense<0.000000e+00> : vector<5xf32>
    %49 = vector.multi_reduction <add>, %48, %cst_21 [1] : vector<5x5xf32> to vector<5xf32>
    %50 = vector.shape_cast %49 : vector<5xf32> to vector<5x1xf32>
    %51 = tpu.reciprocal %50 {approx = true} : vector<5x1xf32> -> vector<5x1xf32>
    %52 = vector.broadcast %51 : vector<5x1xf32> to vector<5x5xf32>
    %53 = arith.mulf %48, %52 : vector<5x5xf32>
    %54 = arith.truncf %53 : vector<5x5xf32> to vector<5x5xbf16>
    %cst_22 = arith.constant dense<0.000000e+00> : vector<5x32xf32>
    %55 = tpu.matmul %54, %42, %cst_22 {dimension_numbers = #tpu.dot_dimension_numbers<[1], [0], [0], [1], [0, 0, 1, 1], [], []>} : vector<5x5xbf16>, vector<5x32xbf16>, vector<5x32xf32> -> vector<5x32xf32>
    %56 = arith.truncf %55 : vector<5x32xf32> to vector<5x32xbf16>
    %57 = vector.extract_strided_slice %33 {offsets = [0, 0], sizes = [32, 128], strides = [1, 1]} : vector<128x128xbf16> to vector<32x128xbf16>
    %cst_23 = arith.constant dense<0.000000e+00> : vector<5x128xf32>
    %58 = tpu.matmul %56, %57, %cst_23 {dimension_numbers = #tpu.dot_dimension_numbers<[1], [0], [0], [1], [0, 0, 1, 1], [], []>} : vector<5x32xbf16>, vector<32x128xbf16>, vector<5x128xf32> -> vector<5x128xf32>
    %59 = arith.addf %34, %58 : vector<5x128xf32>
    %60 = vector.extract_strided_slice %30 {offsets = [0, 32], sizes = [5, 32], strides = [1, 1]} : vector<5x128xf32> to vector<5x32xf32>
    %cst_24 = arith.constant 0.176776692 : f32
    %61 = vector.broadcast %cst_24 : f32 to vector<5x32xf32>
    %62 = arith.mulf %60, %61 : vector<5x32xf32>
    %63 = arith.truncf %62 : vector<5x32xf32> to vector<5x32xbf16>
    %64 = vector.extract_strided_slice %31 {offsets = [0, 32], sizes = [5, 32], strides = [1, 1]} : vector<5x128xf32> to vector<5x32xf32>
    %65 = arith.truncf %64 : vector<5x32xf32> to vector<5x32xbf16>
    %66 = vector.extract_strided_slice %32 {offsets = [0, 32], sizes = [5, 32], strides = [1, 1]} : vector<5x128xf32> to vector<5x32xf32>
    %67 = arith.truncf %66 : vector<5x32xf32> to vector<5x32xbf16>
    %cst_25 = arith.constant dense<0.000000e+00> : vector<5x5xf32>
    %68 = tpu.matmul %63, %65, %cst_25 {dimension_numbers = #tpu.dot_dimension_numbers<[1], [1], [0], [0], [0, 0, 1, 0], [], []>} : vector<5x32xbf16>, vector<5x32xbf16>, vector<5x5xf32> -> vector<5x5xf32>
    %cst_26 = arith.constant dense<0xFF800000> : vector<5xf32>
    %69 = vector.multi_reduction <maximumf>, %68, %cst_26 [1] : vector<5x5xf32> to vector<5xf32>
    %70 = vector.shape_cast %69 : vector<5xf32> to vector<5x1xf32>
    %71 = vector.broadcast %70 : vector<5x1xf32> to vector<5x5xf32>
    %72 = arith.subf %68, %71 : vector<5x5xf32>
    %73 = math.exp %72 : vector<5x5xf32>
    %cst_27 = arith.constant dense<0.000000e+00> : vector<5xf32>
    %74 = vector.multi_reduction <add>, %73, %cst_27 [1] : vector<5x5xf32> to vector<5xf32>
    %75 = vector.shape_cast %74 : vector<5xf32> to vector<5x1xf32>
    %76 = tpu.reciprocal %75 {approx = true} : vector<5x1xf32> -> vector<5x1xf32>
    %77 = vector.broadcast %76 : vector<5x1xf32> to vector<5x5xf32>
    %78 = arith.mulf %73, %77 : vector<5x5xf32>
    %79 = arith.truncf %78 : vector<5x5xf32> to vector<5x5xbf16>
    %cst_28 = arith.constant dense<0.000000e+00> : vector<5x32xf32>
    %80 = tpu.matmul %79, %67, %cst_28 {dimension_numbers = #tpu.dot_dimension_numbers<[1], [0], [0], [1], [0, 0, 1, 1], [], []>} : vector<5x5xbf16>, vector<5x32xbf16>, vector<5x32xf32> -> vector<5x32xf32>
    %81 = arith.truncf %80 : vector<5x32xf32> to vector<5x32xbf16>
    %82 = vector.extract_strided_slice %33 {offsets = [32, 0], sizes = [32, 128], strides = [1, 1]} : vector<128x128xbf16> to vector<32x128xbf16>
    %cst_29 = arith.constant dense<0.000000e+00> : vector<5x128xf32>
    %83 = tpu.matmul %81, %82, %cst_29 {dimension_numbers = #tpu.dot_dimension_numbers<[1], [0], [0], [1], [0, 0, 1, 1], [], []>} : vector<5x32xbf16>, vector<32x128xbf16>, vector<5x128xf32> -> vector<5x128xf32>
    %84 = arith.addf %59, %83 : vector<5x128xf32>
    %85 = vector.extract_strided_slice %30 {offsets = [0, 64], sizes = [5, 32], strides = [1, 1]} : vector<5x128xf32> to vector<5x32xf32>
    %cst_30 = arith.constant 0.176776692 : f32
    %86 = vector.broadcast %cst_30 : f32 to vector<5x32xf32>
    %87 = arith.mulf %85, %86 : vector<5x32xf32>
    %88 = arith.truncf %87 : vector<5x32xf32> to vector<5x32xbf16>
    %89 = vector.extract_strided_slice %31 {offsets = [0, 64], sizes = [5, 32], strides = [1, 1]} : vector<5x128xf32> to vector<5x32xf32>
    %90 = arith.truncf %89 : vector<5x32xf32> to vector<5x32xbf16>
    %91 = vector.extract_strided_slice %32 {offsets = [0, 64], sizes = [5, 32], strides = [1, 1]} : vector<5x128xf32> to vector<5x32xf32>
    %92 = arith.truncf %91 : vector<5x32xf32> to vector<5x32xbf16>
    %cst_31 = arith.constant dense<0.000000e+00> : vector<5x5xf32>
    %93 = tpu.matmul %88, %90, %cst_31 {dimension_numbers = #tpu.dot_dimension_numbers<[1], [1], [0], [0], [0, 0, 1, 0], [], []>} : vector<5x32xbf16>, vector<5x32xbf16>, vector<5x5xf32> -> vector<5x5xf32>
    %cst_32 = arith.constant dense<0xFF800000> : vector<5xf32>
    %94 = vector.multi_reduction <maximumf>, %93, %cst_32 [1] : vector<5x5xf32> to vector<5xf32>
    %95 = vector.shape_cast %94 : vector<5xf32> to vector<5x1xf32>
    %96 = vector.broadcast %95 : vector<5x1xf32> to vector<5x5xf32>
    %97 = arith.subf %93, %96 : vector<5x5xf32>
    %98 = math.exp %97 : vector<5x5xf32>
    %cst_33 = arith.constant dense<0.000000e+00> : vector<5xf32>
    %99 = vector.multi_reduction <add>, %98, %cst_33 [1] : vector<5x5xf32> to vector<5xf32>
    %100 = vector.shape_cast %99 : vector<5xf32> to vector<5x1xf32>
    %101 = tpu.reciprocal %100 {approx = true} : vector<5x1xf32> -> vector<5x1xf32>
    %102 = vector.broadcast %101 : vector<5x1xf32> to vector<5x5xf32>
    %103 = arith.mulf %98, %102 : vector<5x5xf32>
    %104 = arith.truncf %103 : vector<5x5xf32> to vector<5x5xbf16>
    %cst_34 = arith.constant dense<0.000000e+00> : vector<5x32xf32>
    %105 = tpu.matmul %104, %92, %cst_34 {dimension_numbers = #tpu.dot_dimension_numbers<[1], [0], [0], [1], [0, 0, 1, 1], [], []>} : vector<5x5xbf16>, vector<5x32xbf16>, vector<5x32xf32> -> vector<5x32xf32>
    %106 = arith.truncf %105 : vector<5x32xf32> to vector<5x32xbf16>
    %107 = vector.extract_strided_slice %33 {offsets = [64, 0], sizes = [32, 128], strides = [1, 1]} : vector<128x128xbf16> to vector<32x128xbf16>
    %cst_35 = arith.constant dense<0.000000e+00> : vector<5x128xf32>
    %108 = tpu.matmul %106, %107, %cst_35 {dimension_numbers = #tpu.dot_dimension_numbers<[1], [0], [0], [1], [0, 0, 1, 1], [], []>} : vector<5x32xbf16>, vector<32x128xbf16>, vector<5x128xf32> -> vector<5x128xf32>
    %109 = arith.addf %84, %108 : vector<5x128xf32>
    %110 = vector.extract_strided_slice %30 {offsets = [0, 96], sizes = [5, 32], strides = [1, 1]} : vector<5x128xf32> to vector<5x32xf32>
    %cst_36 = arith.constant 0.176776692 : f32
    %111 = vector.broadcast %cst_36 : f32 to vector<5x32xf32>
    %112 = arith.mulf %110, %111 : vector<5x32xf32>
    %113 = arith.truncf %112 : vector<5x32xf32> to vector<5x32xbf16>
    %114 = vector.extract_strided_slice %31 {offsets = [0, 96], sizes = [5, 32], strides = [1, 1]} : vector<5x128xf32> to vector<5x32xf32>
    %115 = arith.truncf %114 : vector<5x32xf32> to vector<5x32xbf16>
    %116 = vector.extract_strided_slice %32 {offsets = [0, 96], sizes = [5, 32], strides = [1, 1]} : vector<5x128xf32> to vector<5x32xf32>
    %117 = arith.truncf %116 : vector<5x32xf32> to vector<5x32xbf16>
    %cst_37 = arith.constant dense<0.000000e+00> : vector<5x5xf32>
    %118 = tpu.matmul %113, %115, %cst_37 {dimension_numbers = #tpu.dot_dimension_numbers<[1], [1], [0], [0], [0, 0, 1, 0], [], []>} : vector<5x32xbf16>, vector<5x32xbf16>, vector<5x5xf32> -> vector<5x5xf32>
    %cst_38 = arith.constant dense<0xFF800000> : vector<5xf32>
    %119 = vector.multi_reduction <maximumf>, %118, %cst_38 [1] : vector<5x5xf32> to vector<5xf32>
    %120 = vector.shape_cast %119 : vector<5xf32> to vector<5x1xf32>
    %121 = vector.broadcast %120 : vector<5x1xf32> to vector<5x5xf32>
    %122 = arith.subf %118, %121 : vector<5x5xf32>
    %123 = math.exp %122 : vector<5x5xf32>
    %cst_39 = arith.constant dense<0.000000e+00> : vector<5xf32>
    %124 = vector.multi_reduction <add>, %123, %cst_39 [1] : vector<5x5xf32> to vector<5xf32>
    %125 = vector.shape_cast %124 : vector<5xf32> to vector<5x1xf32>
    %126 = tpu.reciprocal %125 {approx = true} : vector<5x1xf32> -> vector<5x1xf32>
    %127 = vector.broadcast %126 : vector<5x1xf32> to vector<5x5xf32>
    %128 = arith.mulf %123, %127 : vector<5x5xf32>
    %129 = arith.truncf %128 : vector<5x5xf32> to vector<5x5xbf16>
    %cst_40 = arith.constant dense<0.000000e+00> : vector<5x32xf32>
    %130 = tpu.matmul %129, %117, %cst_40 {dimension_numbers = #tpu.dot_dimension_numbers<[1], [0], [0], [1], [0, 0, 1, 1], [], []>} : vector<5x5xbf16>, vector<5x32xbf16>, vector<5x32xf32> -> vector<5x32xf32>
    %131 = arith.truncf %130 : vector<5x32xf32> to vector<5x32xbf16>
    %132 = vector.extract_strided_slice %33 {offsets = [96, 0], sizes = [32, 128], strides = [1, 1]} : vector<128x128xbf16> to vector<32x128xbf16>
    %cst_41 = arith.constant dense<0.000000e+00> : vector<5x128xf32>
    %133 = tpu.matmul %131, %132, %cst_41 {dimension_numbers = #tpu.dot_dimension_numbers<[1], [0], [0], [1], [0, 0, 1, 1], [], []>} : vector<5x32xbf16>, vector<32x128xbf16>, vector<5x128xf32> -> vector<5x128xf32>
    %134 = arith.addf %109, %133 : vector<5x128xf32>
    %135 = arith.addf %1, %134 : vector<5x128xf32>
    %c0_42 = arith.constant 0 : index
    %c0_43 = arith.constant 0 : index
    %136 = vector.load %arg7[%c0_42, %c0_43] : memref<1x128xf32, #tpu.memory_space<vmem>>, vector<1x128xf32>
    %137 = vector.broadcast %136 : vector<1x128xf32> to vector<5x128xf32>
    %138 = arith.addf %135, %137 : vector<5x128xf32>
    %cst_44 = arith.constant dense<0.000000e+00> : vector<5xf32>
    %139 = vector.multi_reduction <add>, %138, %cst_44 [1] : vector<5x128xf32> to vector<5xf32>
    %140 = vector.shape_cast %139 : vector<5xf32> to vector<5x1xf32>
    %cst_45 = arith.constant 1.280000e+02 : f32
    %141 = vector.broadcast %cst_45 : f32 to vector<5x1xf32>
    %142 = arith.divf %140, %141 : vector<5x1xf32>
    %143 = vector.broadcast %142 : vector<5x1xf32> to vector<5x128xf32>
    %144 = arith.subf %138, %143 : vector<5x128xf32>
    %145 = arith.mulf %144, %144 : vector<5x128xf32>
    %cst_46 = arith.constant dense<0.000000e+00> : vector<5xf32>
    %146 = vector.multi_reduction <add>, %145, %cst_46 [1] : vector<5x128xf32> to vector<5xf32>
    %147 = vector.shape_cast %146 : vector<5xf32> to vector<5x1xf32>
    %cst_47 = arith.constant 1.280000e+02 : f32
    %148 = vector.broadcast %cst_47 : f32 to vector<5x1xf32>
    %149 = arith.divf %147, %148 : vector<5x1xf32>
    %cst_48 = arith.constant 9.99999974E-6 : f32
    %150 = vector.broadcast %cst_48 : f32 to vector<5x1xf32>
    %151 = arith.addf %149, %150 : vector<5x1xf32>
    %152 = math.rsqrt %151 : vector<5x1xf32>
    %153 = vector.broadcast %152 : vector<5x1xf32> to vector<5x128xf32>
    %154 = arith.mulf %144, %153 : vector<5x128xf32>
    %c0_49 = arith.constant 0 : index
    %c0_50 = arith.constant 0 : index
    %155 = vector.load %arg8[%c0_49, %c0_50] : memref<1x128xf32, #tpu.memory_space<vmem>>, vector<1x128xf32>
    %156 = vector.broadcast %155 : vector<1x128xf32> to vector<5x128xf32>
    %157 = arith.mulf %154, %156 : vector<5x128xf32>
    %c0_51 = arith.constant 0 : index
    %c0_52 = arith.constant 0 : index
    %158 = vector.load %arg9[%c0_51, %c0_52] : memref<1x128xf32, #tpu.memory_space<vmem>>, vector<1x128xf32>
    %159 = vector.broadcast %158 : vector<1x128xf32> to vector<5x128xf32>
    %160 = arith.addf %157, %159 : vector<5x128xf32>
    %161 = arith.truncf %160 : vector<5x128xf32> to vector<5x128xbf16>
    %c0_53 = arith.constant 0 : index
    %c0_54 = arith.constant 0 : index
    %162 = vector.load %arg10[%c0_53, %c0_54] : memref<128x256xbf16, #tpu.memory_space<vmem>>, vector<128x256xbf16>
    %cst_55 = arith.constant dense<0.000000e+00> : vector<5x256xf32>
    %163 = tpu.matmul %161, %162, %cst_55 {dimension_numbers = #tpu.dot_dimension_numbers<[1], [0], [0], [1], [0, 0, 1, 1], [], []>} : vector<5x128xbf16>, vector<128x256xbf16>, vector<5x256xf32> -> vector<5x256xf32>
    %c0_56 = arith.constant 0 : index
    %c0_57 = arith.constant 0 : index
    %164 = vector.load %arg11[%c0_56, %c0_57] : memref<1x256xf32, #tpu.memory_space<vmem>>, vector<1x256xf32>
    %165 = vector.broadcast %164 : vector<1x256xf32> to vector<5x256xf32>
    %166 = arith.addf %163, %165 : vector<5x256xf32>
    %cst_58 = arith.constant 1.702000e+00 : f32
    %167 = vector.broadcast %cst_58 : f32 to vector<5x256xf32>
    %168 = arith.mulf %167, %166 : vector<5x256xf32>
    %169 = arith.negf %168 : vector<5x256xf32>
    %170 = math.exp %169 : vector<5x256xf32>
    %cst_59 = arith.constant 1.000000e+00 : f32
    %171 = vector.broadcast %cst_59 : f32 to vector<5x256xf32>
    %172 = arith.addf %171, %170 : vector<5x256xf32>
    %173 = arith.divf %171, %172 : vector<5x256xf32>
    %174 = arith.mulf %166, %173 : vector<5x256xf32>
    %175 = arith.truncf %174 : vector<5x256xf32> to vector<5x256xbf16>
    %c0_60 = arith.constant 0 : index
    %c0_61 = arith.constant 0 : index
    %176 = vector.load %arg12[%c0_60, %c0_61] : memref<256x128xbf16, #tpu.memory_space<vmem>>, vector<256x128xbf16>
    %cst_62 = arith.constant dense<0.000000e+00> : vector<5x128xf32>
    %177 = tpu.matmul %175, %176, %cst_62 {dimension_numbers = #tpu.dot_dimension_numbers<[1], [0], [0], [1], [0, 0, 1, 1], [], []>} : vector<5x256xbf16>, vector<256x128xbf16>, vector<5x128xf32> -> vector<5x128xf32>
    %c0_63 = arith.constant 0 : index
    %c0_64 = arith.constant 0 : index
    %178 = vector.load %arg13[%c0_63, %c0_64] : memref<1x128xf32, #tpu.memory_space<vmem>>, vector<1x128xf32>
    %179 = vector.broadcast %178 : vector<1x128xf32> to vector<5x128xf32>
    %180 = arith.addf %177, %179 : vector<5x128xf32>
    %181 = arith.addf %138, %180 : vector<5x128xf32>
    %c0_65 = arith.constant 0 : index
    %c0_66 = arith.constant 0 : index
    %c0_67 = arith.constant 0 : index
    %182 = vector.load %arg14[%c0_65, %c0_66, %c0_67] : memref<1x5x128xf32, #tpu.memory_space<vmem>>, vector<1x5x128xf32>
    %183 = vector.shape_cast %182 : vector<1x5x128xf32> to vector<5x128xf32>
    %184 = vector.shape_cast %181 : vector<5x128xf32> to vector<1x5x128xf32>
    tpu.vector_store %arg14[%c0_65, %c0_66, %c0_67], %184 {strides = array<i32>} : memref<1x5x128xf32, #tpu.memory_space<vmem>>, vector<1x5x128xf32>,
    return
  }
  func.func @transform_0(%arg0: i32) -> (i32, i32, i32) {
    %c0_i32 = arith.constant 0 : i32
    %c0_i32_0 = arith.constant 0 : i32
    %c0_i32_1 = arith.constant 0 : i32
    return %arg0, %c0_i32, %c0_i32_0 : i32, i32, i32
  }
  func.func @transform_1(%arg0: i32) -> (i32, i32) {
    %c0_i32 = arith.constant 0 : i32
    %c0_i32_0 = arith.constant 0 : i32
    %c0_i32_1 = arith.constant 0 : i32
    return %c0_i32, %c0_i32_0 : i32, i32
  }
  func.func @transform_2(%arg0: i32) -> (i32, i32) {
    %c0_i32 = arith.constant 0 : i32
    %c0_i32_0 = arith.constant 0 : i32
    %c0_i32_1 = arith.constant 0 : i32
    return %c0_i32, %c0_i32_0 : i32, i32
  }
  func.func @transform_3(%arg0: i32) -> (i32, i32) {
    %c0_i32 = arith.constant 0 : i32
    %c0_i32_0 = arith.constant 0 : i32
    %c0_i32_1 = arith.constant 0 : i32
    return %c0_i32, %c0_i32_0 : i32, i32
  }
  func.func @transform_4(%arg0: i32) -> (i32, i32) {
    %c0_i32 = arith.constant 0 : i32
    %c0_i32_0 = arith.constant 0 : i32
    %c0_i32_1 = arith.constant 0 : i32
    return %c0_i32, %c0_i32_0 : i32, i32
  }
  func.func @transform_5(%arg0: i32) -> (i32, i32) {
    %c0_i32 = arith.constant 0 : i32
    %c0_i32_0 = arith.constant 0 : i32
    %c0_i32_1 = arith.constant 0 : i32
    return %c0_i32, %c0_i32_0 : i32, i32
  }
  func.func @transform_6(%arg0: i32) -> (i32, i32) {
    %c0_i32 = arith.constant 0 : i32
    %c0_i32_0 = arith.constant 0 : i32
    %c0_i32_1 = arith.constant 0 : i32
    return %c0_i32, %c0_i32_0 : i32, i32
  }
  func.func @transform_7(%arg0: i32) -> (i32, i32) {
    %c0_i32 = arith.constant 0 : i32
    %c0_i32_0 = arith.constant 0 : i32
    %c0_i32_1 = arith.constant 0 : i32
    return %c0_i32, %c0_i32_0 : i32, i32
  }
  func.func @transform_8(%arg0: i32) -> (i32, i32) {
    %c0_i32 = arith.constant 0 : i32
    %c0_i32_0 = arith.constant 0 : i32
    %c0_i32_1 = arith.constant 0 : i32
    return %c0_i32, %c0_i32_0 : i32, i32
  }
  func.func @transform_9(%arg0: i32) -> (i32, i32) {
    %c0_i32 = arith.constant 0 : i32
    %c0_i32_0 = arith.constant 0 : i32
    %c0_i32_1 = arith.constant 0 : i32
    return %c0_i32, %c0_i32_0 : i32, i32
  }
  func.func @transform_10(%arg0: i32) -> (i32, i32) {
    %c0_i32 = arith.constant 0 : i32
    %c0_i32_0 = arith.constant 0 : i32
    %c0_i32_1 = arith.constant 0 : i32
    return %c0_i32, %c0_i32_0 : i32, i32
  }
  func.func @transform_11(%arg0: i32) -> (i32, i32) {
    %c0_i32 = arith.constant 0 : i32
    %c0_i32_0 = arith.constant 0 : i32
    %c0_i32_1 = arith.constant 0 : i32
    return %c0_i32, %c0_i32_0 : i32, i32
  }
  func.func @transform_12(%arg0: i32) -> (i32, i32) {
    %c0_i32 = arith.constant 0 : i32
    %c0_i32_0 = arith.constant 0 : i32
    %c0_i32_1 = arith.constant 0 : i32
    return %c0_i32, %c0_i32_0 : i32, i32
  }
  func.func @transform_13(%arg0: i32) -> (i32, i32, i32) {
    %c0_i32 = arith.constant 0 : i32
    %c0_i32_0 = arith.constant 0 : i32
    %c0_i32_1 = arith.constant 0 : i32
    return %arg0, %c0_i32, %c0_i32_0 : i32, i32, i32
  }
}

module attributes {stable_mosaic.version = 11 : i64} {
  func.func @_llama_layer_kernel(%arg0: i32, %arg1: memref<1x8x128xf32, #tpu.memory_space<vmem>>, %arg2: memref<1x128xf32, #tpu.memory_space<vmem>>, %arg3: memref<128x384xbf16, #tpu.memory_space<vmem>>, %arg4: memref<128x128xbf16, #tpu.memory_space<vmem>>, %arg5: memref<1x8x16xf32, #tpu.memory_space<vmem>>, %arg6: memref<1x8x16xf32, #tpu.memory_space<vmem>>, %arg7: memref<1x128xf32, #tpu.memory_space<vmem>>, %arg8: memref<128x512xbf16, #tpu.memory_space<vmem>>, %arg9: memref<256x128xbf16, #tpu.memory_space<vmem>>, %arg10: memref<1x8x128xf32, #tpu.memory_space<vmem>>) attributes {dimension_semantics = [#tpu.dimension_semantics<parallel>], iteration_bounds = array<i64: 2>, scalar_prefetch = 0 : i64, scratch_operands = 0 : i64, tpu.core_type = #tpu.core_type<tc>, window_params = [{transform_indices = @transform_0, window_bounds = array<i64: 1, 8, 128>}, {pipeline_mode = #tpu.pipeline_mode<synchronous>, transform_indices = @transform_1, window_bounds = array<i64: 1, 128>}, {pipeline_mode = #tpu.pipeline_mode<synchronous>, transform_indices = @transform_2, window_bounds = array<i64: 128, 384>}, {pipeline_mode = #tpu.pipeline_mode<synchronous>, transform_indices = @transform_3, window_bounds = array<i64: 128, 128>}, {transform_indices = @transform_4, window_bounds = array<i64: 1, 8, 16>}, {transform_indices = @transform_5, window_bounds = array<i64: 1, 8, 16>}, {pipeline_mode = #tpu.pipeline_mode<synchronous>, transform_indices = @transform_6, window_bounds = array<i64: 1, 128>}, {pipeline_mode = #tpu.pipeline_mode<synchronous>, transform_indices = @transform_7, window_bounds = array<i64: 128, 512>}, {pipeline_mode = #tpu.pipeline_mode<synchronous>, transform_indices = @transform_8, window_bounds = array<i64: 256, 128>}, {transform_indices = @transform_9, window_bounds = array<i64: 1, 8, 128>}]} {
    %c0 = arith.constant 0 : index
    %c0_0 = arith.constant 0 : index
    %c0_1 = arith.constant 0 : index
    %0 = vector.load %arg1[%c0, %c0_0, %c0_1] : memref<1x8x128xf32, #tpu.memory_space<vmem>>, vector<1x8x128xf32>
    %1 = vector.shape_cast %0 : vector<1x8x128xf32> to vector<8x128xf32>
    %2 = arith.mulf %1, %1 : vector<8x128xf32>
    %cst = arith.constant dense<0.000000e+00> : vector<8xf32>
    %3 = vector.multi_reduction <add>, %2, %cst [1] : vector<8x128xf32> to vector<8xf32>
    %4 = vector.shape_cast %3 : vector<8xf32> to vector<8x1xf32>
    %cst_2 = arith.constant 1.280000e+02 : f32
    %5 = vector.broadcast %cst_2 : f32 to vector<8x1xf32>
    %6 = arith.divf %4, %5 : vector<8x1xf32>
    %cst_3 = arith.constant 9.99999997E-7 : f32
    %7 = vector.broadcast %cst_3 : f32 to vector<8x1xf32>
    %8 = arith.addf %6, %7 : vector<8x1xf32>
    %9 = math.rsqrt %8 : vector<8x1xf32>
    %10 = vector.broadcast %9 : vector<8x1xf32> to vector<8x128xf32>
    %11 = arith.mulf %1, %10 : vector<8x128xf32>
    %c0_4 = arith.constant 0 : index
    %c0_5 = arith.constant 0 : index
    %12 = vector.load %arg2[%c0_4, %c0_5] : memref<1x128xf32, #tpu.memory_space<vmem>>, vector<1x128xf32>
    %13 = vector.broadcast %12 : vector<1x128xf32> to vector<8x128xf32>
    %14 = arith.mulf %11, %13 : vector<8x128xf32>
    %15 = arith.truncf %14 : vector<8x128xf32> to vector<8x128xbf16>
    %c0_6 = arith.constant 0 : index
    %c0_7 = arith.constant 0 : index
    %16 = vector.load %arg3[%c0_6, %c0_7] : memref<128x384xbf16, #tpu.memory_space<vmem>>, vector<128x384xbf16>
    %cst_8 = arith.constant dense<0.000000e+00> : vector<8x384xf32>
    %17 = tpu.matmul %15, %16, %cst_8 {dimension_numbers = #tpu.dot_dimension_numbers<[1], [0], [0], [1], [0, 0, 1, 1], [], []>} : vector<8x128xbf16>, vector<128x384xbf16>, vector<8x384xf32> -> vector<8x384xf32>
    %18 = vector.extract_strided_slice %17 {offsets = [0, 0], sizes = [8, 128], strides = [1, 1]} : vector<8x384xf32> to vector<8x128xf32>
    %19 = vector.extract_strided_slice %17 {offsets = [0, 128], sizes = [8, 128], strides = [1, 1]} : vector<8x384xf32> to vector<8x128xf32>
    %20 = vector.extract_strided_slice %17 {offsets = [0, 256], sizes = [8, 128], strides = [1, 1]} : vector<8x384xf32> to vector<8x128xf32>
    %c0_9 = arith.constant 0 : index
    %c0_10 = arith.constant 0 : index
    %c0_11 = arith.constant 0 : index
    %21 = vector.load %arg5[%c0_9, %c0_10, %c0_11] : memref<1x8x16xf32, #tpu.memory_space<vmem>>, vector<1x8x16xf32>
    %22 = vector.shape_cast %21 : vector<1x8x16xf32> to vector<8x16xf32>
    %c0_12 = arith.constant 0 : index
    %c0_13 = arith.constant 0 : index
    %c0_14 = arith.constant 0 : index
    %23 = vector.load %arg6[%c0_12, %c0_13, %c0_14] : memref<1x8x16xf32, #tpu.memory_space<vmem>>, vector<1x8x16xf32>
    %24 = vector.shape_cast %23 : vector<1x8x16xf32> to vector<8x16xf32>
    %25 = tpu.iota {dimensions = array<i32: 0>} : vector<8x8xi32>
    %26 = tpu.iota {dimensions = array<i32: 1>} : vector<8x8xi32>
    %27 = arith.cmpi sle, %26, %25 : vector<8x8xi32>
    %c0_15 = arith.constant 0 : index
    %c0_16 = arith.constant 0 : index
    %28 = vector.load %arg4[%c0_15, %c0_16] : memref<128x128xbf16, #tpu.memory_space<vmem>>, vector<128x128xbf16>
    %cst_17 = arith.constant 0.000000e+00 : f32
    %29 = vector.broadcast %cst_17 : f32 to vector<8x128xf32>
    %30 = vector.extract_strided_slice %18 {offsets = [0, 0], sizes = [8, 32], strides = [1, 1]} : vector<8x128xf32> to vector<8x32xf32>
    %31 = vector.extract_strided_slice %19 {offsets = [0, 0], sizes = [8, 32], strides = [1, 1]} : vector<8x128xf32> to vector<8x32xf32>
    %32 = vector.extract_strided_slice %20 {offsets = [0, 0], sizes = [8, 32], strides = [1, 1]} : vector<8x128xf32> to vector<8x32xf32>
    %33 = vector.extract_strided_slice %30 {offsets = [0, 0], sizes = [8, 16], strides = [1, 1]} : vector<8x32xf32> to vector<8x16xf32>
    %34 = vector.extract_strided_slice %30 {offsets = [0, 16], sizes = [8, 16], strides = [1, 1]} : vector<8x32xf32> to vector<8x16xf32>
    %35 = vector.extract_strided_slice %31 {offsets = [0, 0], sizes = [8, 16], strides = [1, 1]} : vector<8x32xf32> to vector<8x16xf32>
    %36 = vector.extract_strided_slice %31 {offsets = [0, 16], sizes = [8, 16], strides = [1, 1]} : vector<8x32xf32> to vector<8x16xf32>
    %37 = arith.mulf %33, %22 : vector<8x16xf32>
    %38 = arith.mulf %34, %24 : vector<8x16xf32>
    %39 = arith.subf %37, %38 : vector<8x16xf32>
    %cst_18 = arith.constant 0.176776692 : f32
    %40 = vector.broadcast %cst_18 : f32 to vector<8x16xf32>
    %41 = arith.mulf %39, %40 : vector<8x16xf32>
    %42 = arith.truncf %41 : vector<8x16xf32> to vector<8x16xbf16>
    %43 = arith.mulf %34, %22 : vector<8x16xf32>
    %44 = arith.mulf %33, %24 : vector<8x16xf32>
    %45 = arith.addf %43, %44 : vector<8x16xf32>
    %cst_19 = arith.constant 0.176776692 : f32
    %46 = vector.broadcast %cst_19 : f32 to vector<8x16xf32>
    %47 = arith.mulf %45, %46 : vector<8x16xf32>
    %48 = arith.truncf %47 : vector<8x16xf32> to vector<8x16xbf16>
    %49 = arith.mulf %35, %22 : vector<8x16xf32>
    %50 = arith.mulf %36, %24 : vector<8x16xf32>
    %51 = arith.subf %49, %50 : vector<8x16xf32>
    %52 = arith.truncf %51 : vector<8x16xf32> to vector<8x16xbf16>
    %53 = arith.mulf %36, %22 : vector<8x16xf32>
    %54 = arith.mulf %35, %24 : vector<8x16xf32>
    %55 = arith.addf %53, %54 : vector<8x16xf32>
    %56 = arith.truncf %55 : vector<8x16xf32> to vector<8x16xbf16>
    %cst_20 = arith.constant dense<0.000000e+00> : vector<8x8xf32>
    %57 = tpu.matmul %42, %52, %cst_20 {dimension_numbers = #tpu.dot_dimension_numbers<[1], [1], [0], [0], [0, 0, 1, 0], [], []>} : vector<8x16xbf16>, vector<8x16xbf16>, vector<8x8xf32> -> vector<8x8xf32>
    %cst_21 = arith.constant dense<0.000000e+00> : vector<8x8xf32>
    %58 = tpu.matmul %48, %56, %cst_21 {dimension_numbers = #tpu.dot_dimension_numbers<[1], [1], [0], [0], [0, 0, 1, 0], [], []>} : vector<8x16xbf16>, vector<8x16xbf16>, vector<8x8xf32> -> vector<8x8xf32>
    %59 = arith.addf %57, %58 : vector<8x8xf32>
    %cst_22 = arith.constant -1.000000e+30 : f32
    %60 = vector.broadcast %cst_22 : f32 to vector<8x8xf32>
    %61 = arith.select %27, %59, %60 : vector<8x8xi1>, vector<8x8xf32>
    %cst_23 = arith.constant dense<0xFF800000> : vector<8xf32>
    %62 = vector.multi_reduction <maximumf>, %61, %cst_23 [1] : vector<8x8xf32> to vector<8xf32>
    %63 = vector.shape_cast %62 : vector<8xf32> to vector<8x1xf32>
    %64 = vector.broadcast %63 : vector<8x1xf32> to vector<8x8xf32>
    %65 = arith.subf %61, %64 : vector<8x8xf32>
    %66 = math.exp %65 : vector<8x8xf32>
    %cst_24 = arith.constant dense<0.000000e+00> : vector<8xf32>
    %67 = vector.multi_reduction <add>, %66, %cst_24 [1] : vector<8x8xf32> to vector<8xf32>
    %68 = vector.shape_cast %67 : vector<8xf32> to vector<8x1xf32>
    %69 = tpu.reciprocal %68 {approx = true} : vector<8x1xf32> -> vector<8x1xf32>
    %70 = vector.broadcast %69 : vector<8x1xf32> to vector<8x8xf32>
    %71 = arith.mulf %66, %70 : vector<8x8xf32>
    %72 = arith.truncf %71 : vector<8x8xf32> to vector<8x8xbf16>
    %73 = arith.truncf %32 : vector<8x32xf32> to vector<8x32xbf16>
    %cst_25 = arith.constant dense<0.000000e+00> : vector<8x32xf32>
    %74 = tpu.matmul %72, %73, %cst_25 {dimension_numbers = #tpu.dot_dimension_numbers<[1], [0], [0], [1], [0, 0, 1, 1], [], []>} : vector<8x8xbf16>, vector<8x32xbf16>, vector<8x32xf32> -> vector<8x32xf32>
    %75 = arith.truncf %74 : vector<8x32xf32> to vector<8x32xbf16>
    %76 = vector.extract_strided_slice %28 {offsets = [0, 0], sizes = [32, 128], strides = [1, 1]} : vector<128x128xbf16> to vector<32x128xbf16>
    %cst_26 = arith.constant dense<0.000000e+00> : vector<8x128xf32>
    %77 = tpu.matmul %75, %76, %cst_26 {dimension_numbers = #tpu.dot_dimension_numbers<[1], [0], [0], [1], [0, 0, 1, 1], [], []>} : vector<8x32xbf16>, vector<32x128xbf16>, vector<8x128xf32> -> vector<8x128xf32>
    %78 = arith.addf %29, %77 : vector<8x128xf32>
    %79 = vector.extract_strided_slice %18 {offsets = [0, 32], sizes = [8, 32], strides = [1, 1]} : vector<8x128xf32> to vector<8x32xf32>
    %80 = vector.extract_strided_slice %19 {offsets = [0, 32], sizes = [8, 32], strides = [1, 1]} : vector<8x128xf32> to vector<8x32xf32>
    %81 = vector.extract_strided_slice %20 {offsets = [0, 32], sizes = [8, 32], strides = [1, 1]} : vector<8x128xf32> to vector<8x32xf32>
    %82 = vector.extract_strided_slice %79 {offsets = [0, 0], sizes = [8, 16], strides = [1, 1]} : vector<8x32xf32> to vector<8x16xf32>
    %83 = vector.extract_strided_slice %79 {offsets = [0, 16], sizes = [8, 16], strides = [1, 1]} : vector<8x32xf32> to vector<8x16xf32>
    %84 = vector.extract_strided_slice %80 {offsets = [0, 0], sizes = [8, 16], strides = [1, 1]} : vector<8x32xf32> to vector<8x16xf32>
    %85 = vector.extract_strided_slice %80 {offsets = [0, 16], sizes = [8, 16], strides = [1, 1]} : vector<8x32xf32> to vector<8x16xf32>
    %86 = arith.mulf %82, %22 : vector<8x16xf32>
    %87 = arith.mulf %83, %24 : vector<8x16xf32>
    %88 = arith.subf %86, %87 : vector<8x16xf32>
    %cst_27 = arith.constant 0.176776692 : f32
    %89 = vector.broadcast %cst_27 : f32 to vector<8x16xf32>
    %90 = arith.mulf %88, %89 : vector<8x16xf32>
    %91 = arith.truncf %90 : vector<8x16xf32> to vector<8x16xbf16>
    %92 = arith.mulf %83, %22 : vector<8x16xf32>
    %93 = arith.mulf %82, %24 : vector<8x16xf32>
    %94 = arith.addf %92, %93 : vector<8x16xf32>
    %cst_28 = arith.constant 0.176776692 : f32
    %95 = vector.broadcast %cst_28 : f32 to vector<8x16xf32>
    %96 = arith.mulf %94, %95 : vector<8x16xf32>
    %97 = arith.truncf %96 : vector<8x16xf32> to vector<8x16xbf16>
    %98 = arith.mulf %84, %22 : vector<8x16xf32>
    %99 = arith.mulf %85, %24 : vector<8x16xf32>
    %100 = arith.subf %98, %99 : vector<8x16xf32>
    %101 = arith.truncf %100 : vector<8x16xf32> to vector<8x16xbf16>
    %102 = arith.mulf %85, %22 : vector<8x16xf32>
    %103 = arith.mulf %84, %24 : vector<8x16xf32>
    %104 = arith.addf %102, %103 : vector<8x16xf32>
    %105 = arith.truncf %104 : vector<8x16xf32> to vector<8x16xbf16>
    %cst_29 = arith.constant dense<0.000000e+00> : vector<8x8xf32>
    %106 = tpu.matmul %91, %101, %cst_29 {dimension_numbers = #tpu.dot_dimension_numbers<[1], [1], [0], [0], [0, 0, 1, 0], [], []>} : vector<8x16xbf16>, vector<8x16xbf16>, vector<8x8xf32> -> vector<8x8xf32>
    %cst_30 = arith.constant dense<0.000000e+00> : vector<8x8xf32>
    %107 = tpu.matmul %97, %105, %cst_30 {dimension_numbers = #tpu.dot_dimension_numbers<[1], [1], [0], [0], [0, 0, 1, 0], [], []>} : vector<8x16xbf16>, vector<8x16xbf16>, vector<8x8xf32> -> vector<8x8xf32>
    %108 = arith.addf %106, %107 : vector<8x8xf32>
    %cst_31 = arith.constant -1.000000e+30 : f32
    %109 = vector.broadcast %cst_31 : f32 to vector<8x8xf32>
    %110 = arith.select %27, %108, %109 : vector<8x8xi1>, vector<8x8xf32>
    %cst_32 = arith.constant dense<0xFF800000> : vector<8xf32>
    %111 = vector.multi_reduction <maximumf>, %110, %cst_32 [1] : vector<8x8xf32> to vector<8xf32>
    %112 = vector.shape_cast %111 : vector<8xf32> to vector<8x1xf32>
    %113 = vector.broadcast %112 : vector<8x1xf32> to vector<8x8xf32>
    %114 = arith.subf %110, %113 : vector<8x8xf32>
    %115 = math.exp %114 : vector<8x8xf32>
    %cst_33 = arith.constant dense<0.000000e+00> : vector<8xf32>
    %116 = vector.multi_reduction <add>, %115, %cst_33 [1] : vector<8x8xf32> to vector<8xf32>
    %117 = vector.shape_cast %116 : vector<8xf32> to vector<8x1xf32>
    %118 = tpu.reciprocal %117 {approx = true} : vector<8x1xf32> -> vector<8x1xf32>
    %119 = vector.broadcast %118 : vector<8x1xf32> to vector<8x8xf32>
    %120 = arith.mulf %115, %119 : vector<8x8xf32>
    %121 = arith.truncf %120 : vector<8x8xf32> to vector<8x8xbf16>
    %122 = arith.truncf %81 : vector<8x32xf32> to vector<8x32xbf16>
    %cst_34 = arith.constant dense<0.000000e+00> : vector<8x32xf32>
    %123 = tpu.matmul %121, %122, %cst_34 {dimension_numbers = #tpu.dot_dimension_numbers<[1], [0], [0], [1], [0, 0, 1, 1], [], []>} : vector<8x8xbf16>, vector<8x32xbf16>, vector<8x32xf32> -> vector<8x32xf32>
    %124 = arith.truncf %123 : vector<8x32xf32> to vector<8x32xbf16>
    %125 = vector.extract_strided_slice %28 {offsets = [32, 0], sizes = [32, 128], strides = [1, 1]} : vector<128x128xbf16> to vector<32x128xbf16>
    %cst_35 = arith.constant dense<0.000000e+00> : vector<8x128xf32>
    %126 = tpu.matmul %124, %125, %cst_35 {dimension_numbers = #tpu.dot_dimension_numbers<[1], [0], [0], [1], [0, 0, 1, 1], [], []>} : vector<8x32xbf16>, vector<32x128xbf16>, vector<8x128xf32> -> vector<8x128xf32>
    %127 = arith.addf %78, %126 : vector<8x128xf32>
    %128 = vector.extract_strided_slice %18 {offsets = [0, 64], sizes = [8, 32], strides = [1, 1]} : vector<8x128xf32> to vector<8x32xf32>
    %129 = vector.extract_strided_slice %19 {offsets = [0, 64], sizes = [8, 32], strides = [1, 1]} : vector<8x128xf32> to vector<8x32xf32>
    %130 = vector.extract_strided_slice %20 {offsets = [0, 64], sizes = [8, 32], strides = [1, 1]} : vector<8x128xf32> to vector<8x32xf32>
    %131 = vector.extract_strided_slice %128 {offsets = [0, 0], sizes = [8, 16], strides = [1, 1]} : vector<8x32xf32> to vector<8x16xf32>
    %132 = vector.extract_strided_slice %128 {offsets = [0, 16], sizes = [8, 16], strides = [1, 1]} : vector<8x32xf32> to vector<8x16xf32>
    %133 = vector.extract_strided_slice %129 {offsets = [0, 0], sizes = [8, 16], strides = [1, 1]} : vector<8x32xf32> to vector<8x16xf32>
    %134 = vector.extract_strided_slice %129 {offsets = [0, 16], sizes = [8, 16], strides = [1, 1]} : vector<8x32xf32> to vector<8x16xf32>
    %135 = arith.mulf %131, %22 : vector<8x16xf32>
    %136 = arith.mulf %132, %24 : vector<8x16xf32>
    %137 = arith.subf %135, %136 : vector<8x16xf32>
    %cst_36 = arith.constant 0.176776692 : f32
    %138 = vector.broadcast %cst_36 : f32 to vector<8x16xf32>
    %139 = arith.mulf %137, %138 : vector<8x16xf32>
    %140 = arith.truncf %139 : vector<8x16xf32> to vector<8x16xbf16>
    %141 = arith.mulf %132, %22 : vector<8x16xf32>
    %142 = arith.mulf %131, %24 : vector<8x16xf32>
    %143 = arith.addf %141, %142 : vector<8x16xf32>
    %cst_37 = arith.constant 0.176776692 : f32
    %144 = vector.broadcast %cst_37 : f32 to vector<8x16xf32>
    %145 = arith.mulf %143, %144 : vector<8x16xf32>
    %146 = arith.truncf %145 : vector<8x16xf32> to vector<8x16xbf16>
    %147 = arith.mulf %133, %22 : vector<8x16xf32>
    %148 = arith.mulf %134, %24 : vector<8x16xf32>
    %149 = arith.subf %147, %148 : vector<8x16xf32>
    %150 = arith.truncf %149 : vector<8x16xf32> to vector<8x16xbf16>
    %151 = arith.mulf %134, %22 : vector<8x16xf32>
    %152 = arith.mulf %133, %24 : vector<8x16xf32>
    %153 = arith.addf %151, %152 : vector<8x16xf32>
    %154 = arith.truncf %153 : vector<8x16xf32> to vector<8x16xbf16>
    %cst_38 = arith.constant dense<0.000000e+00> : vector<8x8xf32>
    %155 = tpu.matmul %140, %150, %cst_38 {dimension_numbers = #tpu.dot_dimension_numbers<[1], [1], [0], [0], [0, 0, 1, 0], [], []>} : vector<8x16xbf16>, vector<8x16xbf16>, vector<8x8xf32> -> vector<8x8xf32>
    %cst_39 = arith.constant dense<0.000000e+00> : vector<8x8xf32>
    %156 = tpu.matmul %146, %154, %cst_39 {dimension_numbers = #tpu.dot_dimension_numbers<[1], [1], [0], [0], [0, 0, 1, 0], [], []>} : vector<8x16xbf16>, vector<8x16xbf16>, vector<8x8xf32> -> vector<8x8xf32>
    %157 = arith.addf %155, %156 : vector<8x8xf32>
    %cst_40 = arith.constant -1.000000e+30 : f32
    %158 = vector.broadcast %cst_40 : f32 to vector<8x8xf32>
    %159 = arith.select %27, %157, %158 : vector<8x8xi1>, vector<8x8xf32>
    %cst_41 = arith.constant dense<0xFF800000> : vector<8xf32>
    %160 = vector.multi_reduction <maximumf>, %159, %cst_41 [1] : vector<8x8xf32> to vector<8xf32>
    %161 = vector.shape_cast %160 : vector<8xf32> to vector<8x1xf32>
    %162 = vector.broadcast %161 : vector<8x1xf32> to vector<8x8xf32>
    %163 = arith.subf %159, %162 : vector<8x8xf32>
    %164 = math.exp %163 : vector<8x8xf32>
    %cst_42 = arith.constant dense<0.000000e+00> : vector<8xf32>
    %165 = vector.multi_reduction <add>, %164, %cst_42 [1] : vector<8x8xf32> to vector<8xf32>
    %166 = vector.shape_cast %165 : vector<8xf32> to vector<8x1xf32>
    %167 = tpu.reciprocal %166 {approx = true} : vector<8x1xf32> -> vector<8x1xf32>
    %168 = vector.broadcast %167 : vector<8x1xf32> to vector<8x8xf32>
    %169 = arith.mulf %164, %168 : vector<8x8xf32>
    %170 = arith.truncf %169 : vector<8x8xf32> to vector<8x8xbf16>
    %171 = arith.truncf %130 : vector<8x32xf32> to vector<8x32xbf16>
    %cst_43 = arith.constant dense<0.000000e+00> : vector<8x32xf32>
    %172 = tpu.matmul %170, %171, %cst_43 {dimension_numbers = #tpu.dot_dimension_numbers<[1], [0], [0], [1], [0, 0, 1, 1], [], []>} : vector<8x8xbf16>, vector<8x32xbf16>, vector<8x32xf32> -> vector<8x32xf32>
    %173 = arith.truncf %172 : vector<8x32xf32> to vector<8x32xbf16>
    %174 = vector.extract_strided_slice %28 {offsets = [64, 0], sizes = [32, 128], strides = [1, 1]} : vector<128x128xbf16> to vector<32x128xbf16>
    %cst_44 = arith.constant dense<0.000000e+00> : vector<8x128xf32>
    %175 = tpu.matmul %173, %174, %cst_44 {dimension_numbers = #tpu.dot_dimension_numbers<[1], [0], [0], [1], [0, 0, 1, 1], [], []>} : vector<8x32xbf16>, vector<32x128xbf16>, vector<8x128xf32> -> vector<8x128xf32>
    %176 = arith.addf %127, %175 : vector<8x128xf32>
    %177 = vector.extract_strided_slice %18 {offsets = [0, 96], sizes = [8, 32], strides = [1, 1]} : vector<8x128xf32> to vector<8x32xf32>
    %178 = vector.extract_strided_slice %19 {offsets = [0, 96], sizes = [8, 32], strides = [1, 1]} : vector<8x128xf32> to vector<8x32xf32>
    %179 = vector.extract_strided_slice %20 {offsets = [0, 96], sizes = [8, 32], strides = [1, 1]} : vector<8x128xf32> to vector<8x32xf32>
    %180 = vector.extract_strided_slice %177 {offsets = [0, 0], sizes = [8, 16], strides = [1, 1]} : vector<8x32xf32> to vector<8x16xf32>
    %181 = vector.extract_strided_slice %177 {offsets = [0, 16], sizes = [8, 16], strides = [1, 1]} : vector<8x32xf32> to vector<8x16xf32>
    %182 = vector.extract_strided_slice %178 {offsets = [0, 0], sizes = [8, 16], strides = [1, 1]} : vector<8x32xf32> to vector<8x16xf32>
    %183 = vector.extract_strided_slice %178 {offsets = [0, 16], sizes = [8, 16], strides = [1, 1]} : vector<8x32xf32> to vector<8x16xf32>
    %184 = arith.mulf %180, %22 : vector<8x16xf32>
    %185 = arith.mulf %181, %24 : vector<8x16xf32>
    %186 = arith.subf %184, %185 : vector<8x16xf32>
    %cst_45 = arith.constant 0.176776692 : f32
    %187 = vector.broadcast %cst_45 : f32 to vector<8x16xf32>
    %188 = arith.mulf %186, %187 : vector<8x16xf32>
    %189 = arith.truncf %188 : vector<8x16xf32> to vector<8x16xbf16>
    %190 = arith.mulf %181, %22 : vector<8x16xf32>
    %191 = arith.mulf %180, %24 : vector<8x16xf32>
    %192 = arith.addf %190, %191 : vector<8x16xf32>
    %cst_46 = arith.constant 0.176776692 : f32
    %193 = vector.broadcast %cst_46 : f32 to vector<8x16xf32>
    %194 = arith.mulf %192, %193 : vector<8x16xf32>
    %195 = arith.truncf %194 : vector<8x16xf32> to vector<8x16xbf16>
    %196 = arith.mulf %182, %22 : vector<8x16xf32>
    %197 = arith.mulf %183, %24 : vector<8x16xf32>
    %198 = arith.subf %196, %197 : vector<8x16xf32>
    %199 = arith.truncf %198 : vector<8x16xf32> to vector<8x16xbf16>
    %200 = arith.mulf %183, %22 : vector<8x16xf32>
    %201 = arith.mulf %182, %24 : vector<8x16xf32>
    %202 = arith.addf %200, %201 : vector<8x16xf32>
    %203 = arith.truncf %202 : vector<8x16xf32> to vector<8x16xbf16>
    %cst_47 = arith.constant dense<0.000000e+00> : vector<8x8xf32>
    %204 = tpu.matmul %189, %199, %cst_47 {dimension_numbers = #tpu.dot_dimension_numbers<[1], [1], [0], [0], [0, 0, 1, 0], [], []>} : vector<8x16xbf16>, vector<8x16xbf16>, vector<8x8xf32> -> vector<8x8xf32>
    %cst_48 = arith.constant dense<0.000000e+00> : vector<8x8xf32>
    %205 = tpu.matmul %195, %203, %cst_48 {dimension_numbers = #tpu.dot_dimension_numbers<[1], [1], [0], [0], [0, 0, 1, 0], [], []>} : vector<8x16xbf16>, vector<8x16xbf16>, vector<8x8xf32> -> vector<8x8xf32>
    %206 = arith.addf %204, %205 : vector<8x8xf32>
    %cst_49 = arith.constant -1.000000e+30 : f32
    %207 = vector.broadcast %cst_49 : f32 to vector<8x8xf32>
    %208 = arith.select %27, %206, %207 : vector<8x8xi1>, vector<8x8xf32>
    %cst_50 = arith.constant dense<0xFF800000> : vector<8xf32>
    %209 = vector.multi_reduction <maximumf>, %208, %cst_50 [1] : vector<8x8xf32> to vector<8xf32>
    %210 = vector.shape_cast %209 : vector<8xf32> to vector<8x1xf32>
    %211 = vector.broadcast %210 : vector<8x1xf32> to vector<8x8xf32>
    %212 = arith.subf %208, %211 : vector<8x8xf32>
    %213 = math.exp %212 : vector<8x8xf32>
    %cst_51 = arith.constant dense<0.000000e+00> : vector<8xf32>
    %214 = vector.multi_reduction <add>, %213, %cst_51 [1] : vector<8x8xf32> to vector<8xf32>
    %215 = vector.shape_cast %214 : vector<8xf32> to vector<8x1xf32>
    %216 = tpu.reciprocal %215 {approx = true} : vector<8x1xf32> -> vector<8x1xf32>
    %217 = vector.broadcast %216 : vector<8x1xf32> to vector<8x8xf32>
    %218 = arith.mulf %213, %217 : vector<8x8xf32>
    %219 = arith.truncf %218 : vector<8x8xf32> to vector<8x8xbf16>
    %220 = arith.truncf %179 : vector<8x32xf32> to vector<8x32xbf16>
    %cst_52 = arith.constant dense<0.000000e+00> : vector<8x32xf32>
    %221 = tpu.matmul %219, %220, %cst_52 {dimension_numbers = #tpu.dot_dimension_numbers<[1], [0], [0], [1], [0, 0, 1, 1], [], []>} : vector<8x8xbf16>, vector<8x32xbf16>, vector<8x32xf32> -> vector<8x32xf32>
    %222 = arith.truncf %221 : vector<8x32xf32> to vector<8x32xbf16>
    %223 = vector.extract_strided_slice %28 {offsets = [96, 0], sizes = [32, 128], strides = [1, 1]} : vector<128x128xbf16> to vector<32x128xbf16>
    %cst_53 = arith.constant dense<0.000000e+00> : vector<8x128xf32>
    %224 = tpu.matmul %222, %223, %cst_53 {dimension_numbers = #tpu.dot_dimension_numbers<[1], [0], [0], [1], [0, 0, 1, 1], [], []>} : vector<8x32xbf16>, vector<32x128xbf16>, vector<8x128xf32> -> vector<8x128xf32>
    %225 = arith.addf %176, %224 : vector<8x128xf32>
    %226 = arith.addf %1, %225 : vector<8x128xf32>
    %227 = arith.mulf %226, %226 : vector<8x128xf32>
    %cst_54 = arith.constant dense<0.000000e+00> : vector<8xf32>
    %228 = vector.multi_reduction <add>, %227, %cst_54 [1] : vector<8x128xf32> to vector<8xf32>
    %229 = vector.shape_cast %228 : vector<8xf32> to vector<8x1xf32>
    %cst_55 = arith.constant 1.280000e+02 : f32
    %230 = vector.broadcast %cst_55 : f32 to vector<8x1xf32>
    %231 = arith.divf %229, %230 : vector<8x1xf32>
    %cst_56 = arith.constant 9.99999997E-7 : f32
    %232 = vector.broadcast %cst_56 : f32 to vector<8x1xf32>
    %233 = arith.addf %231, %232 : vector<8x1xf32>
    %234 = math.rsqrt %233 : vector<8x1xf32>
    %235 = vector.broadcast %234 : vector<8x1xf32> to vector<8x128xf32>
    %236 = arith.mulf %226, %235 : vector<8x128xf32>
    %c0_57 = arith.constant 0 : index
    %c0_58 = arith.constant 0 : index
    %237 = vector.load %arg7[%c0_57, %c0_58] : memref<1x128xf32, #tpu.memory_space<vmem>>, vector<1x128xf32>
    %238 = vector.broadcast %237 : vector<1x128xf32> to vector<8x128xf32>
    %239 = arith.mulf %236, %238 : vector<8x128xf32>
    %240 = arith.truncf %239 : vector<8x128xf32> to vector<8x128xbf16>
    %c0_59 = arith.constant 0 : index
    %c0_60 = arith.constant 0 : index
    %241 = vector.load %arg8[%c0_59, %c0_60] : memref<128x512xbf16, #tpu.memory_space<vmem>>, vector<128x512xbf16>
    %cst_61 = arith.constant dense<0.000000e+00> : vector<8x512xf32>
    %242 = tpu.matmul %240, %241, %cst_61 {dimension_numbers = #tpu.dot_dimension_numbers<[1], [0], [0], [1], [0, 0, 1, 1], [], []>} : vector<8x128xbf16>, vector<128x512xbf16>, vector<8x512xf32> -> vector<8x512xf32>
    %243 = vector.extract_strided_slice %242 {offsets = [0, 0], sizes = [8, 256], strides = [1, 1]} : vector<8x512xf32> to vector<8x256xf32>
    %244 = vector.extract_strided_slice %242 {offsets = [0, 256], sizes = [8, 256], strides = [1, 1]} : vector<8x512xf32> to vector<8x256xf32>
    %245 = arith.negf %243 : vector<8x256xf32>
    %246 = math.exp %245 : vector<8x256xf32>
    %cst_62 = arith.constant 1.000000e+00 : f32
    %247 = vector.broadcast %cst_62 : f32 to vector<8x256xf32>
    %248 = arith.addf %247, %246 : vector<8x256xf32>
    %249 = arith.divf %247, %248 : vector<8x256xf32>
    %250 = arith.mulf %243, %249 : vector<8x256xf32>
    %251 = arith.mulf %250, %244 : vector<8x256xf32>
    %252 = arith.truncf %251 : vector<8x256xf32> to vector<8x256xbf16>
    %c0_63 = arith.constant 0 : index
    %c0_64 = arith.constant 0 : index
    %253 = vector.load %arg9[%c0_63, %c0_64] : memref<256x128xbf16, #tpu.memory_space<vmem>>, vector<256x128xbf16>
    %cst_65 = arith.constant dense<0.000000e+00> : vector<8x128xf32>
    %254 = tpu.matmul %252, %253, %cst_65 {dimension_numbers = #tpu.dot_dimension_numbers<[1], [0], [0], [1], [0, 0, 1, 1], [], []>} : vector<8x256xbf16>, vector<256x128xbf16>, vector<8x128xf32> -> vector<8x128xf32>
    %255 = arith.addf %226, %254 : vector<8x128xf32>
    %c0_66 = arith.constant 0 : index
    %c0_67 = arith.constant 0 : index
    %c0_68 = arith.constant 0 : index
    %256 = vector.load %arg10[%c0_66, %c0_67, %c0_68] : memref<1x8x128xf32, #tpu.memory_space<vmem>>, vector<1x8x128xf32>
    %257 = vector.shape_cast %256 : vector<1x8x128xf32> to vector<8x128xf32>
    %258 = vector.shape_cast %255 : vector<8x128xf32> to vector<1x8x128xf32>
    tpu.vector_store %arg10[%c0_66, %c0_67, %c0_68], %258 {strides = array<i32>} : memref<1x8x128xf32, #tpu.memory_space<vmem>>, vector<1x8x128xf32>,
    return
  }
  func.func @transform_0(%arg0: i32) -> (i32, i32, i32) {
    %c0_i32 = arith.constant 0 : i32
    %c0_i32_0 = arith.constant 0 : i32
    %c0_i32_1 = arith.constant 0 : i32
    return %arg0, %c0_i32, %c0_i32_0 : i32, i32, i32
  }
  func.func @transform_1(%arg0: i32) -> (i32, i32) {
    %c0_i32 = arith.constant 0 : i32
    %c0_i32_0 = arith.constant 0 : i32
    %c0_i32_1 = arith.constant 0 : i32
    return %c0_i32, %c0_i32_0 : i32, i32
  }
  func.func @transform_2(%arg0: i32) -> (i32, i32) {
    %c0_i32 = arith.constant 0 : i32
    %c0_i32_0 = arith.constant 0 : i32
    %c0_i32_1 = arith.constant 0 : i32
    return %c0_i32, %c0_i32_0 : i32, i32
  }
  func.func @transform_3(%arg0: i32) -> (i32, i32) {
    %c0_i32 = arith.constant 0 : i32
    %c0_i32_0 = arith.constant 0 : i32
    %c0_i32_1 = arith.constant 0 : i32
    return %c0_i32, %c0_i32_0 : i32, i32
  }
  func.func @transform_4(%arg0: i32) -> (i32, i32, i32) {
    %c0_i32 = arith.constant 0 : i32
    %c0_i32_0 = arith.constant 0 : i32
    %c0_i32_1 = arith.constant 0 : i32
    return %arg0, %c0_i32, %c0_i32_0 : i32, i32, i32
  }
  func.func @transform_5(%arg0: i32) -> (i32, i32, i32) {
    %c0_i32 = arith.constant 0 : i32
    %c0_i32_0 = arith.constant 0 : i32
    %c0_i32_1 = arith.constant 0 : i32
    return %arg0, %c0_i32, %c0_i32_0 : i32, i32, i32
  }
  func.func @transform_6(%arg0: i32) -> (i32, i32) {
    %c0_i32 = arith.constant 0 : i32
    %c0_i32_0 = arith.constant 0 : i32
    %c0_i32_1 = arith.constant 0 : i32
    return %c0_i32, %c0_i32_0 : i32, i32
  }
  func.func @transform_7(%arg0: i32) -> (i32, i32) {
    %c0_i32 = arith.constant 0 : i32
    %c0_i32_0 = arith.constant 0 : i32
    %c0_i32_1 = arith.constant 0 : i32
    return %c0_i32, %c0_i32_0 : i32, i32
  }
  func.func @transform_8(%arg0: i32) -> (i32, i32) {
    %c0_i32 = arith.constant 0 : i32
    %c0_i32_0 = arith.constant 0 : i32
    %c0_i32_1 = arith.constant 0 : i32
    return %c0_i32, %c0_i32_0 : i32, i32
  }
  func.func @transform_9(%arg0: i32) -> (i32, i32, i32) {
    %c0_i32 = arith.constant 0 : i32
    %c0_i32_0 = arith.constant 0 : i32
    %c0_i32_1 = arith.constant 0 : i32
    return %arg0, %c0_i32, %c0_i32_0 : i32, i32, i32
  }
}

module attributes {stable_mosaic.version = 11 : i64} {
  func.func @_rmsnorm_kernel(%arg0: i32, %arg1: memref<16x128xf32, #tpu.memory_space<vmem>>, %arg2: memref<1x128xf32, #tpu.memory_space<vmem>>, %arg3: memref<16x128xf32, #tpu.memory_space<vmem>>) attributes {dimension_semantics = [#tpu.dimension_semantics<arbitrary>], iteration_bounds = array<i64: 1>, scalar_prefetch = 0 : i64, scratch_operands = 0 : i64, tpu.core_type = #tpu.core_type<tc>, window_params = [{pipeline_mode = #tpu.pipeline_mode<synchronous>, transform_indices = @transform_0, window_bounds = array<i64: 16, 128>}, {pipeline_mode = #tpu.pipeline_mode<synchronous>, transform_indices = @transform_1, window_bounds = array<i64: 1, 128>}, {pipeline_mode = #tpu.pipeline_mode<synchronous>, transform_indices = @transform_2, window_bounds = array<i64: 16, 128>}]} {
    %c0 = arith.constant 0 : index
    %c0_0 = arith.constant 0 : index
    %0 = vector.load %arg1[%c0, %c0_0] : memref<16x128xf32, #tpu.memory_space<vmem>>, vector<16x128xf32>
    %1 = arith.mulf %0, %0 : vector<16x128xf32>
    %cst = arith.constant dense<0.000000e+00> : vector<16xf32>
    %2 = vector.multi_reduction <add>, %1, %cst [1] : vector<16x128xf32> to vector<16xf32>
    %3 = vector.shape_cast %2 : vector<16xf32> to vector<16x1xf32>
    %cst_1 = arith.constant 1.280000e+02 : f32
    %4 = vector.broadcast %cst_1 : f32 to vector<16x1xf32>
    %5 = arith.divf %3, %4 : vector<16x1xf32>
    %cst_2 = arith.constant 9.99999997E-7 : f32
    %6 = vector.broadcast %cst_2 : f32 to vector<16x1xf32>
    %7 = arith.addf %5, %6 : vector<16x1xf32>
    %8 = math.rsqrt %7 : vector<16x1xf32>
    %9 = vector.broadcast %8 : vector<16x1xf32> to vector<16x128xf32>
    %10 = arith.mulf %0, %9 : vector<16x128xf32>
    %c0_3 = arith.constant 0 : index
    %c0_4 = arith.constant 0 : index
    %11 = vector.load %arg2[%c0_3, %c0_4] : memref<1x128xf32, #tpu.memory_space<vmem>>, vector<1x128xf32>
    %12 = vector.broadcast %11 : vector<1x128xf32> to vector<16x128xf32>
    %13 = arith.mulf %10, %12 : vector<16x128xf32>
    %c0_5 = arith.constant 0 : index
    %c0_6 = arith.constant 0 : index
    %14 = vector.load %arg3[%c0_5, %c0_6] : memref<16x128xf32, #tpu.memory_space<vmem>>, vector<16x128xf32>
    tpu.vector_store %arg3[%c0_5, %c0_6], %13 {strides = array<i32>} : memref<16x128xf32, #tpu.memory_space<vmem>>, vector<16x128xf32>,
    return
  }
  func.func @transform_0(%arg0: i32) -> (i32, i32) {
    %c0_i32 = arith.constant 0 : i32
    %c0_i32_0 = arith.constant 0 : i32
    %c0_i32_1 = arith.constant 0 : i32
    return %c0_i32, %c0_i32_0 : i32, i32
  }
  func.func @transform_1(%arg0: i32) -> (i32, i32) {
    %c0_i32 = arith.constant 0 : i32
    %c0_i32_0 = arith.constant 0 : i32
    %c0_i32_1 = arith.constant 0 : i32
    return %c0_i32, %c0_i32_0 : i32, i32
  }
  func.func @transform_2(%arg0: i32) -> (i32, i32) {
    %c0_i32 = arith.constant 0 : i32
    %c0_i32_0 = arith.constant 0 : i32
    %c0_i32_1 = arith.constant 0 : i32
    return %c0_i32, %c0_i32_0 : i32, i32
  }
}

module attributes {stable_mosaic.version = 11 : i64} {
  func.func @_llama_layer_kernel(%arg0: i32, %arg1: memref<1x8x128xf32, #tpu.memory_space<vmem>>, %arg2: memref<1x128xf32, #tpu.memory_space<vmem>>, %arg3: memref<128x384xbf16, #tpu.memory_space<vmem>>, %arg4: memref<128x128xbf16, #tpu.memory_space<vmem>>, %arg5: memref<1x8x16xf32, #tpu.memory_space<vmem>>, %arg6: memref<1x8x16xf32, #tpu.memory_space<vmem>>, %arg7: memref<1x128xf32, #tpu.memory_space<vmem>>, %arg8: memref<128x512xbf16, #tpu.memory_space<vmem>>, %arg9: memref<256x128xbf16, #tpu.memory_space<vmem>>, %arg10: memref<1x8x128xf32, #tpu.memory_space<vmem>>) attributes {dimension_semantics = [#tpu.dimension_semantics<parallel>], iteration_bounds = array<i64: 2>, scalar_prefetch = 0 : i64, scratch_operands = 0 : i64, tpu.core_type = #tpu.core_type<tc>, window_params = [{transform_indices = @transform_0, window_bounds = array<i64: 1, 8, 128>}, {pipeline_mode = #tpu.pipeline_mode<synchronous>, transform_indices = @transform_1, window_bounds = array<i64: 1, 128>}, {pipeline_mode = #tpu.pipeline_mode<synchronous>, transform_indices = @transform_2, window_bounds = array<i64: 128, 384>}, {pipeline_mode = #tpu.pipeline_mode<synchronous>, transform_indices = @transform_3, window_bounds = array<i64: 128, 128>}, {transform_indices = @transform_4, window_bounds = array<i64: 1, 8, 16>}, {transform_indices = @transform_5, window_bounds = array<i64: 1, 8, 16>}, {pipeline_mode = #tpu.pipeline_mode<synchronous>, transform_indices = @transform_6, window_bounds = array<i64: 1, 128>}, {pipeline_mode = #tpu.pipeline_mode<synchronous>, transform_indices = @transform_7, window_bounds = array<i64: 128, 512>}, {pipeline_mode = #tpu.pipeline_mode<synchronous>, transform_indices = @transform_8, window_bounds = array<i64: 256, 128>}, {transform_indices = @transform_9, window_bounds = array<i64: 1, 8, 128>}]} {
    %c0 = arith.constant 0 : index
    %c0_0 = arith.constant 0 : index
    %c0_1 = arith.constant 0 : index
    %0 = vector.load %arg1[%c0, %c0_0, %c0_1] : memref<1x8x128xf32, #tpu.memory_space<vmem>>, vector<1x8x128xf32>
    %1 = vector.shape_cast %0 : vector<1x8x128xf32> to vector<8x128xf32>
    %2 = arith.mulf %1, %1 : vector<8x128xf32>
    %cst = arith.constant dense<0.000000e+00> : vector<8xf32>
    %3 = vector.multi_reduction <add>, %2, %cst [1] : vector<8x128xf32> to vector<8xf32>
    %4 = vector.shape_cast %3 : vector<8xf32> to vector<8x1xf32>
    %cst_2 = arith.constant 1.280000e+02 : f32
    %5 = vector.broadcast %cst_2 : f32 to vector<8x1xf32>
    %6 = arith.divf %4, %5 : vector<8x1xf32>
    %cst_3 = arith.constant 9.99999997E-7 : f32
    %7 = vector.broadcast %cst_3 : f32 to vector<8x1xf32>
    %8 = arith.addf %6, %7 : vector<8x1xf32>
    %9 = math.rsqrt %8 : vector<8x1xf32>
    %10 = vector.broadcast %9 : vector<8x1xf32> to vector<8x128xf32>
    %11 = arith.mulf %1, %10 : vector<8x128xf32>
    %c0_4 = arith.constant 0 : index
    %c0_5 = arith.constant 0 : index
    %12 = vector.load %arg2[%c0_4, %c0_5] : memref<1x128xf32, #tpu.memory_space<vmem>>, vector<1x128xf32>
    %13 = vector.broadcast %12 : vector<1x128xf32> to vector<8x128xf32>
    %14 = arith.mulf %11, %13 : vector<8x128xf32>
    %15 = arith.truncf %14 : vector<8x128xf32> to vector<8x128xbf16>
    %c0_6 = arith.constant 0 : index
    %c0_7 = arith.constant 0 : index
    %16 = vector.load %arg3[%c0_6, %c0_7] : memref<128x384xbf16, #tpu.memory_space<vmem>>, vector<128x384xbf16>
    %cst_8 = arith.constant dense<0.000000e+00> : vector<8x384xf32>
    %17 = tpu.matmul %15, %16, %cst_8 {dimension_numbers = #tpu.dot_dimension_numbers<[1], [0], [0], [1], [0, 0, 1, 1], [], []>} : vector<8x128xbf16>, vector<128x384xbf16>, vector<8x384xf32> -> vector<8x384xf32>
    %18 = vector.extract_strided_slice %17 {offsets = [0, 0], sizes = [8, 128], strides = [1, 1]} : vector<8x384xf32> to vector<8x128xf32>
    %19 = vector.extract_strided_slice %17 {offsets = [0, 128], sizes = [8, 128], strides = [1, 1]} : vector<8x384xf32> to vector<8x128xf32>
    %20 = vector.extract_strided_slice %17 {offsets = [0, 256], sizes = [8, 128], strides = [1, 1]} : vector<8x384xf32> to vector<8x128xf32>
    %c0_9 = arith.constant 0 : index
    %c0_10 = arith.constant 0 : index
    %c0_11 = arith.constant 0 : index
    %21 = vector.load %arg5[%c0_9, %c0_10, %c0_11] : memref<1x8x16xf32, #tpu.memory_space<vmem>>, vector<1x8x16xf32>
    %22 = vector.shape_cast %21 : vector<1x8x16xf32> to vector<8x16xf32>
    %c0_12 = arith.constant 0 : index
    %c0_13 = arith.constant 0 : index
    %c0_14 = arith.constant 0 : index
    %23 = vector.load %arg6[%c0_12, %c0_13, %c0_14] : memref<1x8x16xf32, #tpu.memory_space<vmem>>, vector<1x8x16xf32>
    %24 = vector.shape_cast %23 : vector<1x8x16xf32> to vector<8x16xf32>
    %25 = tpu.iota {dimensions = array<i32: 0>} : vector<8x8xi32>
    %26 = tpu.iota {dimensions = array<i32: 1>} : vector<8x8xi32>
    %27 = arith.cmpi sle, %26, %25 : vector<8x8xi32>
    %c0_15 = arith.constant 0 : index
    %c0_16 = arith.constant 0 : index
    %28 = vector.load %arg4[%c0_15, %c0_16] : memref<128x128xbf16, #tpu.memory_space<vmem>>, vector<128x128xbf16>
    %cst_17 = arith.constant 0.000000e+00 : f32
    %29 = vector.broadcast %cst_17 : f32 to vector<8x128xf32>
    %30 = vector.extract_strided_slice %18 {offsets = [0, 0], sizes = [8, 32], strides = [1, 1]} : vector<8x128xf32> to vector<8x32xf32>
    %31 = vector.extract_strided_slice %19 {offsets = [0, 0], sizes = [8, 32], strides = [1, 1]} : vector<8x128xf32> to vector<8x32xf32>
    %32 = vector.extract_strided_slice %20 {offsets = [0, 0], sizes = [8, 32], strides = [1, 1]} : vector<8x128xf32> to vector<8x32xf32>
    %33 = vector.extract_strided_slice %30 {offsets = [0, 0], sizes = [8, 16], strides = [1, 1]} : vector<8x32xf32> to vector<8x16xf32>
    %34 = vector.extract_strided_slice %30 {offsets = [0, 16], sizes = [8, 16], strides = [1, 1]} : vector<8x32xf32> to vector<8x16xf32>
    %35 = vector.extract_strided_slice %31 {offsets = [0, 0], sizes = [8, 16], strides = [1, 1]} : vector<8x32xf32> to vector<8x16xf32>
    %36 = vector.extract_strided_slice %31 {offsets = [0, 16], sizes = [8, 16], strides = [1, 1]} : vector<8x32xf32> to vector<8x16xf32>
    %37 = arith.mulf %33, %22 : vector<8x16xf32>
    %38 = arith.mulf %34, %24 : vector<8x16xf32>
    %39 = arith.subf %37, %38 : vector<8x16xf32>
    %cst_18 = arith.constant 0.176776692 : f32
    %40 = vector.broadcast %cst_18 : f32 to vector<8x16xf32>
    %41 = arith.mulf %39, %40 : vector<8x16xf32>
    %42 = arith.truncf %41 : vector<8x16xf32> to vector<8x16xbf16>
    %43 = arith.mulf %34, %22 : vector<8x16xf32>
    %44 = arith.mulf %33, %24 : vector<8x16xf32>
    %45 = arith.addf %43, %44 : vector<8x16xf32>
    %cst_19 = arith.constant 0.176776692 : f32
    %46 = vector.broadcast %cst_19 : f32 to vector<8x16xf32>
    %47 = arith.mulf %45, %46 : vector<8x16xf32>
    %48 = arith.truncf %47 : vector<8x16xf32> to vector<8x16xbf16>
    %49 = arith.mulf %35, %22 : vector<8x16xf32>
    %50 = arith.mulf %36, %24 : vector<8x16xf32>
    %51 = arith.subf %49, %50 : vector<8x16xf32>
    %52 = arith.truncf %51 : vector<8x16xf32> to vector<8x16xbf16>
    %53 = arith.mulf %36, %22 : vector<8x16xf32>
    %54 = arith.mulf %35, %24 : vector<8x16xf32>
    %55 = arith.addf %53, %54 : vector<8x16xf32>
    %56 = arith.truncf %55 : vector<8x16xf32> to vector<8x16xbf16>
    %cst_20 = arith.constant dense<0.000000e+00> : vector<8x8xf32>
    %57 = tpu.matmul %42, %52, %cst_20 {dimension_numbers = #tpu.dot_dimension_numbers<[1], [1], [0], [0], [0, 0, 1, 0], [], []>} : vector<8x16xbf16>, vector<8x16xbf16>, vector<8x8xf32> -> vector<8x8xf32>
    %cst_21 = arith.constant dense<0.000000e+00> : vector<8x8xf32>
    %58 = tpu.matmul %48, %56, %cst_21 {dimension_numbers = #tpu.dot_dimension_numbers<[1], [1], [0], [0], [0, 0, 1, 0], [], []>} : vector<8x16xbf16>, vector<8x16xbf16>, vector<8x8xf32> -> vector<8x8xf32>
    %59 = arith.addf %57, %58 : vector<8x8xf32>
    %cst_22 = arith.constant -1.000000e+30 : f32
    %60 = vector.broadcast %cst_22 : f32 to vector<8x8xf32>
    %61 = arith.select %27, %59, %60 : vector<8x8xi1>, vector<8x8xf32>
    %cst_23 = arith.constant dense<0xFF800000> : vector<8xf32>
    %62 = vector.multi_reduction <maximumf>, %61, %cst_23 [1] : vector<8x8xf32> to vector<8xf32>
    %63 = vector.shape_cast %62 : vector<8xf32> to vector<8x1xf32>
    %64 = vector.broadcast %63 : vector<8x1xf32> to vector<8x8xf32>
    %65 = arith.subf %61, %64 : vector<8x8xf32>
    %66 = math.exp %65 : vector<8x8xf32>
    %cst_24 = arith.constant dense<0.000000e+00> : vector<8xf32>
    %67 = vector.multi_reduction <add>, %66, %cst_24 [1] : vector<8x8xf32> to vector<8xf32>
    %68 = vector.shape_cast %67 : vector<8xf32> to vector<8x1xf32>
    %69 = tpu.reciprocal %68 {approx = true} : vector<8x1xf32> -> vector<8x1xf32>
    %70 = vector.broadcast %69 : vector<8x1xf32> to vector<8x8xf32>
    %71 = arith.mulf %66, %70 : vector<8x8xf32>
    %72 = arith.truncf %71 : vector<8x8xf32> to vector<8x8xbf16>
    %73 = arith.truncf %32 : vector<8x32xf32> to vector<8x32xbf16>
    %cst_25 = arith.constant dense<0.000000e+00> : vector<8x32xf32>
    %74 = tpu.matmul %72, %73, %cst_25 {dimension_numbers = #tpu.dot_dimension_numbers<[1], [0], [0], [1], [0, 0, 1, 1], [], []>} : vector<8x8xbf16>, vector<8x32xbf16>, vector<8x32xf32> -> vector<8x32xf32>
    %75 = arith.truncf %74 : vector<8x32xf32> to vector<8x32xbf16>
    %76 = vector.extract_strided_slice %28 {offsets = [0, 0], sizes = [32, 128], strides = [1, 1]} : vector<128x128xbf16> to vector<32x128xbf16>
    %cst_26 = arith.constant dense<0.000000e+00> : vector<8x128xf32>
    %77 = tpu.matmul %75, %76, %cst_26 {dimension_numbers = #tpu.dot_dimension_numbers<[1], [0], [0], [1], [0, 0, 1, 1], [], []>} : vector<8x32xbf16>, vector<32x128xbf16>, vector<8x128xf32> -> vector<8x128xf32>
    %78 = arith.addf %29, %77 : vector<8x128xf32>
    %79 = vector.extract_strided_slice %18 {offsets = [0, 32], sizes = [8, 32], strides = [1, 1]} : vector<8x128xf32> to vector<8x32xf32>
    %80 = vector.extract_strided_slice %19 {offsets = [0, 32], sizes = [8, 32], strides = [1, 1]} : vector<8x128xf32> to vector<8x32xf32>
    %81 = vector.extract_strided_slice %20 {offsets = [0, 32], sizes = [8, 32], strides = [1, 1]} : vector<8x128xf32> to vector<8x32xf32>
    %82 = vector.extract_strided_slice %79 {offsets = [0, 0], sizes = [8, 16], strides = [1, 1]} : vector<8x32xf32> to vector<8x16xf32>
    %83 = vector.extract_strided_slice %79 {offsets = [0, 16], sizes = [8, 16], strides = [1, 1]} : vector<8x32xf32> to vector<8x16xf32>
    %84 = vector.extract_strided_slice %80 {offsets = [0, 0], sizes = [8, 16], strides = [1, 1]} : vector<8x32xf32> to vector<8x16xf32>
    %85 = vector.extract_strided_slice %80 {offsets = [0, 16], sizes = [8, 16], strides = [1, 1]} : vector<8x32xf32> to vector<8x16xf32>
    %86 = arith.mulf %82, %22 : vector<8x16xf32>
    %87 = arith.mulf %83, %24 : vector<8x16xf32>
    %88 = arith.subf %86, %87 : vector<8x16xf32>
    %cst_27 = arith.constant 0.176776692 : f32
    %89 = vector.broadcast %cst_27 : f32 to vector<8x16xf32>
    %90 = arith.mulf %88, %89 : vector<8x16xf32>
    %91 = arith.truncf %90 : vector<8x16xf32> to vector<8x16xbf16>
    %92 = arith.mulf %83, %22 : vector<8x16xf32>
    %93 = arith.mulf %82, %24 : vector<8x16xf32>
    %94 = arith.addf %92, %93 : vector<8x16xf32>
    %cst_28 = arith.constant 0.176776692 : f32
    %95 = vector.broadcast %cst_28 : f32 to vector<8x16xf32>
    %96 = arith.mulf %94, %95 : vector<8x16xf32>
    %97 = arith.truncf %96 : vector<8x16xf32> to vector<8x16xbf16>
    %98 = arith.mulf %84, %22 : vector<8x16xf32>
    %99 = arith.mulf %85, %24 : vector<8x16xf32>
    %100 = arith.subf %98, %99 : vector<8x16xf32>
    %101 = arith.truncf %100 : vector<8x16xf32> to vector<8x16xbf16>
    %102 = arith.mulf %85, %22 : vector<8x16xf32>
    %103 = arith.mulf %84, %24 : vector<8x16xf32>
    %104 = arith.addf %102, %103 : vector<8x16xf32>
    %105 = arith.truncf %104 : vector<8x16xf32> to vector<8x16xbf16>
    %cst_29 = arith.constant dense<0.000000e+00> : vector<8x8xf32>
    %106 = tpu.matmul %91, %101, %cst_29 {dimension_numbers = #tpu.dot_dimension_numbers<[1], [1], [0], [0], [0, 0, 1, 0], [], []>} : vector<8x16xbf16>, vector<8x16xbf16>, vector<8x8xf32> -> vector<8x8xf32>
    %cst_30 = arith.constant dense<0.000000e+00> : vector<8x8xf32>
    %107 = tpu.matmul %97, %105, %cst_30 {dimension_numbers = #tpu.dot_dimension_numbers<[1], [1], [0], [0], [0, 0, 1, 0], [], []>} : vector<8x16xbf16>, vector<8x16xbf16>, vector<8x8xf32> -> vector<8x8xf32>
    %108 = arith.addf %106, %107 : vector<8x8xf32>
    %cst_31 = arith.constant -1.000000e+30 : f32
    %109 = vector.broadcast %cst_31 : f32 to vector<8x8xf32>
    %110 = arith.select %27, %108, %109 : vector<8x8xi1>, vector<8x8xf32>
    %cst_32 = arith.constant dense<0xFF800000> : vector<8xf32>
    %111 = vector.multi_reduction <maximumf>, %110, %cst_32 [1] : vector<8x8xf32> to vector<8xf32>
    %112 = vector.shape_cast %111 : vector<8xf32> to vector<8x1xf32>
    %113 = vector.broadcast %112 : vector<8x1xf32> to vector<8x8xf32>
    %114 = arith.subf %110, %113 : vector<8x8xf32>
    %115 = math.exp %114 : vector<8x8xf32>
    %cst_33 = arith.constant dense<0.000000e+00> : vector<8xf32>
    %116 = vector.multi_reduction <add>, %115, %cst_33 [1] : vector<8x8xf32> to vector<8xf32>
    %117 = vector.shape_cast %116 : vector<8xf32> to vector<8x1xf32>
    %118 = tpu.reciprocal %117 {approx = true} : vector<8x1xf32> -> vector<8x1xf32>
    %119 = vector.broadcast %118 : vector<8x1xf32> to vector<8x8xf32>
    %120 = arith.mulf %115, %119 : vector<8x8xf32>
    %121 = arith.truncf %120 : vector<8x8xf32> to vector<8x8xbf16>
    %122 = arith.truncf %81 : vector<8x32xf32> to vector<8x32xbf16>
    %cst_34 = arith.constant dense<0.000000e+00> : vector<8x32xf32>
    %123 = tpu.matmul %121, %122, %cst_34 {dimension_numbers = #tpu.dot_dimension_numbers<[1], [0], [0], [1], [0, 0, 1, 1], [], []>} : vector<8x8xbf16>, vector<8x32xbf16>, vector<8x32xf32> -> vector<8x32xf32>
    %124 = arith.truncf %123 : vector<8x32xf32> to vector<8x32xbf16>
    %125 = vector.extract_strided_slice %28 {offsets = [32, 0], sizes = [32, 128], strides = [1, 1]} : vector<128x128xbf16> to vector<32x128xbf16>
    %cst_35 = arith.constant dense<0.000000e+00> : vector<8x128xf32>
    %126 = tpu.matmul %124, %125, %cst_35 {dimension_numbers = #tpu.dot_dimension_numbers<[1], [0], [0], [1], [0, 0, 1, 1], [], []>} : vector<8x32xbf16>, vector<32x128xbf16>, vector<8x128xf32> -> vector<8x128xf32>
    %127 = arith.addf %78, %126 : vector<8x128xf32>
    %128 = vector.extract_strided_slice %18 {offsets = [0, 64], sizes = [8, 32], strides = [1, 1]} : vector<8x128xf32> to vector<8x32xf32>
    %129 = vector.extract_strided_slice %19 {offsets = [0, 64], sizes = [8, 32], strides = [1, 1]} : vector<8x128xf32> to vector<8x32xf32>
    %130 = vector.extract_strided_slice %20 {offsets = [0, 64], sizes = [8, 32], strides = [1, 1]} : vector<8x128xf32> to vector<8x32xf32>
    %131 = vector.extract_strided_slice %128 {offsets = [0, 0], sizes = [8, 16], strides = [1, 1]} : vector<8x32xf32> to vector<8x16xf32>
    %132 = vector.extract_strided_slice %128 {offsets = [0, 16], sizes = [8, 16], strides = [1, 1]} : vector<8x32xf32> to vector<8x16xf32>
    %133 = vector.extract_strided_slice %129 {offsets = [0, 0], sizes = [8, 16], strides = [1, 1]} : vector<8x32xf32> to vector<8x16xf32>
    %134 = vector.extract_strided_slice %129 {offsets = [0, 16], sizes = [8, 16], strides = [1, 1]} : vector<8x32xf32> to vector<8x16xf32>
    %135 = arith.mulf %131, %22 : vector<8x16xf32>
    %136 = arith.mulf %132, %24 : vector<8x16xf32>
    %137 = arith.subf %135, %136 : vector<8x16xf32>
    %cst_36 = arith.constant 0.176776692 : f32
    %138 = vector.broadcast %cst_36 : f32 to vector<8x16xf32>
    %139 = arith.mulf %137, %138 : vector<8x16xf32>
    %140 = arith.truncf %139 : vector<8x16xf32> to vector<8x16xbf16>
    %141 = arith.mulf %132, %22 : vector<8x16xf32>
    %142 = arith.mulf %131, %24 : vector<8x16xf32>
    %143 = arith.addf %141, %142 : vector<8x16xf32>
    %cst_37 = arith.constant 0.176776692 : f32
    %144 = vector.broadcast %cst_37 : f32 to vector<8x16xf32>
    %145 = arith.mulf %143, %144 : vector<8x16xf32>
    %146 = arith.truncf %145 : vector<8x16xf32> to vector<8x16xbf16>
    %147 = arith.mulf %133, %22 : vector<8x16xf32>
    %148 = arith.mulf %134, %24 : vector<8x16xf32>
    %149 = arith.subf %147, %148 : vector<8x16xf32>
    %150 = arith.truncf %149 : vector<8x16xf32> to vector<8x16xbf16>
    %151 = arith.mulf %134, %22 : vector<8x16xf32>
    %152 = arith.mulf %133, %24 : vector<8x16xf32>
    %153 = arith.addf %151, %152 : vector<8x16xf32>
    %154 = arith.truncf %153 : vector<8x16xf32> to vector<8x16xbf16>
    %cst_38 = arith.constant dense<0.000000e+00> : vector<8x8xf32>
    %155 = tpu.matmul %140, %150, %cst_38 {dimension_numbers = #tpu.dot_dimension_numbers<[1], [1], [0], [0], [0, 0, 1, 0], [], []>} : vector<8x16xbf16>, vector<8x16xbf16>, vector<8x8xf32> -> vector<8x8xf32>
    %cst_39 = arith.constant dense<0.000000e+00> : vector<8x8xf32>
    %156 = tpu.matmul %146, %154, %cst_39 {dimension_numbers = #tpu.dot_dimension_numbers<[1], [1], [0], [0], [0, 0, 1, 0], [], []>} : vector<8x16xbf16>, vector<8x16xbf16>, vector<8x8xf32> -> vector<8x8xf32>
    %157 = arith.addf %155, %156 : vector<8x8xf32>
    %cst_40 = arith.constant -1.000000e+30 : f32
    %158 = vector.broadcast %cst_40 : f32 to vector<8x8xf32>
    %159 = arith.select %27, %157, %158 : vector<8x8xi1>, vector<8x8xf32>
    %cst_41 = arith.constant dense<0xFF800000> : vector<8xf32>
    %160 = vector.multi_reduction <maximumf>, %159, %cst_41 [1] : vector<8x8xf32> to vector<8xf32>
    %161 = vector.shape_cast %160 : vector<8xf32> to vector<8x1xf32>
    %162 = vector.broadcast %161 : vector<8x1xf32> to vector<8x8xf32>
    %163 = arith.subf %159, %162 : vector<8x8xf32>
    %164 = math.exp %163 : vector<8x8xf32>
    %cst_42 = arith.constant dense<0.000000e+00> : vector<8xf32>
    %165 = vector.multi_reduction <add>, %164, %cst_42 [1] : vector<8x8xf32> to vector<8xf32>
    %166 = vector.shape_cast %165 : vector<8xf32> to vector<8x1xf32>
    %167 = tpu.reciprocal %166 {approx = true} : vector<8x1xf32> -> vector<8x1xf32>
    %168 = vector.broadcast %167 : vector<8x1xf32> to vector<8x8xf32>
    %169 = arith.mulf %164, %168 : vector<8x8xf32>
    %170 = arith.truncf %169 : vector<8x8xf32> to vector<8x8xbf16>
    %171 = arith.truncf %130 : vector<8x32xf32> to vector<8x32xbf16>
    %cst_43 = arith.constant dense<0.000000e+00> : vector<8x32xf32>
    %172 = tpu.matmul %170, %171, %cst_43 {dimension_numbers = #tpu.dot_dimension_numbers<[1], [0], [0], [1], [0, 0, 1, 1], [], []>} : vector<8x8xbf16>, vector<8x32xbf16>, vector<8x32xf32> -> vector<8x32xf32>
    %173 = arith.truncf %172 : vector<8x32xf32> to vector<8x32xbf16>
    %174 = vector.extract_strided_slice %28 {offsets = [64, 0], sizes = [32, 128], strides = [1, 1]} : vector<128x128xbf16> to vector<32x128xbf16>
    %cst_44 = arith.constant dense<0.000000e+00> : vector<8x128xf32>
    %175 = tpu.matmul %173, %174, %cst_44 {dimension_numbers = #tpu.dot_dimension_numbers<[1], [0], [0], [1], [0, 0, 1, 1], [], []>} : vector<8x32xbf16>, vector<32x128xbf16>, vector<8x128xf32> -> vector<8x128xf32>
    %176 = arith.addf %127, %175 : vector<8x128xf32>
    %177 = vector.extract_strided_slice %18 {offsets = [0, 96], sizes = [8, 32], strides = [1, 1]} : vector<8x128xf32> to vector<8x32xf32>
    %178 = vector.extract_strided_slice %19 {offsets = [0, 96], sizes = [8, 32], strides = [1, 1]} : vector<8x128xf32> to vector<8x32xf32>
    %179 = vector.extract_strided_slice %20 {offsets = [0, 96], sizes = [8, 32], strides = [1, 1]} : vector<8x128xf32> to vector<8x32xf32>
    %180 = vector.extract_strided_slice %177 {offsets = [0, 0], sizes = [8, 16], strides = [1, 1]} : vector<8x32xf32> to vector<8x16xf32>
    %181 = vector.extract_strided_slice %177 {offsets = [0, 16], sizes = [8, 16], strides = [1, 1]} : vector<8x32xf32> to vector<8x16xf32>
    %182 = vector.extract_strided_slice %178 {offsets = [0, 0], sizes = [8, 16], strides = [1, 1]} : vector<8x32xf32> to vector<8x16xf32>
    %183 = vector.extract_strided_slice %178 {offsets = [0, 16], sizes = [8, 16], strides = [1, 1]} : vector<8x32xf32> to vector<8x16xf32>
    %184 = arith.mulf %180, %22 : vector<8x16xf32>
    %185 = arith.mulf %181, %24 : vector<8x16xf32>
    %186 = arith.subf %184, %185 : vector<8x16xf32>
    %cst_45 = arith.constant 0.176776692 : f32
    %187 = vector.broadcast %cst_45 : f32 to vector<8x16xf32>
    %188 = arith.mulf %186, %187 : vector<8x16xf32>
    %189 = arith.truncf %188 : vector<8x16xf32> to vector<8x16xbf16>
    %190 = arith.mulf %181, %22 : vector<8x16xf32>
    %191 = arith.mulf %180, %24 : vector<8x16xf32>
    %192 = arith.addf %190, %191 : vector<8x16xf32>
    %cst_46 = arith.constant 0.176776692 : f32
    %193 = vector.broadcast %cst_46 : f32 to vector<8x16xf32>
    %194 = arith.mulf %192, %193 : vector<8x16xf32>
    %195 = arith.truncf %194 : vector<8x16xf32> to vector<8x16xbf16>
    %196 = arith.mulf %182, %22 : vector<8x16xf32>
    %197 = arith.mulf %183, %24 : vector<8x16xf32>
    %198 = arith.subf %196, %197 : vector<8x16xf32>
    %199 = arith.truncf %198 : vector<8x16xf32> to vector<8x16xbf16>
    %200 = arith.mulf %183, %22 : vector<8x16xf32>
    %201 = arith.mulf %182, %24 : vector<8x16xf32>
    %202 = arith.addf %200, %201 : vector<8x16xf32>
    %203 = arith.truncf %202 : vector<8x16xf32> to vector<8x16xbf16>
    %cst_47 = arith.constant dense<0.000000e+00> : vector<8x8xf32>
    %204 = tpu.matmul %189, %199, %cst_47 {dimension_numbers = #tpu.dot_dimension_numbers<[1], [1], [0], [0], [0, 0, 1, 0], [], []>} : vector<8x16xbf16>, vector<8x16xbf16>, vector<8x8xf32> -> vector<8x8xf32>
    %cst_48 = arith.constant dense<0.000000e+00> : vector<8x8xf32>
    %205 = tpu.matmul %195, %203, %cst_48 {dimension_numbers = #tpu.dot_dimension_numbers<[1], [1], [0], [0], [0, 0, 1, 0], [], []>} : vector<8x16xbf16>, vector<8x16xbf16>, vector<8x8xf32> -> vector<8x8xf32>
    %206 = arith.addf %204, %205 : vector<8x8xf32>
    %cst_49 = arith.constant -1.000000e+30 : f32
    %207 = vector.broadcast %cst_49 : f32 to vector<8x8xf32>
    %208 = arith.select %27, %206, %207 : vector<8x8xi1>, vector<8x8xf32>
    %cst_50 = arith.constant dense<0xFF800000> : vector<8xf32>
    %209 = vector.multi_reduction <maximumf>, %208, %cst_50 [1] : vector<8x8xf32> to vector<8xf32>
    %210 = vector.shape_cast %209 : vector<8xf32> to vector<8x1xf32>
    %211 = vector.broadcast %210 : vector<8x1xf32> to vector<8x8xf32>
    %212 = arith.subf %208, %211 : vector<8x8xf32>
    %213 = math.exp %212 : vector<8x8xf32>
    %cst_51 = arith.constant dense<0.000000e+00> : vector<8xf32>
    %214 = vector.multi_reduction <add>, %213, %cst_51 [1] : vector<8x8xf32> to vector<8xf32>
    %215 = vector.shape_cast %214 : vector<8xf32> to vector<8x1xf32>
    %216 = tpu.reciprocal %215 {approx = true} : vector<8x1xf32> -> vector<8x1xf32>
    %217 = vector.broadcast %216 : vector<8x1xf32> to vector<8x8xf32>
    %218 = arith.mulf %213, %217 : vector<8x8xf32>
    %219 = arith.truncf %218 : vector<8x8xf32> to vector<8x8xbf16>
    %220 = arith.truncf %179 : vector<8x32xf32> to vector<8x32xbf16>
    %cst_52 = arith.constant dense<0.000000e+00> : vector<8x32xf32>
    %221 = tpu.matmul %219, %220, %cst_52 {dimension_numbers = #tpu.dot_dimension_numbers<[1], [0], [0], [1], [0, 0, 1, 1], [], []>} : vector<8x8xbf16>, vector<8x32xbf16>, vector<8x32xf32> -> vector<8x32xf32>
    %222 = arith.truncf %221 : vector<8x32xf32> to vector<8x32xbf16>
    %223 = vector.extract_strided_slice %28 {offsets = [96, 0], sizes = [32, 128], strides = [1, 1]} : vector<128x128xbf16> to vector<32x128xbf16>
    %cst_53 = arith.constant dense<0.000000e+00> : vector<8x128xf32>
    %224 = tpu.matmul %222, %223, %cst_53 {dimension_numbers = #tpu.dot_dimension_numbers<[1], [0], [0], [1], [0, 0, 1, 1], [], []>} : vector<8x32xbf16>, vector<32x128xbf16>, vector<8x128xf32> -> vector<8x128xf32>
    %225 = arith.addf %176, %224 : vector<8x128xf32>
    %226 = arith.addf %1, %225 : vector<8x128xf32>
    %227 = arith.mulf %226, %226 : vector<8x128xf32>
    %cst_54 = arith.constant dense<0.000000e+00> : vector<8xf32>
    %228 = vector.multi_reduction <add>, %227, %cst_54 [1] : vector<8x128xf32> to vector<8xf32>
    %229 = vector.shape_cast %228 : vector<8xf32> to vector<8x1xf32>
    %cst_55 = arith.constant 1.280000e+02 : f32
    %230 = vector.broadcast %cst_55 : f32 to vector<8x1xf32>
    %231 = arith.divf %229, %230 : vector<8x1xf32>
    %cst_56 = arith.constant 9.99999997E-7 : f32
    %232 = vector.broadcast %cst_56 : f32 to vector<8x1xf32>
    %233 = arith.addf %231, %232 : vector<8x1xf32>
    %234 = math.rsqrt %233 : vector<8x1xf32>
    %235 = vector.broadcast %234 : vector<8x1xf32> to vector<8x128xf32>
    %236 = arith.mulf %226, %235 : vector<8x128xf32>
    %c0_57 = arith.constant 0 : index
    %c0_58 = arith.constant 0 : index
    %237 = vector.load %arg7[%c0_57, %c0_58] : memref<1x128xf32, #tpu.memory_space<vmem>>, vector<1x128xf32>
    %238 = vector.broadcast %237 : vector<1x128xf32> to vector<8x128xf32>
    %239 = arith.mulf %236, %238 : vector<8x128xf32>
    %240 = arith.truncf %239 : vector<8x128xf32> to vector<8x128xbf16>
    %c0_59 = arith.constant 0 : index
    %c0_60 = arith.constant 0 : index
    %241 = vector.load %arg8[%c0_59, %c0_60] : memref<128x512xbf16, #tpu.memory_space<vmem>>, vector<128x512xbf16>
    %cst_61 = arith.constant dense<0.000000e+00> : vector<8x512xf32>
    %242 = tpu.matmul %240, %241, %cst_61 {dimension_numbers = #tpu.dot_dimension_numbers<[1], [0], [0], [1], [0, 0, 1, 1], [], []>} : vector<8x128xbf16>, vector<128x512xbf16>, vector<8x512xf32> -> vector<8x512xf32>
    %243 = vector.extract_strided_slice %242 {offsets = [0, 0], sizes = [8, 256], strides = [1, 1]} : vector<8x512xf32> to vector<8x256xf32>
    %244 = vector.extract_strided_slice %242 {offsets = [0, 256], sizes = [8, 256], strides = [1, 1]} : vector<8x512xf32> to vector<8x256xf32>
    %245 = arith.negf %243 : vector<8x256xf32>
    %246 = math.exp %245 : vector<8x256xf32>
    %cst_62 = arith.constant 1.000000e+00 : f32
    %247 = vector.broadcast %cst_62 : f32 to vector<8x256xf32>
    %248 = arith.addf %247, %246 : vector<8x256xf32>
    %249 = arith.divf %247, %248 : vector<8x256xf32>
    %250 = arith.mulf %243, %249 : vector<8x256xf32>
    %251 = arith.mulf %250, %244 : vector<8x256xf32>
    %252 = arith.truncf %251 : vector<8x256xf32> to vector<8x256xbf16>
    %c0_63 = arith.constant 0 : index
    %c0_64 = arith.constant 0 : index
    %253 = vector.load %arg9[%c0_63, %c0_64] : memref<256x128xbf16, #tpu.memory_space<vmem>>, vector<256x128xbf16>
    %cst_65 = arith.constant dense<0.000000e+00> : vector<8x128xf32>
    %254 = tpu.matmul %252, %253, %cst_65 {dimension_numbers = #tpu.dot_dimension_numbers<[1], [0], [0], [1], [0, 0, 1, 1], [], []>} : vector<8x256xbf16>, vector<256x128xbf16>, vector<8x128xf32> -> vector<8x128xf32>
    %255 = arith.addf %226, %254 : vector<8x128xf32>
    %c0_66 = arith.constant 0 : index
    %c0_67 = arith.constant 0 : index
    %c0_68 = arith.constant 0 : index
    %256 = vector.load %arg10[%c0_66, %c0_67, %c0_68] : memref<1x8x128xf32, #tpu.memory_space<vmem>>, vector<1x8x128xf32>
    %257 = vector.shape_cast %256 : vector<1x8x128xf32> to vector<8x128xf32>
    %258 = vector.shape_cast %255 : vector<8x128xf32> to vector<1x8x128xf32>
    tpu.vector_store %arg10[%c0_66, %c0_67, %c0_68], %258 {strides = array<i32>} : memref<1x8x128xf32, #tpu.memory_space<vmem>>, vector<1x8x128xf32>,
    return
  }
  func.func @transform_0(%arg0: i32) -> (i32, i32, i32) {
    %c0_i32 = arith.constant 0 : i32
    %c0_i32_0 = arith.constant 0 : i32
    %c0_i32_1 = arith.constant 0 : i32
    return %arg0, %c0_i32, %c0_i32_0 : i32, i32, i32
  }
  func.func @transform_1(%arg0: i32) -> (i32, i32) {
    %c0_i32 = arith.constant 0 : i32
    %c0_i32_0 = arith.constant 0 : i32
    %c0_i32_1 = arith.constant 0 : i32
    return %c0_i32, %c0_i32_0 : i32, i32
  }
  func.func @transform_2(%arg0: i32) -> (i32, i32) {
    %c0_i32 = arith.constant 0 : i32
    %c0_i32_0 = arith.constant 0 : i32
    %c0_i32_1 = arith.constant 0 : i32
    return %c0_i32, %c0_i32_0 : i32, i32
  }
  func.func @transform_3(%arg0: i32) -> (i32, i32) {
    %c0_i32 = arith.constant 0 : i32
    %c0_i32_0 = arith.constant 0 : i32
    %c0_i32_1 = arith.constant 0 : i32
    return %c0_i32, %c0_i32_0 : i32, i32
  }
  func.func @transform_4(%arg0: i32) -> (i32, i32, i32) {
    %c0_i32 = arith.constant 0 : i32
    %c0_i32_0 = arith.constant 0 : i32
    %c0_i32_1 = arith.constant 0 : i32
    return %arg0, %c0_i32, %c0_i32_0 : i32, i32, i32
  }
  func.func @transform_5(%arg0: i32) -> (i32, i32, i32) {
    %c0_i32 = arith.constant 0 : i32
    %c0_i32_0 = arith.constant 0 : i32
    %c0_i32_1 = arith.constant 0 : i32
    return %arg0, %c0_i32, %c0_i32_0 : i32, i32, i32
  }
  func.func @transform_6(%arg0: i32) -> (i32, i32) {
    %c0_i32 = arith.constant 0 : i32
    %c0_i32_0 = arith.constant 0 : i32
    %c0_i32_1 = arith.constant 0 : i32
    return %c0_i32, %c0_i32_0 : i32, i32
  }
  func.func @transform_7(%arg0: i32) -> (i32, i32) {
    %c0_i32 = arith.constant 0 : i32
    %c0_i32_0 = arith.constant 0 : i32
    %c0_i32_1 = arith.constant 0 : i32
    return %c0_i32, %c0_i32_0 : i32, i32
  }
  func.func @transform_8(%arg0: i32) -> (i32, i32) {
    %c0_i32 = arith.constant 0 : i32
    %c0_i32_0 = arith.constant 0 : i32
    %c0_i32_1 = arith.constant 0 : i32
    return %c0_i32, %c0_i32_0 : i32, i32
  }
  func.func @transform_9(%arg0: i32) -> (i32, i32, i32) {
    %c0_i32 = arith.constant 0 : i32
    %c0_i32_0 = arith.constant 0 : i32
    %c0_i32_1 = arith.constant 0 : i32
    return %arg0, %c0_i32, %c0_i32_0 : i32, i32, i32
  }
}

</mosaic_0001>

<bundles_post_ra>
// kernel: llava_forward.7
= control target key start
LH: loop header
LB: loop body
LE: loop exit
PB: predicated region body
PF: predicated region fallthrough
CT: control target
= control target key end

     0   :  { %vm112_vm0 = vcmask 523264   ;;  %s268_s1 = inlined_call_operand.vmem [shape: bf16[192,128], index: 1, kind: input, shape index: {}]   ;;  %s269_s0 = inlined_call_operand.vmem [shape: f32[8,192], index: 0, kind: input, shape index: {}]   ;;  %s270_s2 = inlined_call_operand.vmem [shape: f32[8,128], index: 2, kind: output, shape index: {}]  }
   0x1   :  { %v203_v0 = vld [vmem:[%s268_s1 + $0x38] sm:$0xff]  ;;  %v202_v2 = vld [vmem:[%s268_s1 + $0x30] sm:$0xff]  ;;  %v201_v4 = vld [vmem:[%s268_s1 + $0x28] sm:$0xff] }
   0x2   :  { %v207_v1 = vld [vmem:[%s268_s1 + $0x58] sm:$0xff]  ;;  %116 = vmatpush.bf16.msra.mxu0 %v203_v0  ;;  %v206_v3 = vld [vmem:[%s268_s1 + $0x50] sm:$0xff]  ;;  %v205_v5 = vld [vmem:[%s268_s1 + $0x48] sm:$0xff] }
   0x3   :  { %133 = vmatpush.bf16.msra.mxu1 %v207_v1  ;;  %v200_v6 = vld [vmem:[%s268_s1 + $0x20] sm:$0xff]  ;;  %v13_v8 = vld [vmem:[%s269_s0 + $0x8] sm:$0xff]  ;;  %v199_v9 = vld [vmem:[%s268_s1 + $0x18] sm:$0xff] }
   0x4   :  { %v204_v7 = vld [vmem:[%s268_s1 + $0x40] sm:$0xff]  ;;  %v15_v10 = vpack.c.bf16 %v13_v8, %v13_v8  ;;  %v198_v11 = vld [vmem:[%s268_s1 + $0x10] sm:$0xff]  ;;  %v197_v12 = vld [vmem:[%s268_s1 + $0x8] sm:$0xff] }
   0x5   :  { %v196_v13 = vld [vmem:[%s268_s1] sm:$0xff] }
   0x6   :  { %117 = vmatpush.bf16.msra.mxu0 %v202_v2  ;;  %v12_v14 = vld [vmem:[%s269_s0] sm:$0xff] }
   0x7   :  { %134 = vmatpush.bf16.msra.mxu1 %v206_v3  ;;  %v14_v15 = vpack.c.bf16 %v12_v14, %v12_v14 }
   0xa   :  { %118 = vmatpush.bf16.msra.mxu0 %v201_v4 }
   0xb   :  { %135 = vmatpush.bf16.msra.mxu1 %v205_v5 }
   0xe   :  { %119 = vmatpush.bf16.msra.mxu0 %v200_v6 }
   0xf   :  { %136 = vmatpush.bf16.msra.mxu1 %v204_v7 }
  0x12   :  { %120 = vmatpush.bf16.msra.mxu0 %v199_v9  ;;  %195 = vmatmul.msk.bf16.vlgmr.msra.gmra.mxu1 %vm112_vm0, %v15_v10 }
  0x16   :  { %121 = vmatpush.bf16.msra.mxu0 %v198_v11 }
  0x1a   :  { %122 = vmatpush.bf16.msra.mxu0 %v197_v12 }
  0x1e   :  { %123 = vmatpush.bf16.msra.mxu0 %v196_v13 }
  0x21   :  { %124 = vmatmul.bf16.vlgmr.msra.gmra.mxu0 %v14_v15 }
  0x8f   :  { %v138_v16 = vpop.f32.mrf.mxu1 }
  0x97   :  { %v140_v17 = vpop.f32.mrf.mxu1 }
  0x9e   :  { %v125_v18 = vpop.f32.mrf.mxu0 }
  0x9f   :  { %v139_v19 = vadd.f32 %v138_v16, %v125_v18 }
  0xa1   :  { %142 = vst [vmem:[%s270_s2] sm:$0xff] %v139_v19 }
  0xa6   :  { %v127_v20 = vpop.f32.mrf.mxu0 }

// kernel: llava_forward.8
= control target key start
LH: loop header
LB: loop body
LE: loop exit
PB: predicated region body
PF: predicated region fallthrough
CT: control target
= control target key end

     0   :  { %vm18_vm0 = vcmask 1041408   ;;  %v93_v3 = vmov 128.0   ;;  %s134_s0 = inlined_call_operand.vmem [shape: f32[10,128], index: 0, kind: input, shape index: {}]   ;;  %s135_s1 = inlined_call_operand.vmem [shape: f32[1,128], index: 1, kind: input, shape index: {}]   ;;  %s136_s2 = inlined_call_operand.vmem [shape: f32[1,128], index: 2, kind: input, shape index: {}]   ;;  %s137_s3 = inlined_call_operand.vmem [shape: f32[10,128], index: 3, kind: output, shape index: {}]  }
   0x1   :  { %v15_v0 = vld [vmem:[%s134_s0 + $0x8] sm:$0x3]  ;;  %v14_v2 = vld [vmem:[%s134_s0] sm:$0xff]  ;;  %87 = vrcp.f32 %v93_v3 }
   0x2   :  { %v19_v1 = vsel %vm18_vm0, %v15_v0, 0.0  ;;  %v85_v33 = vld [vmem:[%s135_s1] ss:$0 sm:$0xff] }
   0x3   :  { %20 = vadd.xlane.f32.xlu0 %v19_v1  ;;  %v86_v36 = vld [vmem:[%s136_s2] ss:$0 sm:$0xff] }
   0x7   :  { %v88_v4 = vpop.eup %87 }
   0x8   :  { %v23_v5 = vmul.f32 128.0, %v88_v4  ;;  %vm27_vm1 = vweird.f32 %v88_v4 }
   0xa   :  { %v24_v6 = vsub.f32 1.0, %v23_v5 }
   0xb   :  { %16 = vadd.xlane.f32.xlu0 %v14_v2 }
   0xc   :  { %v25_v7 = vmul.f32 %v88_v4, %v24_v6 }
   0xe   :  { %v26_v9 = vadd.f32 %v88_v4, %v25_v7 }
  0x10   :  { %v28_v10 = vsel %vm27_vm1, %v88_v4, %v26_v9 }
  0x76   :  { %v21_v8 = vpop.xlane.xlu0 %20 }
  0x77   :  { %v30_v13 = vmul.f32 %v28_v10, %v21_v8 }
  0x79   :  { %v32_v16 = vsub.f32 %v15_v0, %v30_v13 }
  0x7b   :  { %v34_v17 = vmul.f32 %v32_v16, %v32_v16 }
  0x7d   :  { %v37_v18 = vsel %vm18_vm0, %v34_v17, 0.0 }
  0x7e   :  { %v17_v11 = vpop.xlane.xlu0 %16 }
  0x7f   :  { %v29_v12 = vmul.f32 %v28_v10, %v17_v11 }
  0x81   :  { %v31_v14 = vsub.f32 %v14_v2, %v29_v12 }
  0x83   :  { %v33_v15 = vmul.f32 %v31_v14, %v31_v14 }
  0x85   :  { %35 = vadd.xlane.f32.xlu1 %v33_v15 }
  0x8d   :  { %38 = vadd.xlane.f32.xlu1 %v37_v18 }
  0xf8   :  { %v36_v19 = vpop.xlane.xlu1 %35 }
  0xf9   :  { %v40_v20 = vmul.f32 %v36_v19, %v28_v10 }
  0xfb   :  { %v42_v21 = vadd.f32 1e-05, %v40_v20 }
  0xfd   :  { %89 = vrsqrt.f32 %v42_v21  ;;  %vm50_vm3 = vweird.f32 %v42_v21 }
 0x100   :  { %v39_v22 = vpop.xlane.xlu1 %38 }
 0x101   :  { %v41_v23 = vmul.f32 %v39_v22, %v28_v10 }
 0x103   :  { %v90_v24 = vpop.eup %89  ;;  %v43_v25 = vadd.f32 1e-05, %v41_v23 }
 0x104   :  { %v45_v26 = vmul.f32 %v90_v24, %v42_v21  ;;  %vm51_vm2 = vweird.f32 %v90_v24 }
 0x105   :  { %91 = vrsqrt.f32 %v43_v25  ;;  %vm52_vm4 = vmor %vm50_vm3, %vm51_vm2  ;;  %vm60_vm6 = vweird.f32 %v43_v25 }
 0x106   :  { %v46_v27 = vmul.f32 %v90_v24, %v45_v26 }
 0x108   :  { %v47_v28 = vmul.f32 0.5, %v46_v27 }
 0x10a   :  { %v48_v29 = vsub.f32 1.5, %v47_v28 }
 0x10b   :  { %v92_v30 = vpop.eup %91 }
 0x10c   :  { %v49_v31 = vmul.f32 %v90_v24, %v48_v29  ;;  %v55_v32 = vmul.f32 %v92_v30, %v43_v25  ;;  %vm61_vm5 = vweird.f32 %v92_v30 }
 0x10d   :  { %vm62_vm7 = vmor %vm60_vm6, %vm61_vm5 }
 0x10e   :  { %v53_v34 = vsel %vm52_vm4, %v90_v24, %v49_v31  ;;  %v56_v35 = vmul.f32 %v92_v30, %v55_v32 }
 0x10f   :  { %v64_v37 = vmul.f32 %v53_v34, %v31_v14 }
 0x110   :  { %v57_v38 = vmul.f32 0.5, %v56_v35 }
 0x111   :  { %v70_v39 = vmul.f32 %v85_v33, %v64_v37 }
 0x112   :  { %v58_v40 = vsub.f32 1.5, %v57_v38 }
 0x113   :  { %v76_v41 = vadd.f32 %v86_v36, %v70_v39 }
 0x114   :  { %v59_v42 = vmul.f32 %v92_v30, %v58_v40 }
 0x115   :  { %78 = vst [vmem:[%s137_s3] sm:$0xff] %v76_v41 }
 0x116   :  { %v63_v43 = vsel %vm62_vm7, %v92_v30, %v59_v42 }
 0x117   :  { %v65_v44 = vmul.f32 %v63_v43, %v32_v16 }
 0x119   :  { %v71_v45 = vmul.f32 %v85_v33, %v65_v44 }
 0x11b   :  { %v77_v46 = vadd.f32 %v86_v36, %v71_v45 }
 0x11d   :  { %79 = vst [vmem:[%s137_s3 + $0x8] sm:$0x3] %v77_v46 }

// kernel: llava_forward.10
= control target key start
LH: loop header
LB: loop body
LE: loop exit
PB: predicated region body
PF: predicated region fallthrough
CT: control target
= control target key end

     0   :  { %10 = vsyncpa [#allocation3], 0  ;;  %s425_s0 = inlined_call_operand.vmem [shape: f32[8,128], index: 0, kind: input, shape index: {}]   ;;  %s426_s1 = inlined_call_operand.hbm [shape: bf16[128,128], index: 1, kind: input, shape index: {}]   ;;  %s427_s2 = inlined_call_operand.vmem [shape: f32[1,128], index: 2, kind: input, shape index: {}]   ;;  %s428_s3 = inlined_call_operand.hbm [shape: bf16[128,128], index: 3, kind: input, shape index: {}]   ;;  %s429_s4 = inlined_call_operand.vmem [shape: f32[1,128], index: 4, kind: input, shape index: {}]   ;;  %s430_s5 = inlined_call_operand.vmem [shape: f32[8,128], index: 5, kind: output, shape index: {}]  }
   0x1   :  { %s18_s20 = sshll.u32 %s426_s1, 4  ;;  %s19_s20 = int_to_ptr.hbm [resolvable:$true] %s18_s20 }
   0x2   :  { %11 = vsyncpa [#allocation5], 0  ;;  %s373_s21 = smov [#allocation2]   ;;  %s33_s25 = sshll.u32 %s428_s3, 4  ;;  %s34_s25 = int_to_ptr.hbm [resolvable:$true] %s33_s25 }
   0x3   :  { %s20_s22 = sshll.u32 %s373_s21, 4  ;;  %s374_s26 = smov 64   ;;  %s21_s22 = int_to_ptr.vmem [resolvable:$true] %s20_s22 }
   0x4   :  { %s375_s27 = smov 4   ;;  %s376_s28 = smov [#allocation4]  }
   0x5   :  { %26 = dma.hbm_to_vmem [thread:$0]  %s19_s20, 1024, %s21_s22, [#allocation3], %s374_s26, %s374_s26, %s375_s27  }
   0x6   :  { %s35_s29 = sshll.u32 %s376_s28, 4  ;;  %s36_s29 = int_to_ptr.vmem [resolvable:$true] %s35_s29 }
   0x7   :  { %41 = dma.hbm_to_vmem [thread:$0]  %s34_s25, 1024, %s36_s29, [#allocation5], %s374_s26, %s374_s26, %s375_s27  }
   0x8   :  { %369 = dma.done.wait [#allocation3], 1024  }
   0x9   :  { %370 = vsyncadd [#allocation3], 4294966272 }
   0xa   :  { %371 = dma.done.wait [#allocation5], 1024  }
   0xb   :  { %372 = vsyncadd [#allocation5], 4294966272  ;;  %v304_v0 = vld [vmem:[#allocation2 + $0x38] sm:$0xff]  ;;  %v303_v1 = vld [vmem:[#allocation2 + $0x30] sm:$0xff] }
   0xc   :  { %122 = vmatpush.bf16.msra.mxu0 %v304_v0  ;;  %v312_v2 = vld [vmem:[#allocation4 + $0x38] sm:$0xff]  ;;  %v311_v3 = vld [vmem:[#allocation4 + $0x30] sm:$0xff]  ;;  %v302_v4 = vld [vmem:[#allocation2 + $0x28] sm:$0xff] }
   0xd   :  { %213 = vmatpush.bf16.msra.mxu1 %v312_v2  ;;  %v301_v5 = vld [vmem:[#allocation2 + $0x20] sm:$0xff]  ;;  %v300_v6 = vld [vmem:[#allocation2 + $0x18] sm:$0xff]  ;;  %v299_v7 = vld [vmem:[#allocation2 + $0x10] sm:$0xff] }
   0xe   :  { %v298_v8 = vld [vmem:[#allocation2 + $0x8] sm:$0xff]  ;;  %v297_v9 = vld [vmem:[#allocation2] sm:$0xff]  ;;  %v308_v14 = vld [vmem:[#allocation4 + $0x18] sm:$0xff] }
   0xf   :  { %v52_v10 = vld [vmem:[%s425_s0] sm:$0xff]  ;;  %v310_v12 = vld [vmem:[#allocation4 + $0x28] sm:$0xff]  ;;  %v307_v15 = vld [vmem:[#allocation4 + $0x10] sm:$0xff] }
  0x10   :  { %123 = vmatpush.bf16.msra.mxu0 %v303_v1  ;;  %v53_v11 = vpack.c.bf16 %v52_v10, %v52_v10  ;;  %v309_v13 = vld [vmem:[#allocation4 + $0x20] sm:$0xff]  ;;  %v306_v16 = vld [vmem:[#allocation4 + $0x8] sm:$0xff] }
  0x11   :  { %214 = vmatpush.bf16.msra.mxu1 %v311_v3  ;;  %v305_v17 = vld [vmem:[#allocation4] sm:$0xff] }
  0x12   :  { %v317_v18 = vld [vmem:[%s427_s2] ss:$0 sm:$0xff] }
  0x13   :  { %v318_v32 = vld [vmem:[%s429_s4] ss:$0 sm:$0xff] }
  0x14   :  { %124 = vmatpush.bf16.msra.mxu0 %v302_v4 }
  0x15   :  { %215 = vmatpush.bf16.msra.mxu1 %v310_v12 }
  0x18   :  { %125 = vmatpush.bf16.msra.mxu0 %v301_v5 }
  0x19   :  { %216 = vmatpush.bf16.msra.mxu1 %v309_v13 }
  0x1c   :  { %126 = vmatpush.bf16.msra.mxu0 %v300_v6 }
  0x1d   :  { %217 = vmatpush.bf16.msra.mxu1 %v308_v14 }
  0x20   :  { %127 = vmatpush.bf16.msra.mxu0 %v299_v7 }
  0x21   :  { %218 = vmatpush.bf16.msra.mxu1 %v307_v15 }
  0x24   :  { %128 = vmatpush.bf16.msra.mxu0 %v298_v8 }
  0x25   :  { %219 = vmatpush.bf16.msra.mxu1 %v306_v16 }
  0x28   :  { %129 = vmatpush.bf16.msra.mxu0 %v297_v9 }
  0x29   :  { %220 = vmatpush.bf16.msra.mxu1 %v305_v17 }
  0x2b   :  { %130 = vmatmul.bf16.vlgmr.msra.gmra.mxu0 %v53_v11 }
  0xa8   :  { %v131_v19 = vpop.f32.mrf.mxu0 }
  0xa9   :  { %v132_v20 = vadd.f32 %v317_v18, %v131_v19 }
  0xab   :  { %v136_v21 = vmul.f32 0.044715, %v132_v20  ;;  %v135_v28 = vmul.f32 0.5, %v132_v20 }
  0xad   :  { %v137_v22 = vmul.f32 %v136_v21, %v132_v20 }
  0xaf   :  { %v138_v23 = vmul.f32 %v137_v22, %v132_v20 }
  0xb0   :  { %v133_v24 = vpop.f32.mrf.mxu0 }
  0xb1   :  { %v139_v25 = vadd.f32 %v138_v23, %v132_v20 }
  0xb3   :  { %v140_v26 = vmul.f32 0.7978846, %v139_v25 }
  0xb5   :  { %319 = vtanh.f32 %v140_v26 }
  0xbb   :  { %v320_v27 = vpop.eup %319 }
  0xbc   :  { %v142_v29 = vadd.f32 1.0, %v320_v27 }
  0xbe   :  { %v143_v30 = vmul.f32 %v142_v29, %v135_v28 }
  0xc0   :  { %v144_v31 = vpack.c.bf16 %v143_v30, %v143_v30 }
  0xc2   :  { %221 = vmatmul.bf16.vlgmr.msra.gmra.mxu1 %v144_v31 }
 0x13f   :  { %v222_v33 = vpop.f32.mrf.mxu1 }
 0x140   :  { %v223_v34 = vadd.f32 %v318_v32, %v222_v33 }
 0x142   :  { %226 = vst [vmem:[%s430_s5] sm:$0xff] %v223_v34 }
 0x147   :  { %v224_v35 = vpop.f32.mrf.mxu1 }
 0x148   :  { %231 = vsyncpa [#allocation3], 1 }
 0x149   :  { %232 = vsyncpa [#allocation5], 1 }

// kernel: llava_forward.9
= control target key start
LH: loop header
LB: loop body
LE: loop exit
PB: predicated region body
PF: predicated region fallthrough
CT: control target
= control target key end

     0   :  { %18 = vsyncpa [#allocation3], 0  ;;  %s2491_s0 = inlined_call_operand.vmem [shape: f32[2,5,128], index: 0, kind: input, shape index: {}]   ;;  %s2492_s1 = inlined_call_operand.vmem [shape: f32[1,128], index: 1, kind: input, shape index: {}]   ;;  %s2493_s2 = inlined_call_operand.vmem [shape: f32[1,128], index: 2, kind: input, shape index: {}]   ;;  %s2494_s3 = inlined_call_operand.vmem [shape: bf16[128,384], index: 3, kind: input, shape index: {}]   ;;  %s2495_s4 = inlined_call_operand.vmem [shape: f32[1,384], index: 4, kind: input, shape index: {}]   ;;  %s2496_s5 = inlined_call_operand.hbm [shape: bf16[128,128], index: 5, kind: input, shape index: {}]   ;;  %s2497_s6 = inlined_call_operand.vmem [shape: f32[1,128], index: 6, kind: input, shape index: {}]   ;;  %s2498_s7 = inlined_call_operand.vmem [shape: f32[1,128], index: 7, kind: input, shape index: {}]   ;;  %s2499_s8 = inlined_call_operand.vmem [shape: f32[1,128], index: 8, kind: input, shape index: {}]   ;;  %s2500_s9 = inlined_call_operand.vmem [shape: bf16[128,256], index: 9, kind: input, shape index: {}]   ;;  %s2501_s10 = inlined_call_operand.vmem [shape: f32[1,256], index: 10, kind: input, shape index: {}]   ;;  %s2502_s11 = inlined_call_operand.hbm [shape: bf16[256,128], index: 11, kind: input, shape index: {}]   ;;  %s2503_s12 = inlined_call_operand.vmem [shape: f32[1,128], index: 12, kind: input, shape index: {}]   ;;  %s2504_s13 = inlined_call_operand.vmem [shape: f32[2,5,128], index: 13, kind: output, shape index: {}]  }
   0x1   :  { %19 = vsyncpa [#allocation5], 0  ;;  %s2106_s25 = smov 0  }
   0x2 LB: > { %s357_s28 = sshll.u32 %s2496_s5, 4  ;;  %s1532_s29 = sadd.s32 4294967295, %s2025_s25   ;;  %s2025_s25 = sphi %s2106_s25, %s25_s25   ;;  %s358_s28 = int_to_ptr.hbm [resolvable:$true] %s357_s28 }
   0x3   : > { %p1534_p0 = scmp.ge.s32.totalorder %s2025_s25, 1  ;;  %p334_p1 = scmp.lt.s32.totalorder %s2025_s25, 3 }
   0x4   : > { %p1894_p2 = scmp.eq.s32.totalorder %s1532_s29, 0  ;;  %s2027_s14 = smov [#allocation2]  }
   0x5   : > { %p2117_p3 = pnand %p1534_p0, %p334_p1  ;;  %s359_s15 = sshll.u32 %s2027_s14, 4  ;;  %s360_s15 = int_to_ptr.vmem [resolvable:$true] %s359_s15 }
   0x6   : > { %s386_s18 = sshll.u32 %s2502_s11, 4  ;;  %s2028_s19 = smov [#allocation4]   ;;  %s387_s18 = int_to_ptr.hbm [resolvable:$true] %s386_s18 }
   0x7   : > { %p1887_p4 = pneg %p2117_p3  ;;  %s388_s20 = sshll.u32 %s2028_s19, 4  ;;  %s389_s20 = int_to_ptr.vmem [resolvable:$true] %s388_s20 }
   0x8   : > { %s2029_s21 = smov 64   ;;  %s2030_s22 = smov 4  }
   0x9   : > { %p1888_p5 = pnand %p1894_p2, %p1887_p4  ;;  %414 = sbr.rel (%p2117_p3) target bundleno = 2197 (0x895), region = 72 }
   0xb   : > { %1890 = dma.hbm_to_vmem [thread:$0]  (!%p1888_p5), %s358_s28, 1024, %s360_s15, [#allocation3], %s2029_s21, %s2029_s21, %s2030_s22  }
   0xc   : > { %1893 = dma.hbm_to_vmem [thread:$0]  (!%p1888_p5), %s387_s18, 2048, %s389_s20, [#allocation5], %s2029_s21, %s2029_s21, %s2030_s22  }
   0xe   : > { %2016 = dma.done.wait (%p1894_p2), [#allocation3], 1024  }
   0xf   : > { %2018 = vsyncadd (%p1894_p2), [#allocation3], 4294966272 }
  0x10   : > { %2020 = dma.done.wait (%p1894_p2), [#allocation5], 2048  }
  0x11   : > { %2022 = vsyncadd (%p1894_p2), [#allocation5], 4294965248  ;;  %p462_p6 = scmp.lt.s32.totalorder %s1532_s29, 1  ;;  %vm472_vm0 = vcmask 1044480   ;;  %v2031_v2 = vmov 128.0   ;;  %vm740_vm5 = vcmask 261120  }
  0x12   : > { %1921 = vrcp.f32 %v2031_v2  ;;  %v1629_v3 = vld [vmem:[%s2494_s3 + $0xa8] sm:$0xf]  ;;  %v1837_v4 = vld [vmem:[%s2494_s3 + $0xb0] sm:$0xf0]  ;;  %v1836_v5 = vld [vmem:[%s2494_s3 + $0xac] sm:$0xf] }
  0x13   : > { %s2507_s29 = smov (!%p462_p6, %s1532_s29), 1  ;;  %v1630_v6 = vor.u32 %v1837_v4, %v1629_v3  ;;  %v1631_v7 = vld [vmem:[%s2494_s3 + $0xb4] sm:$0xf0]  ;;  %v1637_v8 = vld [vmem:[%s2494_s3 + $0xb0] sm:$0xf]  ;;  %vm777_vm6 = vcmask 1041408  }
  0x14   : > { %s1541_s23 = sshll.u32 %s2507_s29, 3  ;;  %v1838_v9 = vld [vmem:[%s2494_s3 + $0xb8] sm:$0xf0]  ;;  %v1634_v10 = vor.u32 %v1836_v5, %v1631_v7  ;;  %v1617_v23 = vld [vmem:[%s2494_s3 + $0x90] sm:$0xf]  ;;  %s2032_s16 = smov 32  }
  0x15   : > { %s465_s27 = scalar_lea.vmem %s2491_s0, %s1541_s23  ;;  %v1638_v11 = vor.u32 %v1838_v9, %v1637_v8  ;;  %681 = vmatpush.bf16.msra.mxu0 %v1630_v6  ;;  %v1834_v24 = vld [vmem:[%s2494_s3 + $0x98] sm:$0xf0]  ;;  %v1833_v25 = vld [vmem:[%s2494_s3 + $0x94] sm:$0xf]  ;;  %v1619_v27 = vld [vmem:[%s2494_s3 + $0x9c] sm:$0xf0] }
  0x16   : > { %v2141_v0 = vld [vmem:[%s465_s27] sm:$0x1f]  ;;  %694 = vmatpush.bf16.msra.mxu1 %v1634_v10  ;;  %v1618_v26 = vor.u32 %v1834_v24, %v1617_v23  ;;  %v1625_v28 = vld [vmem:[%s2494_s3 + $0x98] sm:$0xf]  ;;  %v1622_v30 = vor.u32 %v1833_v25, %v1619_v27  ;;  %v1830_v34 = vld [vmem:[%s2494_s3 + $0x7c] sm:$0xf]  ;;  %s469_s27 = scalar_lea.vmem %s2504_s13, %s1541_s23 }
  0x17   : > { %v473_v1 = vsel %vm472_vm0, %v2141_v0, 0.0  ;;  %707 = vmatpush.bf16.msra.mxu2 %v1638_v11  ;;  %v1835_v29 = vld [vmem:[%s2494_s3 + $0xa0] sm:$0xf0]  ;;  %v1605_v32 = vld [vmem:[%s2494_s3 + $0x78] sm:$0xf]  ;;  %s2033_s17 = smov 96  }
  0x18   : > { %474 = vadd.xlane.f32.xlu0 %v473_v1  ;;  %v1922_v12 = vpop.eup %1921  ;;  %v1626_v31 = vor.u32 %v1835_v29, %v1625_v28  ;;  %v1831_v33 = vld [vmem:[%s2494_s3 + $0x80] sm:$0xf0]  ;;  %v1607_v36 = vld [vmem:[%s2494_s3 + $0x84] sm:$0xf0]  ;;  %v1613_v37 = vld [vmem:[%s2494_s3 + $0x80] sm:$0xf] }
  0x19   : > { %v477_v13 = vmul.f32 128.0, %v1922_v12  ;;  %vm481_vm1 = vweird.f32 %v1922_v12  ;;  %682 = vmatpush.bf16.msra.mxu0 %v1618_v26  ;;  %v1606_v35 = vor.u32 %v1831_v33, %v1605_v32  ;;  %v1832_v38 = vld [vmem:[%s2494_s3 + $0x88] sm:$0xf0]  ;;  %v1610_v39 = vor.u32 %v1830_v34, %v1607_v36  ;;  %v1593_v41 = vld [vmem:[%s2494_s3 + $0x60] sm:$0xf]  ;;  %s2035_s18 = smov 64  }
  0x1a   : > { %695 = vmatpush.bf16.msra.mxu1 %v1622_v30  ;;  %v1614_v40 = vor.u32 %v1832_v38, %v1613_v37  ;;  %v1828_v42 = vld [vmem:[%s2494_s3 + $0x68] sm:$0xf0]  ;;  %v1827_v43 = vld [vmem:[%s2494_s3 + $0x64] sm:$0xf]  ;;  %v1595_v45 = vld [vmem:[%s2494_s3 + $0x6c] sm:$0xf0] }
  0x1b   : > { %v478_v14 = vsub.f32 1.0, %v477_v13  ;;  %708 = vmatpush.bf16.msra.mxu2 %v1626_v31  ;;  %v1594_v44 = vor.u32 %v1828_v42, %v1593_v41  ;;  %v1601_v46 = vld [vmem:[%s2494_s3 + $0x68] sm:$0xf]  ;;  %v1829_v47 = vld [vmem:[%s2494_s3 + $0x70] sm:$0xf0]  ;;  %v1598_v48 = vor.u32 %v1827_v43, %v1595_v45  ;;  %vm778_vm7 = vcmask 1042432  }
  0x1c   : > { %v1602_v49 = vor.u32 %v1829_v47, %v1601_v46  ;;  %v1581_v50 = vld [vmem:[%s2494_s3 + $0x48] sm:$0xf]  ;;  %v1825_v51 = vld [vmem:[%s2494_s3 + $0x50] sm:$0xf0]  ;;  %v1824_v52 = vld [vmem:[%s2494_s3 + $0x4c] sm:$0xf] }
  0x1d   : > { %v479_v15 = vmul.f32 %v1922_v12, %v478_v14  ;;  %683 = vmatpush.bf16.msra.mxu0 %v1606_v35  ;;  %v1582_v53 = vor.u32 %v1825_v51, %v1581_v50  ;;  %v1583_v54 = vld [vmem:[%s2494_s3 + $0x54] sm:$0xf0]  ;;  %v1589_v55 = vld [vmem:[%s2494_s3 + $0x50] sm:$0xf]  ;;  %v1826_v56 = vld [vmem:[%s2494_s3 + $0x58] sm:$0xf0] }
  0x1e   : > { %696 = vmatpush.bf16.msra.mxu1 %v1610_v39  ;;  %v1586_v57 = vor.u32 %v1824_v52, %v1583_v54  ;;  %v1590_v58 = vor.u32 %v1826_v56, %v1589_v55  ;;  %v1569_v59 = vld [vmem:[%s2494_s3 + $0x30] sm:$0xf]  ;;  %v1822_v60 = vld [vmem:[%s2494_s3 + $0x38] sm:$0xf0]  ;;  %v1821_v61 = vld [vmem:[%s2494_s3 + $0x34] sm:$0xf] }
  0x1f   : > { %v480_v16 = vadd.f32 %v1922_v12, %v479_v15  ;;  %709 = vmatpush.bf16.msra.mxu2 %v1614_v40  ;;  %v1570_v62 = vor.u32 %v1822_v60, %v1569_v59  ;;  %v1571_v63 = vld [vmem:[%s2494_s3 + $0x3c] sm:$0xf0]  ;;  %v1577_v1 = vld [vmem:[%s2494_s3 + $0x38] sm:$0xf]  ;;  %v1823_v2 = vld [vmem:[%s2494_s3 + $0x40] sm:$0xf0] }
  0x20   : > { %v1574_v3 = vor.u32 %v1821_v61, %v1571_v63  ;;  %v1578_v4 = vor.u32 %v1823_v2, %v1577_v1  ;;  %v1557_v5 = vld [vmem:[%s2494_s3 + $0x18] sm:$0xf]  ;;  %v1819_v6 = vld [vmem:[%s2494_s3 + $0x20] sm:$0xf0]  ;;  %v1818_v7 = vld [vmem:[%s2494_s3 + $0x1c] sm:$0xf] }
  0x21   : > { %v2163_v17 = vsel %vm481_vm1, %v1922_v12, %v480_v16  ;;  %684 = vmatpush.bf16.msra.mxu0 %v1594_v44  ;;  %v1558_v8 = vor.u32 %v1819_v6, %v1557_v5  ;;  %v1559_v9 = vld [vmem:[%s2494_s3 + $0x24] sm:$0xf0]  ;;  %v1565_v10 = vld [vmem:[%s2494_s3 + $0x20] sm:$0xf]  ;;  %v1820_v11 = vld [vmem:[%s2494_s3 + $0x28] sm:$0xf0] }
  0x22   : > { %697 = vmatpush.bf16.msra.mxu1 %v1598_v48  ;;  %v1562_v12 = vor.u32 %v1818_v7, %v1559_v9  ;;  %v1566_v13 = vor.u32 %v1820_v11, %v1565_v10  ;;  %v1545_v14 = vld [vmem:[%s2494_s3] sm:$0xf]  ;;  %v1816_v15 = vld [vmem:[%s2494_s3 + $0x8] sm:$0xf0]  ;;  %v1815_v16 = vld [vmem:[%s2494_s3 + $0x4] sm:$0xf] }
  0x23   : > { %710 = vmatpush.bf16.msra.mxu2 %v1602_v49  ;;  %v1915_v34 = vld [vmem:[%s2492_s1] ss:$0 sm:$0xff]  ;;  %v2034_v50 = vmov 65535   ;;  %vm760_vm8 = vcmask 36864   ;;  %vm773_vm9 = vcmask 39936  }
  0x24   : > { %v1916_v37 = vld [vmem:[%s2493_s2] ss:$0 sm:$0xff]  ;;  %v779_v51 = vsel %vm777_vm6, 4294967295, %v2034_v50 }
  0x25   : > { %685 = vmatpush.bf16.msra.mxu0 %v1582_v53  ;;  %v545_v41 = vld [vmem:[%s2495_s4] sm:$0x7] }
  0x26   : > { %698 = vmatpush.bf16.msra.mxu1 %v1586_v57  ;;  %v548_v42 = vperm.slane %v545_v41, 1  ;;  %v547_v43 = vperm.slane %v545_v41, 0  ;;  %v549_v48 = vperm.slane %v545_v41, 2  ;;  %v2312_v57 = vsel %vm778_vm7, %v779_v51, 0  ;;  %v1839_v63 = vld [vmem:[#allocation2] sm:$0xff] }
  0x27   : > { %711 = vmatpush.bf16.msra.mxu2 %v1590_v58 }
  0x29   : > { %686 = vmatpush.bf16.msra.mxu0 %v1570_v62  ;;  %v1840_v62 = vld [vmem:[#allocation2 + $0x8] sm:$0xff] }
  0x2a   : > { %699 = vmatpush.bf16.msra.mxu1 %v1574_v3 }
  0x2b   : > { %712 = vmatpush.bf16.msra.mxu2 %v1578_v4 }
  0x2d   : > { %687 = vmatpush.bf16.msra.mxu0 %v1558_v8 }
  0x2e   : > { %700 = vmatpush.bf16.msra.mxu1 %v1562_v12 }
  0x2f   : > { %713 = vmatpush.bf16.msra.mxu2 %v1566_v13 }
  0x8b   : > { %v475_v18 = vpop.xlane.xlu0 %474 }
  0x8c   : > { %v483_v19 = vmul.f32 %v2163_v17, %v475_v18  ;;  %v1546_v18 = vor.u32 %v1816_v15, %v1545_v14 }
  0x8e   : > { %v2167_v20 = vsub.f32 %v2141_v0, %v483_v19  ;;  %v1547_v19 = vld [vmem:[%s2494_s3 + $0xc] sm:$0xf0]  ;;  %688 = vmatpush.bf16.msra.mxu0 %v1546_v18 }
  0x8f   : > { %v1550_v23 = vor.u32 %v1815_v16, %v1547_v19 }
  0x90   : > { %v485_v21 = vmul.f32 %v2167_v20, %v2167_v20 }
  0x91   : > { %701 = vmatpush.bf16.msra.mxu1 %v1550_v23 }
  0x92   : > { %v486_v22 = vsel %vm472_vm0, %v485_v21, 0.0  ;;  %v1553_v21 = vld [vmem:[%s2494_s3 + $0x8] sm:$0xf] }
  0x93   : > { %487 = vadd.xlane.f32.xlu0 %v486_v22  ;;  %v1817_v22 = vld [vmem:[%s2494_s3 + $0x10] sm:$0xf0] }
  0x94   : > { %v1554_v24 = vor.u32 %v1817_v22, %v1553_v21 }
  0x96   : > { %714 = vmatpush.bf16.msra.mxu2 %v1554_v24 }
  0x9a   : > { %907 = vmatpush.bf16.msrb.mxu2 %v1840_v62 }
  0x9e   : > { %908 = vmatpush.bf16.msrb.mxu2 %v1839_v63 }
 0x106   : > { %v488_v25 = vpop.xlane.xlu0 %487 }
 0x107   : > { %v489_v26 = vmul.f32 %v488_v25, %v2163_v17 }
 0x109   : > { %v490_v27 = vadd.f32 1e-05, %v489_v26 }
 0x10b   : > { %1923 = vrsqrt.f32 %v490_v27  ;;  %vm497_vm3 = vweird.f32 %v490_v27 }
 0x111   : > { %v1924_v28 = vpop.eup %1923 }
 0x112   : > { %v492_v29 = vmul.f32 %v1924_v28, %v490_v27  ;;  %vm498_vm2 = vweird.f32 %v1924_v28 }
 0x113   : > { %vm499_vm4 = vmor %vm497_vm3, %vm498_vm2 }
 0x114   : > { %v493_v30 = vmul.f32 %v1924_v28, %v492_v29 }
 0x116   : > { %v494_v31 = vmul.f32 0.5, %v493_v30 }
 0x118   : > { %v495_v32 = vsub.f32 1.5, %v494_v31 }
 0x11a   : > { %v496_v33 = vmul.f32 %v1924_v28, %v495_v32 }
 0x11c   : > { %v500_v35 = vsel %vm499_vm4, %v1924_v28, %v496_v33 }
 0x11d   : > { %v501_v36 = vmul.f32 %v500_v35, %v2167_v20 }
 0x11f   : > { %v506_v38 = vmul.f32 %v1915_v34, %v501_v36 }
 0x121   : > { %v511_v39 = vadd.f32 %v1916_v37, %v506_v38 }
 0x123   : > { %v512_v40 = vpack.c.bf16 %v511_v39, %v511_v39 }
 0x125   : > { %689 = vmatmul.bf16.vlgmr.msra.gmra.mxu0 %v512_v40  ;;  %702 = vmatmul.bf16.vlgmr.msra.gmra.mxu1 %v512_v40 }
 0x126   : > { %715 = vmatmul.bf16.vlgmr.msra.gmra.mxu2 %v512_v40 }
 0x1a2   : > { %v690_v44 = vpop.f32.mrf.mxu0  ;;  %v703_v45 = vpop.f32.mrf.mxu1 }
 0x1a3   : > { %v704_v46 = vadd.f32 %v703_v45, %v548_v42  ;;  %v691_v20 = vadd.f32 %v690_v44, %v547_v43 }
 0x1a5   : > { %v738_v47 = vpack.c.bf16 %v704_v46, %v704_v46  ;;  %v736_v52 = vmul.f32 0.17677669, %v691_v20 }
 0x1a7   : > { %1002 = vrot.lane.b32.xlu0 %v738_v47, %s2032_s16  ;;  %802 = vrot.lane.b32.xlu2 %v738_v47, %s2033_s17  ;;  %v745_v49 = vsel %vm740_vm5, %v738_v47, 0  ;;  %v737_v59 = vpack.c.bf16 %v736_v52, %v736_v52 }
 0x1a8   : > { %754 = vmatpush.bf16.xpose.msra.mxu3 %v745_v49 }
 0x1a9   : > { %v716_v53 = vpop.f32.mrf.mxu2 }
 0x1aa   : > { %v717_v54 = vadd.f32 %v716_v53, %v549_v48  ;;  %v692_v55 = vpop.f32.mrf.mxu0  ;;  %v705_v56 = vpop.f32.mrf.mxu1 }
 0x1ac   : > { %v2314_v58 = vpack.c.bf16 %v717_v54, %v717_v54 }
 0x1ae   : > { %v782_v60 = vand.u32 %v2312_v57, %v2314_v58 }
 0x1af   : > { %799 = vrot.lane.b32.xlu2 %v737_v59, %s2033_s17  ;;  %1639 = vmatmul.msk.bf16.vlgmr.msra.gmra.mxu3 %vm740_vm5, %v737_v59 }
 0x1b0   : > { %791 = vmatpush.bf16.msrb.mxu3 %v782_v60 }
 0x1b1   : > { %v718_v61 = vpop.f32.mrf.mxu2 }
 0x1b7   : > { %1000 = vrot.lane.b32.xlu2 %v737_v59, %s2032_s16 }
 0x1bf   : > { %914 = vrot.lane.b32.xlu2 %v737_v59, %s2035_s18 }
 0x201   : > { %v803_v1 = vpop.permute.xlu2 %802 }
 0x202   : > { %v808_v2 = vsel %vm740_vm5, %v803_v1, 0 }
 0x203   : > { %817 = vmatpush.bf16.xpose.msra.mxu3 %v808_v2 }
 0x209   : > { %v800_v18 = vpop.permute.xlu2 %799 }
 0x211   : > { %v1001_v22 = vpop.permute.xlu2 %1000 }
 0x219   : > { %v1003_v3 = vpop.permute.xlu0 %1002  ;;  %v915_v23 = vpop.permute.xlu2 %914 }
 0x21a   : > { %v1008_v4 = vsel %vm740_vm5, %v1003_v3, 0  ;;  %v1842_v3 = vld [vmem:[#allocation2 + $0x18] sm:$0xff] }
 0x21b   : > { %1017 = vmatpush.bf16.xpose.msra.mxu2 %v1008_v4  ;;  %879 = vmatpush.bf16.msrb.mxu1 %v1842_v3  ;;  %v1841_v4 = vld [vmem:[#allocation2 + $0x10] sm:$0xff] }
 0x21c   : > { %v1709_v3 = vld [vmem:[%s2500_s9 + $0x30] sm:$0xf] }
 0x21f   : > { %880 = vmatpush.bf16.msrb.mxu1 %v1841_v4  ;;  %v1854_v4 = vld [vmem:[%s2500_s9 + $0x34] sm:$0xf0] }
 0x232   : > { %v756_v5 = vpop.f32.mrf.mxu3 }
 0x233   : > { %v761_v6 = vsel %vm760_vm8, %v756_v5, -inf }
 0x234   : > { %762 = vmax.xlane.f32.xlu1 %v761_v6 }
 0x23a   : > { %v758_v7 = vpop.f32.mrf.mxu3 }
 0x23b   : > { %v1843_v7 = vld [vmem:[#allocation2 + $0x20] sm:$0xff] }
 0x2a7   : > { %v763_v8 = vpop.xlane.xlu1 %762 }
 0x2a8   : > { %v764_v9 = vsub.f32 %v756_v5, %v763_v8  ;;  %v1844_v5 = vld [vmem:[#allocation2 + $0x28] sm:$0xff] }
 0x2a9   : > { %992 = vmatpush.bf16.msra.mxu1 %v1844_v5  ;;  %v1853_v5 = vld [vmem:[%s2500_s9 + $0x34] sm:$0xf] }
 0x2aa   : > { %v765_v10 = vmul.f32 1.442695, %v764_v9 }
 0x2ac   : > { %1925 = vpow2.f32 %v765_v10 }
 0x2ad   : > { %993 = vmatpush.bf16.msra.mxu1 %v1843_v7  ;;  %v1711_v7 = vld [vmem:[%s2500_s9 + $0x38] sm:$0xf0] }
 0x2b2   : > { %v1926_v11 = vpop.eup %1925 }
 0x2b3   : > { %v767_v12 = vsel %vm760_vm8, %v1926_v11, 0.0 }
 0x2b4   : > { %768 = vadd.xlane.f32.xlu1 %v767_v12  ;;  %v1846_v12 = vld [vmem:[#allocation2 + $0x38] sm:$0xff] }
 0x2cd   : > { %916 = vrot.lane.b32.xlu1 %v738_v47, %s2035_s18 }
 0x327   : > { %v769_v13 = vpop.xlane.xlu1 %768 }
 0x328   : > { %1927 = vrcp.f32 %v769_v13 }
 0x32e   : > { %v1928_v14 = vpop.eup %1927 }
 0x32f   : > { %v771_v15 = vmul.f32 %v1928_v14, %v1926_v11 }
 0x331   : > { %v772_v16 = vpack.c.bf16 %v771_v15, %v771_v15 }
 0x333   : > { %1640 = vmatmul.msk.bf16.vlgmr.msrb.gmra.mxu3 %vm773_vm9, %v772_v16 }
 0x33f   : > { %v917_v19 = vpop.permute.xlu1 %916 }
 0x340   : > { %v922_v21 = vsel %vm740_vm5, %v917_v19, 0 }
 0x341   : > { %931 = vmatpush.bf16.xpose.msrb.mxu3 %v922_v21  ;;  %v1845_v21 = vld [vmem:[#allocation2 + $0x30] sm:$0xff] }
 0x343   : > { %1641 = vmatmul.msk.bf16.vlgmr.msra.gmra.mxu3 %vm740_vm5, %v800_v18 }
 0x353   : > { %1661 = vmatmul.msk.bf16.vlgmr.msrb.gmra.mxu3 %vm740_vm5, %v915_v23 }
 0x3b6   : > { %v793_v24 = vpop.f32.mrf.mxu3 }
 0x3b7   : > { %v797_v25 = vpack.c.bf16 %v793_v24, %v793_v24 }
 0x3b9   : > { %1660 = vmatmul.msk.bf16.vlgmr.msrb.gmra.mxu2 %vm740_vm5, %v797_v25 }
 0x3be   : > { %v795_v26 = vpop.f32.mrf.mxu3 }
 0x3c6   : > { %v819_v27 = vpop.f32.mrf.mxu3 }
 0x3c7   : > { %v823_v28 = vsel %vm760_vm8, %v819_v27, -inf }
 0x3c8   : > { %824 = vmax.xlane.f32.xlu2 %v823_v28 }
 0x3c9   : > { %1672 = vmatmul.msk.bf16.vlgmr.msra.gmra.mxu2 %vm740_vm5, %v1001_v22 }
 0x3ce   : > { %v821_v29 = vpop.f32.mrf.mxu3 }
 0x3d6   : > { %v933_v30 = vpop.f32.mrf.mxu3 }
 0x3d7   : > { %v937_v31 = vsel %vm760_vm8, %v933_v30, -inf }
 0x3d8   : > { %938 = vmax.xlane.f32.xlu1 %v937_v31 }
 0x3de   : > { %v935_v32 = vpop.f32.mrf.mxu3 }
 0x3df   : > { %v1917_v32 = vld [vmem:[%s2497_s6] ss:$0 sm:$0xff] }
 0x43b   : > { %v825_v33 = vpop.xlane.xlu2 %824 }
 0x43c   : > { %v826_v34 = vsub.f32 %v819_v27, %v825_v33  ;;  %v2335_v35 = vpop.f32.mrf.mxu2 }
 0x43e   : > { %v827_v36 = vmul.f32 1.442695, %v826_v34 }
 0x440   : > { %1929 = vpow2.f32 %v827_v36 }
 0x444   : > { %v912_v37 = vpop.f32.mrf.mxu2 }
 0x446   : > { %v1930_v38 = vpop.eup %1929 }
 0x447   : > { %v829_v39 = vsel %vm760_vm8, %v1930_v38, 0.0 }
 0x448   : > { %830 = vadd.xlane.f32.xlu2 %v829_v39  ;;  %v1861_v39 = vld [vmem:[%s2500_s9 + $0x74] sm:$0xf] }
 0x44b   : > { %v939_v40 = vpop.xlane.xlu1 %938 }
 0x44c   : > { %v940_v41 = vsub.f32 %v933_v30, %v939_v40  ;;  %v1019_v42 = vpop.f32.mrf.mxu2  ;;  %v1743_v40 = vld [vmem:[%s2500_s9 + $0x78] sm:$0xf0] }
 0x44d   : > { %v1023_v43 = vsel %vm760_vm8, %v1019_v42, -inf }
 0x44e   : > { %v941_v44 = vmul.f32 1.442695, %v940_v41  ;;  %1024 = vmax.xlane.f32.xlu0 %v1023_v43  ;;  %v1746_v41 = vor.u32 %v1861_v39, %v1743_v40 }
 0x450   : > { %1931 = vpow2.f32 %v941_v44  ;;  %1240 = vmatpush.bf16.msrb.mxu2 %v1746_v41 }
 0x454   : > { %v1021_v45 = vpop.f32.mrf.mxu2 }
 0x456   : > { %v1932_v46 = vpop.eup %1931 }
 0x457   : > { %v943_v20 = vsel %vm760_vm8, %v1932_v46, 0.0 }
 0x458   : > { %944 = vadd.xlane.f32.xlu1 %v943_v20  ;;  %v1733_v20 = vld [vmem:[%s2500_s9 + $0x60] sm:$0xf] }
 0x462   : > { %836 = vrot.lane.b32.xlu0 %v2314_v58, %s2033_s17 }
 0x471   : > { %949 = vrot.lane.b32.xlu1 %v2314_v58, %s2035_s18 }
 0x4bb   : > { %v831_v50 = vpop.xlane.xlu2 %830 }
 0x4c1   : > { %v1025_v47 = vpop.xlane.xlu0 %1024 }
 0x4c2   : > { %v1026_v48 = vsub.f32 %v1019_v42, %v1025_v47  ;;  %v1860_v47 = vld [vmem:[%s2500_s9 + $0x64] sm:$0xf0] }
 0x4c4   : > { %v1027_v49 = vmul.f32 1.442695, %v1026_v48  ;;  %v1859_v48 = vld [vmem:[%s2500_s9 + $0x64] sm:$0xf] }
 0x4c6   : > { %1933 = vpow2.f32 %v1027_v49  ;;  %v1734_v49 = vor.u32 %v1860_v47, %v1733_v20  ;;  %v1877_v20 = vld [vmem:[#allocation4 + $0x70] sm:$0xff]  ;;  %v1876_v47 = vld [vmem:[#allocation4 + $0x68] sm:$0xff] }
 0x4c7   : > { %1935 = vrcp.f32 %v831_v50  ;;  %v1735_v50 = vld [vmem:[%s2500_s9 + $0x68] sm:$0xf0] }
 0x4cb   : > { %v945_v59 = vpop.xlane.xlu1 %944 }
 0x4cc   : > { %v1934_v51 = vpop.eup %1933  ;;  %1937 = vrcp.f32 %v945_v59 }
 0x4cd   : > { %v1029_v52 = vsel %vm760_vm8, %v1934_v51, 0.0  ;;  %v1936_v53 = vpop.eup %1935 }
 0x4ce   : > { %1030 = vadd.xlane.f32.xlu2 %v1029_v52  ;;  %v833_v54 = vmul.f32 %v1936_v53, %v1930_v38  ;;  %v1862_v38 = vld [vmem:[%s2500_s9 + $0x74] sm:$0xf0]  ;;  %v1725_v52 = vld [vmem:[%s2500_s9 + $0x50] sm:$0xf] }
 0x4cf   : > { %v1858_v53 = vld [vmem:[%s2500_s9 + $0x54] sm:$0xf0] }
 0x4d0   : > { %v834_v60 = vpack.c.bf16 %v833_v54, %v833_v54  ;;  %v1857_v54 = vld [vmem:[%s2500_s9 + $0x54] sm:$0xf] }
 0x4d2   : > { %v1938_v61 = vpop.eup %1937 }
 0x4d3   : > { %v947_v63 = vmul.f32 %v1938_v61, %v1932_v46  ;;  %v1856_v61 = vld [vmem:[%s2500_s9 + $0x44] sm:$0xf0] }
 0x4d4   : > { %v837_v55 = vpop.permute.xlu0 %836 }
 0x4d5   : > { %v842_v56 = vand.u32 %v837_v55, %v2312_v57  ;;  %v948_v2 = vpack.c.bf16 %v947_v63, %v947_v63  ;;  %v1726_v55 = vor.u32 %v1858_v53, %v1725_v52  ;;  %v1874_v52 = vld [vmem:[#allocation4 + $0x58] sm:$0xff] }
 0x4d7   : > { %851 = vmatpush.bf16.msrb.mxu0 %v842_v56  ;;  %v1727_v56 = vld [vmem:[%s2500_s9 + $0x58] sm:$0xf0] }
 0x4d8   : > { %v1730_v59 = vor.u32 %v1857_v54, %v1727_v56  ;;  %v1864_v54 = vld [vmem:[#allocation4 + $0x8] sm:$0xff] }
 0x4da   : > { %1642 = vmatmul.msk.bf16.vlgmr.msrb.gmra.mxu0 %vm773_vm9, %v834_v60  ;;  %v1717_v60 = vld [vmem:[%s2500_s9 + $0x40] sm:$0xf] }
 0x4db   : > { %v1718_v63 = vor.u32 %v1856_v61, %v1717_v60  ;;  %v1863_v60 = vld [vmem:[#allocation4] sm:$0xff] }
 0x4e3   : > { %v950_v62 = vpop.permute.xlu1 %949 }
 0x4e4   : > { %v955_v1 = vand.u32 %v950_v62, %v2312_v57  ;;  %v1855_v62 = vld [vmem:[%s2500_s9 + $0x44] sm:$0xf] }
 0x4e6   : > { %1035 = vrot.lane.b32.xlu2 %v2314_v58, %s2032_s16  ;;  %964 = vmatpush.bf16.msra.mxu0 %v955_v1  ;;  %v1719_v1 = vld [vmem:[%s2500_s9 + $0x48] sm:$0xf0] }
 0x4ea   : > { %1662 = vmatmul.msk.bf16.vlgmr.msra.gmra.mxu0 %vm773_vm9, %v948_v2  ;;  %v1722_v2 = vor.u32 %v1855_v62, %v1719_v1 }
 0x4eb   : > { %1078 = vmatpush.bf16.msrb.mxu0 %v1846_v12  ;;  %v1703_v12 = vld [vmem:[%s2500_s9 + $0x28] sm:$0xf0] }
 0x4ef   : > { %1079 = vmatpush.bf16.msrb.mxu0 %v1845_v21  ;;  %v1685_v21 = vld [vmem:[%s2500_s9] sm:$0xf] }
 0x541   : > { %v1031_v6 = vpop.xlane.xlu2 %1030 }
 0x542   : > { %1939 = vrcp.f32 %v1031_v6  ;;  %v1710_v6 = vor.u32 %v1854_v4, %v1709_v3  ;;  %v1871_v4 = vld [vmem:[#allocation4 + $0x40] sm:$0xff] }
 0x548   : > { %v1940_v8 = vpop.eup %1939 }
 0x549   : > { %v1033_v9 = vmul.f32 %v1940_v8, %v1934_v51  ;;  %v1036_v10 = vpop.permute.xlu2 %1035  ;;  %v1738_v51 = vor.u32 %v1859_v48, %v1735_v50  ;;  %v1714_v8 = vor.u32 %v1853_v5, %v1711_v7  ;;  %v1866_v48 = vld [vmem:[#allocation4 + $0x18] sm:$0xff]  ;;  %v1865_v50 = vld [vmem:[#allocation4 + $0x10] sm:$0xff] }
 0x54a   : > { %v1041_v11 = vand.u32 %v1036_v10, %v2312_v57  ;;  %v1852_v10 = vld [vmem:[%s2500_s9 + $0x24] sm:$0xf0] }
 0x54b   : > { %v1034_v58 = vpack.c.bf16 %v1033_v9, %v1033_v9  ;;  %1241 = vmatpush.bf16.msrb.mxu2 %v1738_v51  ;;  %v1701_v9 = vld [vmem:[%s2500_s9 + $0x20] sm:$0xf] }
 0x54c   : > { %1050 = vmatpush.bf16.msra.mxu3 %v1041_v11  ;;  %v1851_v11 = vld [vmem:[%s2500_s9 + $0x24] sm:$0xf]  ;;  %v1141_v51 = vld [vmem:[%s2501_s10] sm:$0x3] }
 0x54d   : > { %v1143_v53 = vperm.slane %v1141_v51, 0  ;;  %v1144_v62 = vperm.slane %v1141_v51, 1 }
 0x54f   : > { %1673 = vmatmul.msk.bf16.vlgmr.msra.gmra.mxu3 %vm773_vm9, %v1034_v58  ;;  %1242 = vmatpush.bf16.msrb.mxu2 %v1730_v59  ;;  %v1702_v58 = vor.u32 %v1852_v10, %v1701_v9 }
 0x553   : > { %1243 = vmatpush.bf16.msrb.mxu2 %v1722_v2 }
 0x557   : > { %v853_v13 = vpop.f32.mrf.mxu0  ;;  %1244 = vmatpush.bf16.msrb.mxu2 %v1714_v8 }
 0x558   : > { %v857_v14 = vpack.c.bf16 %v853_v13, %v853_v13  ;;  %v1706_v13 = vor.u32 %v1851_v11, %v1703_v12 }
 0x55a   : > { %1651 = vmatmul.msk.bf16.vlgmr.msrb.gmra.mxu1 %vm740_vm5, %v857_v14  ;;  %v1693_v14 = vld [vmem:[%s2500_s9 + $0x10] sm:$0xf] }
 0x55b   : > { %1245 = vmatpush.bf16.msrb.mxu2 %v1706_v13 }
 0x55f   : > { %v855_v15 = vpop.f32.mrf.mxu0 }
 0x560   : > { %v1850_v15 = vld [vmem:[%s2500_s9 + $0x14] sm:$0xf0] }
 0x567   : > { %v966_v16 = vpop.f32.mrf.mxu0 }
 0x568   : > { %v970_v18 = vpack.c.bf16 %v966_v16, %v966_v16  ;;  %v1849_v16 = vld [vmem:[%s2500_s9 + $0x14] sm:$0xf] }
 0x56a   : > { %1671 = vmatmul.msk.bf16.vlgmr.msra.gmra.mxu1 %vm740_vm5, %v970_v18  ;;  %v1694_v18 = vor.u32 %v1850_v15, %v1693_v14 }
 0x56f   : > { %v968_v19 = vpop.f32.mrf.mxu0 }
 0x570   : > { %v1695_v19 = vld [vmem:[%s2500_s9 + $0x18] sm:$0xf0] }
 0x5d2   : > { %v1052_v22 = vpop.f32.mrf.mxu3 }
 0x5d3   : > { %v1056_v57 = vpack.c.bf16 %v1052_v22, %v1052_v22  ;;  %v1848_v22 = vld [vmem:[%s2500_s9 + $0x4] sm:$0xf0] }
 0x5d5   : > { %1682 = vmatmul.msk.bf16.vlgmr.msrb.gmra.mxu0 %vm740_vm5, %v1056_v57  ;;  %v1698_v57 = vor.u32 %v1849_v16, %v1695_v19 }
 0x5d7   : > { %v882_v23 = vpop.f32.mrf.mxu1  ;;  %1246 = vmatpush.bf16.msrb.mxu2 %v1698_v57 }
 0x5d8   : > { %v911_v26 = vadd.f32 %v2335_v35, %v882_v23  ;;  %v1741_v35 = vld [vmem:[%s2500_s9 + $0x70] sm:$0xf]  ;;  %v1847_v23 = vld [vmem:[%s2500_s9 + $0x4] sm:$0xf] }
 0x5da   : > { %v1054_v24 = vpop.f32.mrf.mxu3 }
 0x5db   : > { %v1687_v24 = vld [vmem:[%s2500_s9 + $0x8] sm:$0xf0] }
 0x5df   : > { %v884_v25 = vpop.f32.mrf.mxu1 }
 0x5e0   : > { %v1686_v25 = vor.u32 %v1848_v22, %v1685_v21 }
 0x5e7   : > { %v995_v27 = vpop.f32.mrf.mxu1 }
 0x5e8   : > { %v999_v28 = vadd.f32 %v995_v27, %v911_v26  ;;  %v1690_v26 = vor.u32 %v1847_v23, %v1687_v24 }
 0x5ea   : > { %1247 = vmatpush.bf16.msrb.mxu2 %v1690_v26 }
 0x5ef   : > { %v997_v29 = vpop.f32.mrf.mxu1 }
 0x652   : > { %v1081_v30 = vpop.f32.mrf.mxu0 }
 0x653   : > { %v1085_v31 = vadd.f32 %v1081_v30, %v999_v28 }
 0x655   : > { %v1086_v33 = vadd.f32 %v1085_v31, %v2141_v0  ;;  %v1742_v0 = vor.u32 %v1862_v38, %v1741_v35  ;;  %v1918_v35 = vld [vmem:[%s2498_s7] ss:$0 sm:$0xff] }
 0x657   : > { %v2361_v34 = vadd.f32 %v1917_v32, %v1086_v33  ;;  %1227 = vmatpush.bf16.msrb.mxu1 %v1742_v0 }
 0x659   : > { %v1092_v36 = vsel %vm472_vm0, %v2361_v34, 0.0 }
 0x65a   : > { %1093 = vadd.xlane.f32.xlu0 %v1092_v36  ;;  %v1083_v37 = vpop.f32.mrf.mxu0 }
 0x65b   : > { %1228 = vmatpush.bf16.msrb.mxu1 %v1734_v49  ;;  %v1875_v49 = vld [vmem:[#allocation4 + $0x60] sm:$0xff] }
 0x65f   : > { %1229 = vmatpush.bf16.msrb.mxu1 %v1726_v55  ;;  %v1873_v55 = vld [vmem:[#allocation4 + $0x50] sm:$0xff] }
 0x663   : > { %1230 = vmatpush.bf16.msrb.mxu1 %v1718_v63  ;;  %v1872_v63 = vld [vmem:[#allocation4 + $0x48] sm:$0xff] }
 0x667   : > { %1231 = vmatpush.bf16.msrb.mxu1 %v1710_v6 }
 0x66b   : > { %1232 = vmatpush.bf16.msrb.mxu1 %v1702_v58 }
 0x66f   : > { %1233 = vmatpush.bf16.msrb.mxu1 %v1694_v18 }
 0x673   : > { %1234 = vmatpush.bf16.msrb.mxu1 %v1686_v25 }
 0x6cd   : > { %v1094_v42 = vpop.xlane.xlu0 %1093 }
 0x6ce   : > { %v1095_v43 = vmul.f32 %v1094_v42, %v2163_v17  ;;  %v1870_v42 = vld [vmem:[#allocation4 + $0x38] sm:$0xff] }
 0x6cf   : > { %1429 = vmatpush.bf16.msrb.mxu3 %v1870_v42 }
 0x6d0   : > { %v2379_v44 = vsub.f32 %v2361_v34, %v1095_v43  ;;  %v1869_v43 = vld [vmem:[#allocation4 + $0x30] sm:$0xff] }
 0x6d2   : > { %v1097_v45 = vmul.f32 %v2379_v44, %v2379_v44 }
 0x6d3   : > { %1430 = vmatpush.bf16.msrb.mxu3 %v1869_v43 }
 0x6d4   : > { %v1098_v46 = vsel %vm472_vm0, %v1097_v45, 0.0  ;;  %v1878_v45 = vld [vmem:[#allocation4 + $0x78] sm:$0xff] }
 0x6d5   : > { %1099 = vadd.xlane.f32.xlu2 %v1098_v46  ;;  %1442 = vmatpush.bf16.msra.mxu0 %v1878_v45  ;;  %v1868_v46 = vld [vmem:[#allocation4 + $0x28] sm:$0xff] }
 0x6d7   : > { %1431 = vmatpush.bf16.msrb.mxu3 %v1868_v46 }
 0x6d9   : > { %1443 = vmatpush.bf16.msra.mxu0 %v1877_v20 }
 0x6dd   : > { %1444 = vmatpush.bf16.msra.mxu0 %v1876_v47 }
 0x6e1   : > { %1445 = vmatpush.bf16.msra.mxu0 %v1875_v49 }
 0x6e5   : > { %1446 = vmatpush.bf16.msra.mxu0 %v1874_v52 }
 0x6e9   : > { %1447 = vmatpush.bf16.msra.mxu0 %v1873_v55 }
 0x6ed   : > { %1448 = vmatpush.bf16.msra.mxu0 %v1872_v63 }
 0x6f1   : > { %1449 = vmatpush.bf16.msra.mxu0 %v1871_v4 }
 0x748   : > { %v1100_v27 = vpop.xlane.xlu2 %1099 }
 0x749   : > { %v1101_v28 = vmul.f32 %v1100_v27, %v2163_v17  ;;  %v1919_v17 = vld [vmem:[%s2499_s8] ss:$0 sm:$0xff] }
 0x74b   : > { %v1102_v29 = vadd.f32 1e-05, %v1101_v28 }
 0x74d   : > { %1941 = vrsqrt.f32 %v1102_v29  ;;  %vm1109_vm11 = vweird.f32 %v1102_v29 }
 0x753   : > { %v1942_v30 = vpop.eup %1941 }
 0x754   : > { %v1104_v31 = vmul.f32 %v1942_v30, %v1102_v29  ;;  %vm1110_vm10 = vweird.f32 %v1942_v30 }
 0x755   : > { %vm1111_vm12 = vmor %vm1109_vm11, %vm1110_vm10 }
 0x756   : > { %v1105_v32 = vmul.f32 %v1942_v30, %v1104_v31 }
 0x758   : > { %v1106_v33 = vmul.f32 0.5, %v1105_v32 }
 0x75a   : > { %v1107_v36 = vsub.f32 1.5, %v1106_v33 }
 0x75c   : > { %v1108_v37 = vmul.f32 %v1942_v30, %v1107_v36 }
 0x75e   : > { %v1112_v38 = vsel %vm1111_vm12, %v1942_v30, %v1108_v37 }
 0x75f   : > { %v1113_v39 = vmul.f32 %v1112_v38, %v2379_v44  ;;  %v1867_v44 = vld [vmem:[#allocation4 + $0x20] sm:$0xff] }
 0x760   : > { %1432 = vmatpush.bf16.msrb.mxu3 %v1867_v44  ;;  %v1920_v38 = vld [vmem:[%s2503_s12] ss:$0 sm:$0xff] }
 0x761   : > { %v1118_v0 = vmul.f32 %v1918_v35, %v1113_v39 }
 0x763   : > { %v1123_v40 = vadd.f32 %v1919_v17, %v1118_v0 }
 0x764   : > { %1433 = vmatpush.bf16.msrb.mxu3 %v1866_v48 }
 0x765   : > { %v1124_v41 = vpack.c.bf16 %v1123_v40, %v1123_v40 }
 0x767   : > { %1235 = vmatmul.bf16.vlgmr.msrb.gmra.mxu1 %v1124_v41  ;;  %1248 = vmatmul.bf16.vlgmr.msrb.gmra.mxu2 %v1124_v41 }
 0x768   : > { %1434 = vmatpush.bf16.msrb.mxu3 %v1865_v50 }
 0x76c   : > { %1435 = vmatpush.bf16.msrb.mxu3 %v1864_v54 }
 0x770   : > { %1436 = vmatpush.bf16.msrb.mxu3 %v1863_v60 }
 0x7e4   : > { %v1236_v56 = vpop.f32.mrf.mxu1 }
 0x7e5   : > { %v1237_v59 = vadd.f32 %v1236_v56, %v1143_v53 }
 0x7e7   : > { %v1747_v61 = vmul.f32 -1.702, %v1237_v59 }
 0x7e9   : > { %v1257_v1 = vmul.f32 1.442695, %v1747_v61 }
 0x7ea   : > { %v1249_v2 = vpop.f32.mrf.mxu2 }
 0x7eb   : > { %1943 = vpow2.f32 %v1257_v1  ;;  %v1250_v3 = vadd.f32 %v1249_v2, %v1144_v62 }
 0x7ec   : > { %v1238_v5 = vpop.f32.mrf.mxu1 }
 0x7ed   : > { %v1748_v6 = vmul.f32 -1.702, %v1250_v3 }
 0x7ef   : > { %v1259_v7 = vmul.f32 1.442695, %v1748_v6 }
 0x7f1   : > { %v1944_v8 = vpop.eup %1943  ;;  %1945 = vpow2.f32 %v1259_v7 }
 0x7f2   : > { %v1261_v9 = vadd.f32 1.0, %v1944_v8  ;;  %v1251_v10 = vpop.f32.mrf.mxu2 }
 0x7f4   : > { %1947 = vrcp.f32 %v1261_v9  ;;  %v1274_v15 = vand.u32 2147483648, %v1261_v9  ;;  %v1272_v18 = vand.u32 2147483647, %v1261_v9  ;;  %vm1268_vm14 = vweird.f32 %v1261_v9 }
 0x7f6   : > { %v1275_v57 = vor.u32 1.1754944e-38, %v1274_v15  ;;  %vm1273_vm0 = vcmp.eq.f32.partialorder %v1272_v18, 8.507059e+37 }
 0x7f7   : > { %v1946_v11 = vpop.eup %1945 }
 0x7f8   : > { %v1262_v58 = vadd.f32 1.0, %v1946_v11 }
 0x7fa   : > { %v1948_v12 = vpop.eup %1947  ;;  %1949 = vrcp.f32 %v1262_v58  ;;  %v1289_v26 = vand.u32 2147483648, %v1262_v58  ;;  %v1287_v29 = vand.u32 2147483647, %v1262_v58  ;;  %vm1283_vm2 = vweird.f32 %v1262_v58 }
 0x7fb   : > { %v1264_v13 = vmul.f32 %v1948_v12, %v1261_v9  ;;  %vm1269_vm13 = vweird.f32 %v1948_v12 }
 0x7fc   : > { %vm1270_vm15 = vmor %vm1268_vm14, %vm1269_vm13  ;;  %v1290_v32 = vor.u32 1.1754944e-38, %v1289_v26  ;;  %vm1288_vm4 = vcmp.eq.f32.partialorder %v1287_v29, 8.507059e+37 }
 0x7fd   : > { %v1265_v14 = vsub.f32 1.0, %v1264_v13 }
 0x7ff   : > { %v1266_v16 = vmul.f32 %v1948_v12, %v1265_v14 }
 0x800   : > { %v1950_v19 = vpop.eup %1949 }
 0x801   : > { %v1267_v21 = vadd.f32 %v1948_v12, %v1266_v16  ;;  %v1279_v22 = vmul.f32 %v1950_v19, %v1262_v58  ;;  %vm1284_vm1 = vweird.f32 %v1950_v19 }
 0x802   : > { %vm1285_vm3 = vmor %vm1283_vm2, %vm1284_vm1 }
 0x803   : > { %v1271_v23 = vsel %vm1270_vm15, %v1948_v12, %v1267_v21  ;;  %v1280_v24 = vsub.f32 1.0, %v1279_v22 }
 0x804   : > { %v1276_v25 = vsel %vm1273_vm0, %v1275_v57, %v1271_v23 }
 0x805   : > { %v1293_v27 = vmul.f32 %v1276_v25, %v1237_v59  ;;  %v1281_v28 = vmul.f32 %v1950_v19, %v1280_v24 }
 0x807   : > { %v1295_v30 = vpack.c.bf16 %v1293_v27, %v1293_v27  ;;  %v1282_v31 = vadd.f32 %v1950_v19, %v1281_v28 }
 0x809   : > { %v1286_v33 = vsel %vm1285_vm3, %v1950_v19, %v1282_v31  ;;  %1437 = vmatmul.bf16.vlgmr.msrb.gmra.mxu3 %v1295_v30 }
 0x80a   : > { %v1291_v36 = vsel %vm1288_vm4, %v1290_v32, %v1286_v33 }
 0x80b   : > { %v1294_v37 = vmul.f32 %v1291_v36, %v1250_v3 }
 0x80d   : > { %v1296_v35 = vpack.c.bf16 %v1294_v37, %v1294_v37 }
 0x80f   : > { %1450 = vmatmul.bf16.vlgmr.msra.gmra.mxu0 %v1296_v35 }
 0x88c   : > { %v1438_v39 = vpop.f32.mrf.mxu3  ;;  %v1451_v17 = vpop.f32.mrf.mxu0 }
 0x88d   : > { %v1439_v0 = vadd.f32 %v1920_v38, %v1438_v39 }
 0x88f   : > { %v1452_v40 = vadd.f32 %v1451_v17, %v1439_v0 }
 0x891   : > { %v1455_v41 = vadd.f32 %v1452_v40, %v2361_v34 }
 0x893   : > { %1456 = vst [vmem:[%s469_s27] sm:$0x1f] %v1455_v41 }
 0x894   : > { %v1440_v42 = vpop.f32.mrf.mxu3  ;;  %v1453_v43 = vpop.f32.mrf.mxu0 }
 0x895 PF: > { %s25_s25 = sadd.s32 1, %s2025_s25  }
 0x896   : > { %p22_p7 = scmp.ge.s32.totalorder %s25_s25, 4  }
 0x898   :  { %24 = sbr.rel (!%p22_p7) target bundleno = 2 (0x2), region = 111 }
 0x89d   :  { %1476 = vsyncpa [#allocation3], 1 }
 0x89e   :  { %1478 = vsyncpa [#allocation3 + $0x1], 1 }
 0x89f   :  { %1479 = vsyncpa [#allocation5], 1 }

// kernel: llava_forward.13
= control target key start
LH: loop header
LB: loop body
LE: loop exit
PB: predicated region body
PF: predicated region fallthrough
CT: control target
= control target key end

     0   :  { %s147_s0 = inlined_call_operand.vmem [shape: f32[16,128], index: 0, kind: input, shape index: {}]   ;;  %s148_s1 = inlined_call_operand.vmem [shape: f32[1,128], index: 1, kind: input, shape index: {}]   ;;  %s149_s2 = inlined_call_operand.hbm [shape: f32[16,128], index: 2, kind: output, shape index: {}]  }
   0x1   :  { %v12_v0 = vld [vmem:[%s147_s0] sm:$0xff] }
   0x2   :  { %v14_v1 = vmul.f32 %v12_v0, %v12_v0 }
   0x3   :  { %7 = vsyncpa [#allocation3], 0  ;;  %v13_v2 = vld [vmem:[%s147_s0 + $0x8] sm:$0xff]  ;;  %v116_v4 = vmov 128.0   ;;  %v83_v25 = vld [vmem:[%s148_s1] ss:$0 sm:$0xff] }
   0x4   :  { %16 = vadd.xlane.f32.xlu0 %v14_v1  ;;  %v15_v3 = vmul.f32 %v13_v2, %v13_v2  ;;  %84 = vrcp.f32 %v116_v4  ;;  %s117_s14 = smov [#allocation2]   ;;  %s67_s18 = sshll.u32 %s149_s2, 4  ;;  %s68_s18 = int_to_ptr.hbm [resolvable:$true] %s67_s18 }
   0x5   :  { %s65_s15 = sshll.u32 %s117_s14, 4  ;;  %s118_s1 = smov 128   ;;  %s66_s15 = int_to_ptr.vmem [resolvable:$true] %s65_s15 }
   0x6   :  { %s119_s19 = smov 8  }
   0xa   :  { %v85_v5 = vpop.eup %84 }
   0xb   :  { %v21_v6 = vmul.f32 128.0, %v85_v5  ;;  %vm25_vm0 = vweird.f32 %v85_v5 }
   0xc   :  { %18 = vadd.xlane.f32.xlu0 %v15_v3 }
   0xd   :  { %v22_v7 = vsub.f32 1.0, %v21_v6 }
   0xf   :  { %v23_v8 = vmul.f32 %v85_v5, %v22_v7 }
  0x11   :  { %v24_v9 = vadd.f32 %v85_v5, %v23_v8 }
  0x13   :  { %v26_v10 = vsel %vm25_vm0, %v85_v5, %v24_v9 }
  0x77   :  { %v17_v11 = vpop.xlane.xlu0 %16 }
  0x78   :  { %v27_v12 = vmul.f32 %v26_v10, %v17_v11 }
  0x7a   :  { %v29_v13 = vadd.f32 1e-06, %v27_v12 }
  0x7c   :  { %86 = vrsqrt.f32 %v29_v13  ;;  %vm37_vm2 = vweird.f32 %v29_v13 }
  0x7f   :  { %v19_v14 = vpop.xlane.xlu0 %18 }
  0x80   :  { %v28_v15 = vmul.f32 %v26_v10, %v19_v14 }
  0x82   :  { %v87_v16 = vpop.eup %86  ;;  %v30_v17 = vadd.f32 1e-06, %v28_v15 }
  0x83   :  { %v32_v18 = vmul.f32 %v87_v16, %v29_v13  ;;  %vm38_vm1 = vweird.f32 %v87_v16 }
  0x84   :  { %88 = vrsqrt.f32 %v30_v17  ;;  %vm39_vm3 = vmor %vm37_vm2, %vm38_vm1  ;;  %vm47_vm5 = vweird.f32 %v30_v17 }
  0x85   :  { %v33_v19 = vmul.f32 %v87_v16, %v32_v18 }
  0x87   :  { %v34_v20 = vmul.f32 0.5, %v33_v19 }
  0x89   :  { %v35_v21 = vsub.f32 1.5, %v34_v20 }
  0x8a   :  { %v89_v22 = vpop.eup %88 }
  0x8b   :  { %v36_v23 = vmul.f32 %v87_v16, %v35_v21  ;;  %v42_v24 = vmul.f32 %v89_v22, %v30_v17  ;;  %vm48_vm4 = vweird.f32 %v89_v22 }
  0x8c   :  { %vm49_vm6 = vmor %vm47_vm5, %vm48_vm4 }
  0x8d   :  { %v40_v26 = vsel %vm39_vm3, %v87_v16, %v36_v23  ;;  %v43_v27 = vmul.f32 %v89_v22, %v42_v24 }
  0x8e   :  { %v51_v28 = vmul.f32 %v40_v26, %v12_v0 }
  0x8f   :  { %v44_v29 = vmul.f32 0.5, %v43_v27 }
  0x90   :  { %v57_v30 = vmul.f32 %v83_v25, %v51_v28 }
  0x91   :  { %v45_v31 = vsub.f32 1.5, %v44_v29 }
  0x92   :  { %59 = vst [vmem:[#allocation2] sm:$0xff] %v57_v30 }
  0x93   :  { %v46_v32 = vmul.f32 %v89_v22, %v45_v31 }
  0x95   :  { %v50_v33 = vsel %vm49_vm6, %v89_v22, %v46_v32 }
  0x96   :  { %v52_v34 = vmul.f32 %v50_v33, %v13_v2 }
  0x98   :  { %v58_v35 = vmul.f32 %v83_v25, %v52_v34 }
  0x9a   :  { %60 = vst [vmem:[#allocation2 + $0x8] sm:$0xff] %v58_v35 }
  0x9b   :  { %73 = dma.vmem_to_hbm [thread:$0]  %s66_s15, 256, %s68_s18, [#allocation3], %s118_s1, %s118_s1, %s119_s19  }
  0x9c   :  { %114 = dma.done.wait [#allocation3], 256  }
  0x9d   :  { %115 = vsyncadd [#allocation3], 4294967040 }
  0x9e   :  { %78 = vsyncpa [#allocation3], 1 }

// kernel: llava_forward.11
= control target key start
LH: loop header
LB: loop body
LE: loop exit
PB: predicated region body
PF: predicated region fallthrough
CT: control target
= control target key end

     0   :  { %14 = vsyncpa [#allocation3], 0  ;;  %s2415_s30 = smov 0   ;;  %s2996_s0 = inlined_call_operand.vmem [shape: f32[2,8,128], index: 0, kind: input, shape index: {}]   ;;  %s2997_s1 = inlined_call_operand.vmem [shape: f32[1,128], index: 1, kind: input, shape index: {}]   ;;  %s2998_s2 = inlined_call_operand.vmem [shape: bf16[128,384], index: 2, kind: input, shape index: {}]   ;;  %s2999_s3 = inlined_call_operand.vmem [shape: bf16[128,128], index: 3, kind: input, shape index: {}]   ;;  %s3000_s4 = inlined_call_operand.vmem [shape: f32[2,8,16], index: 4, kind: input, shape index: {}]   ;;  %s3001_s5 = inlined_call_operand.vmem [shape: f32[2,8,16], index: 5, kind: input, shape index: {}]   ;;  %s3002_s6 = inlined_call_operand.vmem [shape: f32[1,128], index: 6, kind: input, shape index: {}]   ;;  %s3003_s7 = inlined_call_operand.vmem [shape: bf16[128,512], index: 7, kind: input, shape index: {}]   ;;  %s3004_s8 = inlined_call_operand.hbm [shape: bf16[256,128], index: 8, kind: input, shape index: {}]   ;;  %s3005_s9 = inlined_call_operand.vmem [shape: f32[2,8,128], index: 9, kind: output, shape index: {}]  }
   0x1 LB: > { %s281_s12 = sshll.u32 %s3004_s8, 4  ;;  %s1820_s13 = sadd.s32 4294967295, %s2352_s30   ;;  %s2352_s30 = sphi %s2415_s30, %s20_s30   ;;  %s282_s12 = int_to_ptr.hbm [resolvable:$true] %s281_s12 }
   0x2   : > { %p1822_p0 = scmp.ge.s32.totalorder %s2352_s30, 1  ;;  %p255_p1 = scmp.lt.s32.totalorder %s2352_s30, 3 }
   0x3   : > { %p2259_p2 = scmp.eq.s32.totalorder %s1820_s13, 0  ;;  %s2354_s14 = smov [#allocation2]  }
   0x4   : > { %p256_p3 = pnand %p1822_p0, %p255_p1  ;;  %s283_s15 = sshll.u32 %s2354_s14, 4  ;;  %s284_s15 = int_to_ptr.vmem [resolvable:$true] %s283_s15 }
   0x5   : > { %s2355_s16 = smov 64   ;;  %s2356_s17 = smov 4  }
   0x6   : > { %p2255_p4 = pneg %p256_p3  ;;  %320 = sbr.rel (%p256_p3) target bundleno = 2489 (0x9b9), region = 56 }
   0x8   : > { %p2256_p5 = pnand %p2259_p2, %p2255_p4 }
   0xa   : > { %2258 = dma.hbm_to_vmem [thread:$0]  (!%p2256_p5), %s282_s12, 2048, %s284_s15, [#allocation3], %s2355_s16, %s2355_s16, %s2356_s17  }
   0xb   : > { %2347 = dma.done.wait (%p2259_p2), [#allocation3], 2048  }
   0xc   : > { %2349 = vsyncadd (%p2259_p2), [#allocation3], 4294965248  ;;  %p363_p6 = scmp.lt.s32.totalorder %s1820_s13, 1  ;;  %v1917_v2 = vld [vmem:[%s2998_s2 + $0xa8] sm:$0xf]  ;;  %s2358_s22 = smov 32  }
   0xd   : > { %v2193_v3 = vld [vmem:[%s2998_s2 + $0xb0] sm:$0xf0]  ;;  %v2192_v4 = vld [vmem:[%s2998_s2 + $0xac] sm:$0xf]  ;;  %v1919_v6 = vld [vmem:[%s2998_s2 + $0xb4] sm:$0xf0] }
   0xe   : > { %s3007_s13 = smov (!%p363_p6, %s1820_s13), 1  ;;  %v1918_v5 = vor.u32 %v2193_v3, %v1917_v2  ;;  %v1925_v7 = vld [vmem:[%s2998_s2 + $0xb0] sm:$0xf]  ;;  %v2194_v8 = vld [vmem:[%s2998_s2 + $0xb8] sm:$0xf0]  ;;  %v1922_v9 = vor.u32 %v2192_v4, %v1919_v6  ;;  %v2359_v29 = vmov 128.0  }
   0xf   : > { %s2426_s18 = sshll.u32 %s3007_s13, 3  ;;  %v1926_v10 = vor.u32 %v2194_v8, %v1925_v7  ;;  %v1905_v13 = vld [vmem:[%s2998_s2 + $0x90] sm:$0xf]  ;;  %v2190_v14 = vld [vmem:[%s2998_s2 + $0x98] sm:$0xf0]  ;;  %2282 = vrcp.f32 %v2359_v29  ;;  %s2360_s24 = smov 112  }
  0x10   : > { %s366_s21 = scalar_lea.vmem %s2996_s0, %s2426_s18  ;;  %570 = vmatpush.bf16.msra.mxu0 %v1918_v5  ;;  %583 = vmatpush.bf16.msra.mxu1 %v1922_v9  ;;  %s370_s16 = scalar_lea.vmem %s3000_s4, %s2426_s18  ;;  %v2189_v15 = vld [vmem:[%s2998_s2 + $0x94] sm:$0xf]  ;;  %v1906_v16 = vor.u32 %v2190_v14, %v1905_v13  ;;  %v1907_v17 = vld [vmem:[%s2998_s2 + $0x9c] sm:$0xf0]  ;;  %v1913_v18 = vld [vmem:[%s2998_s2 + $0x98] sm:$0xf] }
  0x11   : > { %v2432_v0 = vld [vmem:[%s366_s21] sm:$0xff]  ;;  %596 = vmatpush.bf16.msra.mxu2 %v1926_v10  ;;  %s374_s20 = scalar_lea.vmem %s3001_s5, %s2426_s18  ;;  %s2357_s21 = smov 16   ;;  %v1910_v20 = vor.u32 %v2189_v15, %v1907_v17  ;;  %v1893_v22 = vld [vmem:[%s2998_s2 + $0x78] sm:$0xf]  ;;  %v2186_v24 = vld [vmem:[%s2998_s2 + $0x7c] sm:$0xf] }
  0x12   : > { %v381_v1 = vmul.f32 %v2432_v0, %v2432_v0  ;;  %v2462_v11 = vld [vmem:[%s370_s16] sm:$0xff]  ;;  %v1895_v26 = vld [vmem:[%s2998_s2 + $0x84] sm:$0xf0]  ;;  %v2188_v28 = vld [vmem:[%s2998_s2 + $0x88] sm:$0xf0]  ;;  %s2361_s25 = smov 48  }
  0x13   : > { %v2464_v12 = vld [vmem:[%s374_s20] sm:$0xff]  ;;  %v1898_v30 = vor.u32 %v2186_v24, %v1895_v26  ;;  %v2184_v33 = vld [vmem:[%s2998_s2 + $0x68] sm:$0xf0]  ;;  %v1883_v36 = vld [vmem:[%s2998_s2 + $0x6c] sm:$0xf0]  ;;  %vm680_vm4 = vcmask 130048  }
  0x14   : > { %382 = vadd.xlane.f32.xlu0 %v381_v1  ;;  %634 = vrot.lane.b32.xlu2 %v2464_v12, %s2357_s21  ;;  %v2191_v19 = vld [vmem:[%s2998_s2 + $0xa0] sm:$0xf0]  ;;  %v1901_v27 = vld [vmem:[%s2998_s2 + $0x80] sm:$0xf]  ;;  %v1889_v37 = vld [vmem:[%s2998_s2 + $0x68] sm:$0xf] }
  0x15   : > { %v1914_v21 = vor.u32 %v2191_v19, %v1913_v18  ;;  %571 = vmatpush.bf16.msra.mxu0 %v1906_v16  ;;  %584 = vmatpush.bf16.msra.mxu1 %v1910_v20  ;;  %v2187_v23 = vld [vmem:[%s2998_s2 + $0x80] sm:$0xf0]  ;;  %v1902_v31 = vor.u32 %v2188_v28, %v1901_v27  ;;  %v1881_v32 = vld [vmem:[%s2998_s2 + $0x60] sm:$0xf]  ;;  %v2185_v38 = vld [vmem:[%s2998_s2 + $0x70] sm:$0xf0]  ;;  %v2283_v41 = vpop.eup %2282 }
  0x16   : > { %v1894_v25 = vor.u32 %v2187_v23, %v1893_v22  ;;  %v2183_v34 = vld [vmem:[%s2998_s2 + $0x64] sm:$0xf]  ;;  %v1882_v35 = vor.u32 %v2184_v33, %v1881_v32  ;;  %v1890_v40 = vor.u32 %v2185_v38, %v1889_v37  ;;  %v1869_v42 = vld [vmem:[%s2998_s2 + $0x48] sm:$0xf]  ;;  %v2181_v43 = vld [vmem:[%s2998_s2 + $0x50] sm:$0xf0]  ;;  %vm389_vm0 = vweird.f32 %v2283_v41 }
  0x17   : > { %597 = vmatpush.bf16.msra.mxu2 %v1914_v21  ;;  %v1886_v39 = vor.u32 %v2183_v34, %v1883_v36  ;;  %v2180_v44 = vld [vmem:[%s2998_s2 + $0x4c] sm:$0xf]  ;;  %v1870_v45 = vor.u32 %v2181_v43, %v1869_v42  ;;  %v1871_v46 = vld [vmem:[%s2998_s2 + $0x54] sm:$0xf0]  ;;  %v1877_v47 = vld [vmem:[%s2998_s2 + $0x50] sm:$0xf] }
  0x18   : > { %v2182_v48 = vld [vmem:[%s2998_s2 + $0x58] sm:$0xf0]  ;;  %v1874_v49 = vor.u32 %v2180_v44, %v1871_v46  ;;  %v385_v51 = vmul.f32 128.0, %v2283_v41  ;;  %v1857_v52 = vld [vmem:[%s2998_s2 + $0x30] sm:$0xf]  ;;  %vm737_vm5 = vcmask 1043456  }
  0x19   : > { %572 = vmatpush.bf16.msra.mxu0 %v1894_v25  ;;  %585 = vmatpush.bf16.msra.mxu1 %v1898_v30  ;;  %v1878_v50 = vor.u32 %v2182_v48, %v1877_v47  ;;  %v2178_v53 = vld [vmem:[%s2998_s2 + $0x38] sm:$0xf0]  ;;  %v2177_v54 = vld [vmem:[%s2998_s2 + $0x34] sm:$0xf]  ;;  %v1859_v56 = vld [vmem:[%s2998_s2 + $0x3c] sm:$0xf0] }
  0x1a   : > { %v1858_v55 = vor.u32 %v2178_v53, %v1857_v52  ;;  %v1865_v57 = vld [vmem:[%s2998_s2 + $0x38] sm:$0xf]  ;;  %v2179_v58 = vld [vmem:[%s2998_s2 + $0x40] sm:$0xf0]  ;;  %v1862_v59 = vor.u32 %v2177_v54, %v1859_v56  ;;  %v386_v61 = vsub.f32 1.0, %v385_v51  ;;  %s2362_s26 = smov 96  }
  0x1b   : > { %598 = vmatpush.bf16.msra.mxu2 %v1902_v31  ;;  %v1866_v60 = vor.u32 %v2179_v58, %v1865_v57  ;;  %v1845_v62 = vld [vmem:[%s2998_s2 + $0x18] sm:$0xf]  ;;  %v2175_v63 = vld [vmem:[%s2998_s2 + $0x20] sm:$0xf0]  ;;  %v2174_v1 = vld [vmem:[%s2998_s2 + $0x1c] sm:$0xf] }
  0x1c   : > { %v1846_v2 = vor.u32 %v2175_v63, %v1845_v62  ;;  %v1847_v3 = vld [vmem:[%s2998_s2 + $0x24] sm:$0xf0]  ;;  %v1853_v4 = vld [vmem:[%s2998_s2 + $0x20] sm:$0xf]  ;;  %v2176_v5 = vld [vmem:[%s2998_s2 + $0x28] sm:$0xf0]  ;;  %v387_v13 = vmul.f32 %v2283_v41, %v386_v61 }
  0x1d   : > { %573 = vmatpush.bf16.msra.mxu0 %v1882_v35  ;;  %586 = vmatpush.bf16.msra.mxu1 %v1886_v39  ;;  %v1850_v6 = vor.u32 %v2174_v1, %v1847_v3  ;;  %v1854_v7 = vor.u32 %v2176_v5, %v1853_v4  ;;  %v1833_v8 = vld [vmem:[%s2998_s2] sm:$0xf]  ;;  %v2172_v9 = vld [vmem:[%s2998_s2 + $0x8] sm:$0xf0]  ;;  %v2171_v10 = vld [vmem:[%s2998_s2 + $0x4] sm:$0xf] }
  0x1e   : > { %v1834_v14 = vor.u32 %v2172_v9, %v1833_v8  ;;  %v1835_v15 = vld [vmem:[%s2998_s2 + $0xc] sm:$0xf0]  ;;  %v1841_v16 = vld [vmem:[%s2998_s2 + $0x8] sm:$0xf]  ;;  %v2173_v17 = vld [vmem:[%s2998_s2 + $0x10] sm:$0xf0]  ;;  %v388_v20 = vadd.f32 %v2283_v41, %v387_v13 }
  0x1f   : > { %599 = vmatpush.bf16.msra.mxu2 %v1890_v40  ;;  %v1838_v18 = vor.u32 %v2171_v10, %v1835_v15  ;;  %v1842_v19 = vor.u32 %v2173_v17, %v1841_v16  ;;  %v2280_v31 = vld [vmem:[%s2997_s1] ss:$0 sm:$0xff]  ;;  %s2363_s27 = smov 80   ;;  %s2364_s28 = smov 64   ;;  %vm720_vm7 = vcmask 64512   ;;  %vm899_vm8 = vcmask 261120  }
  0x20   : > { %v2598_v21 = vsel %vm389_vm0, %v2283_v41, %v388_v20 }
  0x21   : > { %574 = vmatpush.bf16.msra.mxu0 %v1870_v45  ;;  %587 = vmatpush.bf16.msra.mxu1 %v1874_v49 }
  0x23   : > { %600 = vmatpush.bf16.msra.mxu2 %v1878_v50 }
  0x25   : > { %575 = vmatpush.bf16.msra.mxu0 %v1858_v55  ;;  %588 = vmatpush.bf16.msra.mxu1 %v1862_v59 }
  0x27   : > { %601 = vmatpush.bf16.msra.mxu2 %v1866_v60 }
  0x28   : > { %646 = vrot.lane.b32.xlu0 %v2462_v11, %s2357_s21 }
  0x29   : > { %576 = vmatpush.bf16.msra.mxu0 %v1846_v2  ;;  %589 = vmatpush.bf16.msra.mxu1 %v1850_v6 }
  0x2b   : > { %602 = vmatpush.bf16.msra.mxu2 %v1854_v7 }
  0x2d   : > { %577 = vmatpush.bf16.msra.mxu0 %v1834_v14  ;;  %590 = vmatpush.bf16.msra.mxu1 %v1838_v18 }
  0x2f   : > { %603 = vmatpush.bf16.msra.mxu2 %v1842_v19 }
  0x30   : > { %774 = vrot.lane.b32.xlu0 %v2464_v12, %s2358_s22 }
  0x6e   : > { %v635_v50 = vpop.permute.xlu2 %634 }
  0x87   : > { %v383_v22 = vpop.xlane.xlu0 %382 }
  0x88   : > { %v391_v23 = vmul.f32 %v2598_v21, %v383_v22 }
  0x8a   : > { %v392_v24 = vadd.f32 1e-06, %v391_v23 }
  0x8c   : > { %2284 = vrsqrt.f32 %v392_v24  ;;  %vm399_vm2 = vweird.f32 %v392_v24 }
  0x92   : > { %v2285_v25 = vpop.eup %2284 }
  0x93   : > { %v394_v26 = vmul.f32 %v2285_v25, %v392_v24  ;;  %vm400_vm1 = vweird.f32 %v2285_v25 }
  0x94   : > { %vm401_vm3 = vmor %vm399_vm2, %vm400_vm1 }
  0x95   : > { %v395_v27 = vmul.f32 %v2285_v25, %v394_v26 }
  0x97   : > { %v396_v28 = vmul.f32 0.5, %v395_v27 }
  0x99   : > { %v397_v29 = vsub.f32 1.5, %v396_v28 }
  0x9a   : > { %v647_v44 = vpop.permute.xlu0 %646 }
  0x9b   : > { %v398_v30 = vmul.f32 %v2285_v25, %v397_v29 }
  0x9d   : > { %v402_v32 = vsel %vm401_vm3, %v2285_v25, %v398_v30 }
  0x9e   : > { %v403_v33 = vmul.f32 %v402_v32, %v2432_v0 }
  0xa0   : > { %v408_v34 = vmul.f32 %v2280_v31, %v403_v33 }
  0xa2   : > { %v409_v35 = vpack.c.bf16 %v408_v34, %v408_v34  ;;  %v775_v57 = vpop.permute.xlu0 %774 }
  0xa4   : > { %578 = vmatmul.bf16.vlgmr.msra.gmra.mxu0 %v409_v35  ;;  %591 = vmatmul.bf16.vlgmr.msra.gmra.mxu1 %v409_v35 }
  0xa5   : > { %604 = vmatmul.bf16.vlgmr.msra.gmra.mxu2 %v409_v35 }
 0x121   : > { %v2605_v36 = vpop.f32.mrf.mxu0  ;;  %v2607_v37 = vpop.f32.mrf.mxu1 }
 0x122   : > { %v667_v38 = vmul.f32 %v2464_v12, %v2607_v37  ;;  %v650_v42 = vmul.f32 %v2464_v12, %v2605_v36  ;;  %v666_v45 = vmul.f32 %v647_v44, %v2607_v37  ;;  %v649_v49 = vmul.f32 %v647_v44, %v2605_v36 }
 0x123   : > { %v659_v54 = vmul.f32 %v635_v50, %v2607_v37  ;;  %v637_v56 = vmul.f32 %v635_v50, %v2605_v36  ;;  %v794_v58 = vmul.f32 %v775_v57, %v2607_v37  ;;  %v658_v61 = vmul.f32 %v2462_v11, %v2607_v37 }
 0x124   : > { %669 = vrot.lane.b32.xlu1 %v667_v38, %s2357_s21  ;;  %v777_v7 = vmul.f32 %v775_v57, %v2605_v36  ;;  %v632_v10 = vmul.f32 %v2462_v11, %v2605_v36 }
 0x128   : > { %v605_v39 = vpop.f32.mrf.mxu2 }
 0x129   : > { %v581_v40 = vpop.f32.mrf.mxu0  ;;  %v594_v41 = vpop.f32.mrf.mxu1  ;;  %v2639_v6 = vpack.c.bf16 %v605_v39, %v605_v39 }
 0x12a   : > { %v611_v40 = vlaneseq }
 0x12b   : > { %v739_v9 = vsel %vm737_vm5, %v2639_v6, 0 }
 0x12c   : > { %652 = vrot.lane.b32.xlu1 %v650_v42, %s2357_s21  ;;  %v2657_v41 = vshrl.u32 %v611_v40, 7  ;;  %v2659_v42 = vand.u32 127, %v611_v40 }
 0x12e   : > { %vm615_vm6 = vcmp.le.s32.totalorder %v2659_v42, %v2657_v41 }
 0x130   : > { %v607_v43 = vpop.f32.mrf.mxu2 }
 0x196   : > { %v670_v46 = vpop.permute.xlu1 %669 }
 0x197   : > { %v672_v47 = vadd.f32 %v670_v46, %v666_v45 }
 0x199   : > { %v673_v48 = vpack.c.bf16 %v672_v47, %v672_v47 }
 0x19b   : > { %678 = vrot.lane.b32.xlu2 %v673_v48, %s2360_s24 }
 0x19e   : > { %v653_v51 = vpop.permute.xlu1 %652 }
 0x19f   : > { %v655_v52 = vadd.f32 %v653_v51, %v649_v49 }
 0x1a1   : > { %v656_v53 = vmul.f32 0.17677669, %v655_v52 }
 0x1a3   : > { %v657_v55 = vpack.c.bf16 %v656_v53, %v656_v53  ;;  %661 = vrot.lane.b32.xlu2 %v659_v54, %s2360_s24 }
 0x1a5   : > { %675 = vrot.lane.b32.xlu1 %v657_v55, %s2360_s24 }
 0x1ab   : > { %759 = vrot.lane.b32.xlu2 %v2464_v12, %s2361_s25 }
 0x1ad   : > { %639 = vrot.lane.b32.xlu1 %v637_v56, %s2360_s24 }
 0x1b3   : > { %755 = vrot.lane.b32.xlu2 %v2462_v11, %s2358_s22 }
 0x1bb   : > { %770 = vrot.lane.b32.xlu2 %v2462_v11, %s2361_s25 }
 0x1c3   : > { %796 = vrot.lane.b32.xlu2 %v794_v58, %s2357_s21 }
 0x1f5   : > { %v679_v59 = vpop.permute.xlu2 %678 }
 0x1f6   : > { %v685_v60 = vsel %vm680_vm4, %v679_v59, 0 }
 0x1f7   : > { %694 = vmatpush.bf16.xpose.msra.mxu3 %v685_v60 }
 0x1fd   : > { %v662_v62 = vpop.permute.xlu2 %661 }
 0x1fe   : > { %v664_v63 = vsub.f32 %v658_v61, %v662_v62 }
 0x200   : > { %v665_v1 = vpack.c.bf16 %v664_v63, %v664_v63 }
 0x202   : > { %v704_v2 = vsel %vm680_vm4, %v665_v1, 0 }
 0x203   : > { %713 = vmatpush.bf16.xpose.msrb.mxu3 %v704_v2 }
 0x205   : > { %v760_v3 = vpop.permute.xlu2 %759 }
 0x206   : > { %v786_v4 = vmul.f32 %v760_v3, %v2607_v37  ;;  %v762_v5 = vmul.f32 %v760_v3, %v2605_v36 }
 0x208   : > { %788 = vrot.lane.b32.xlu0 %v786_v4, %s2360_s24 }
 0x20d   : > { %v756_v17 = vpop.permute.xlu2 %755 }
 0x20e   : > { %v785_v19 = vmul.f32 %v756_v17, %v2607_v37  ;;  %v758_v26 = vmul.f32 %v756_v17, %v2605_v36  ;;  %v2195_v17 = vld [vmem:[%s2999_s3] sm:$0xff] }
 0x210   : > { %764 = vrot.lane.b32.xlu0 %v762_v5, %s2360_s24 }
 0x215   : > { %v771_v18 = vpop.permute.xlu2 %770 }
 0x216   : > { %v793_v25 = vmul.f32 %v771_v18, %v2607_v37  ;;  %v773_v31 = vmul.f32 %v771_v18, %v2605_v36 }
 0x217   : > { %v676_v8 = vpop.permute.xlu1 %675 }
 0x218   : > { %1927 = vmatmul.msk.bf16.vlgmr.msra.gmra.mxu3 %vm680_vm4, %v676_v8  ;;  %779 = vrot.lane.b32.xlu0 %v777_v7, %s2357_s21 }
 0x219   : > { %748 = vmatpush.bf16.msra.mxu3 %v739_v9 }
 0x21d   : > { %v797_v24 = vpop.permute.xlu2 %796 }
 0x21e   : > { %v799_v27 = vadd.f32 %v797_v24, %v793_v25 }
 0x21f   : > { %v640_v13 = vpop.permute.xlu1 %639 }
 0x220   : > { %v642_v14 = vsub.f32 %v632_v10, %v640_v13  ;;  %v800_v30 = vpack.c.bf16 %v799_v27, %v799_v27  ;;  %v2196_v13 = vld [vmem:[%s2999_s3 + $0x8] sm:$0xff] }
 0x222   : > { %v643_v15 = vmul.f32 0.17677669, %v642_v14 }
 0x224   : > { %v644_v16 = vpack.c.bf16 %v643_v15, %v643_v15 }
 0x228   : > { %1928 = vmatmul.msk.bf16.vlgmr.msrb.gmra.mxu3 %vm680_vm4, %v644_v16 }
 0x27a   : > { %v789_v20 = vpop.permute.xlu0 %788 }
 0x27b   : > { %v791_v22 = vsub.f32 %v785_v19, %v789_v20 }
 0x27d   : > { %v792_v23 = vpack.c.bf16 %v791_v22, %v791_v22 }
 0x27f   : > { %830 = vrot.lane.b32.xlu0 %v792_v23, %s2362_s26 }
 0x282   : > { %v765_v28 = vpop.permute.xlu0 %764 }
 0x283   : > { %v767_v29 = vsub.f32 %v758_v26, %v765_v28 }
 0x285   : > { %v768_v48 = vmul.f32 0.17677669, %v767_v29 }
 0x287   : > { %805 = vrot.lane.b32.xlu0 %v800_v30, %s2363_s27  ;;  %v769_v49 = vpack.c.bf16 %v768_v48, %v768_v48 }
 0x28a   : > { %v780_v32 = vpop.permute.xlu0 %779 }
 0x28b   : > { %v782_v33 = vadd.f32 %v780_v32, %v773_v31 }
 0x28d   : > { %v783_v34 = vmul.f32 0.17677669, %v782_v33 }
 0x28f   : > { %v784_v35 = vpack.c.bf16 %v783_v34, %v783_v34 }
 0x291   : > { %802 = vrot.lane.b32.xlu0 %v784_v35, %s2363_s27 }
 0x299   : > { %948 = vrot.lane.b32.xlu0 %v2464_v12, %s2363_s27 }
 0x29b   : > { %v696_v38 = vpop.f32.mrf.mxu3 }
 0x2a1   : > { %963 = vrot.lane.b32.xlu0 %v2464_v12, %s2364_s28 }
 0x2a3   : > { %v698_v39 = vpop.f32.mrf.mxu3 }
 0x2a9   : > { %1123 = vrot.lane.b32.xlu0 %v2464_v12, %s2362_s26 }
 0x2ab   : > { %v715_v43 = vpop.f32.mrf.mxu3 }
 0x2ac   : > { %v716_v44 = vadd.f32 %v715_v43, %v696_v38 }
 0x2ae   : > { %v719_v45 = vsel %vm615_vm6, %v716_v44, -1e+30 }
 0x2af   : > { %v721_v46 = vsel %vm720_vm7, %v719_v45, -inf }
 0x2b0   : > { %722 = vmax.xlane.f32.xlu1 %v721_v46 }
 0x2b1   : > { %959 = vrot.lane.b32.xlu0 %v2462_v11, %s2363_s27 }
 0x2b3   : > { %v717_v47 = vpop.f32.mrf.mxu3 }
 0x2c9   : > { %827 = vrot.lane.b32.xlu1 %v769_v49, %s2362_s26 }
 0x2d1   : > { %1108 = vrot.lane.b32.xlu1 %v2464_v12, %s2360_s24 }
 0x2f1   : > { %v831_v50 = vpop.permute.xlu0 %830 }
 0x2f2   : > { %v836_v51 = vsel %vm680_vm4, %v831_v50, 0 }
 0x2f3   : > { %845 = vmatpush.bf16.xpose.msrb.mxu3 %v836_v51 }
 0x2f9   : > { %v806_v52 = vpop.permute.xlu0 %805 }
 0x2fa   : > { %v811_v53 = vsel %vm680_vm4, %v806_v52, 0 }
 0x2fb   : > { %820 = vmatpush.bf16.xpose.msrb.mxu0 %v811_v53 }
 0x303   : > { %v803_v54 = vpop.permute.xlu0 %802  ;;  %937 = vmatpush.bf16.msra.mxu0 %v2196_v13 }
 0x304   : > { %1930 = vmatmul.msk.bf16.vlgmr.msrb.gmra.mxu0 %vm680_vm4, %v803_v54 }
 0x307   : > { %938 = vmatpush.bf16.msra.mxu0 %v2195_v17 }
 0x30b   : > { %v949_v55 = vpop.permute.xlu0 %948 }
 0x30c   : > { %v975_v56 = vmul.f32 %v949_v55, %v2607_v37  ;;  %v951_v58 = vmul.f32 %v949_v55, %v2605_v36 }
 0x30e   : > { %977 = vrot.lane.b32.xlu1 %v975_v56, %s2360_s24 }
 0x313   : > { %v964_v57 = vpop.permute.xlu0 %963 }
 0x314   : > { %v983_v12 = vmul.f32 %v964_v57, %v2607_v37  ;;  %v966_v59 = vmul.f32 %v964_v57, %v2605_v36 }
 0x316   : > { %953 = vrot.lane.b32.xlu1 %v951_v58, %s2360_s24  ;;  %985 = vrot.lane.b32.xlu0 %v983_v12, %s2357_s21 }
 0x31b   : > { %v1124_v5 = vpop.permute.xlu0 %1123 }
 0x31c   : > { %v1126_v7 = vmul.f32 %v1124_v5, %v2605_v36  ;;  %v1143_v29 = vmul.f32 %v1124_v5, %v2607_v37 }
 0x31e   : > { %1104 = vrot.lane.b32.xlu0 %v2462_v11, %s2362_s26  ;;  %968 = vrot.lane.b32.xlu1 %v966_v59, %s2357_s21 }
 0x323   : > { %v723_v60 = vpop.xlane.xlu1 %722  ;;  %v960_v30 = vpop.permute.xlu0 %959 }
 0x324   : > { %v724_v61 = vsub.f32 %v719_v45, %v723_v60  ;;  %v982_v33 = vmul.f32 %v960_v30, %v2607_v37 }
 0x326   : > { %v725_v62 = vmul.f32 1.442695, %v724_v61  ;;  %1119 = vrot.lane.b32.xlu1 %v2462_v11, %s2360_s24 }
 0x328   : > { %2286 = vpow2.f32 %v725_v62 }
 0x32e   : > { %v2287_v63 = vpop.eup %2286 }
 0x32f   : > { %v727_v1 = vsel %vm720_vm7, %v2287_v63, 0.0 }
 0x330   : > { %728 = vadd.xlane.f32.xlu2 %v727_v1 }
 0x33b   : > { %v828_v2 = vpop.permute.xlu1 %827 }
 0x343   : > { %v1109_v3 = vpop.permute.xlu1 %1108 }
 0x344   : > { %v1111_v4 = vmul.f32 %v1109_v3, %v2605_v36  ;;  %v1135_v27 = vmul.f32 %v1109_v3, %v2607_v37 }
 0x346   : > { %1113 = vrot.lane.b32.xlu0 %v1111_v4, %s2360_s24 }
 0x34e   : > { %1128 = vrot.lane.b32.xlu0 %v1126_v7, %s2357_s21 }
 0x380   : > { %v978_v28 = vpop.permute.xlu1 %977 }
 0x381   : > { %v822_v8 = vpop.f32.mrf.mxu0 }
 0x388   : > { %v954_v31 = vpop.permute.xlu1 %953  ;;  %v986_v32 = vpop.permute.xlu0 %985 }
 0x389   : > { %v824_v9 = vpop.f32.mrf.mxu0  ;;  %v988_v34 = vadd.f32 %v986_v32, %v982_v33 }
 0x38b   : > { %v989_v38 = vpack.c.bf16 %v988_v34, %v988_v34 }
 0x390   : > { %v969_v35 = vpop.permute.xlu1 %968  ;;  %v1105_v49 = vpop.permute.xlu0 %1104 }
 0x391   : > { %v1134_v62 = vmul.f32 %v1105_v49, %v2607_v37  ;;  %v1107_v7 = vmul.f32 %v1105_v49, %v2605_v36 }
 0x398   : > { %v1120_v60 = vpop.permute.xlu1 %1119 }
 0x399   : > { %v1122_v3 = vmul.f32 %v1120_v60, %v2605_v36 }
 0x3a3   : > { %v729_v10 = vpop.xlane.xlu2 %728 }
 0x3a4   : > { %2288 = vrcp.f32 %v729_v10 }
 0x3aa   : > { %v2289_v14 = vpop.eup %2288 }
 0x3ab   : > { %v731_v15 = vmul.f32 %v2289_v14, %v2287_v63  ;;  %v1142_v63 = vmul.f32 %v1120_v60, %v2607_v37 }
 0x3ad   : > { %v732_v16 = vpack.c.bf16 %v731_v15, %v731_v15 }
 0x3af   : > { %1929 = vmatmul.msk.bf16.vlgmr.msra.gmra.mxu3 %vm720_vm7, %v732_v16 }
 0x3b8   : > { %v1114_v58 = vpop.permute.xlu0 %1113 }
 0x3b9   : > { %v1116_v10 = vsub.f32 %v1107_v7, %v1114_v58 }
 0x3bb   : > { %v1117_v15 = vmul.f32 0.17677669, %v1116_v10 }
 0x3bf   : > { %1931 = vmatmul.msk.bf16.vlgmr.msrb.gmra.mxu3 %vm680_vm4, %v828_v2 }
 0x3c0   : > { %v1129_v1 = vpop.permute.xlu0 %1128 }
 0x432   : > { %v750_v18 = vpop.f32.mrf.mxu3 }
 0x433   : > { %v754_v19 = vpack.c.bf16 %v750_v18, %v750_v18  ;;  %v1118_v18 = vpack.c.bf16 %v1117_v15, %v1117_v15 }
 0x435   : > { %1950 = vmatmul.msk.bf16.vlgmr.msra.gmra.mxu0 %vm899_vm8, %v754_v19 }
 0x43a   : > { %v752_v20 = vpop.f32.mrf.mxu3 }
 0x442   : > { %v847_v22 = vpop.f32.mrf.mxu3 }
 0x443   : > { %v848_v23 = vadd.f32 %v847_v22, %v822_v8  ;;  %v1131_v8 = vadd.f32 %v1129_v1, %v1122_v3 }
 0x445   : > { %v851_v24 = vsel %vm615_vm6, %v848_v23, -1e+30  ;;  %v1132_v14 = vmul.f32 0.17677669, %v1131_v8  ;;  %v2200_v8 = vld [vmem:[%s2999_s3 + $0x28] sm:$0xff] }
 0x446   : > { %v852_v25 = vsel %vm720_vm7, %v851_v24, -inf  ;;  %1096 = vmatpush.bf16.msrb.mxu0 %v2200_v8  ;;  %v2041_v8 = vld [vmem:[%s3003_s7 + $0x80] sm:$0xf] }
 0x447   : > { %853 = vmax.xlane.f32.xlu2 %v852_v25  ;;  %v1133_v17 = vpack.c.bf16 %v1132_v14, %v1132_v14 }
 0x44a   : > { %v849_v26 = vpop.f32.mrf.mxu3 }
 0x45f   : > { %944 = vrot.lane.b32.xlu2 %v2462_v11, %s2364_s28  ;;  %v962_v11 = vmul.f32 %v960_v30, %v2605_v36 }
 0x461   : > { %v971_v39 = vadd.f32 %v969_v35, %v962_v11 }
 0x463   : > { %v972_v40 = vmul.f32 0.17677669, %v971_v39  ;;  %v2197_v39 = vld [vmem:[%s2999_s3 + $0x10] sm:$0xff] }
 0x465   : > { %v973_v43 = vpack.c.bf16 %v972_v40, %v972_v40 }
 0x467   : > { %1137 = vrot.lane.b32.xlu2 %v1135_v27, %s2360_s24 }
 0x46f   : > { %1145 = vrot.lane.b32.xlu2 %v1143_v29, %s2357_s21 }
 0x477   : > { %865 = vrot.lane.b32.xlu2 %v2639_v6, %s2362_s26 }
 0x47f   : > { %994 = vrot.lane.b32.xlu2 %v989_v38, %s2361_s25  ;;  %v2198_v38 = vld [vmem:[%s2999_s3 + $0x18] sm:$0xff] }
 0x480   : > { %909 = vmatpush.bf16.msra.mxu3 %v2198_v38  ;;  %v2099_v38 = vld [vmem:[%s3003_s7 + $0xf8] sm:$0xf0] }
 0x484   : > { %910 = vmatpush.bf16.msra.mxu3 %v2197_v39 }
 0x487   : > { %991 = vrot.lane.b32.xlu2 %v973_v43, %s2361_s25  ;;  %s378_s25 = scalar_lea.vmem %s3005_s9, %s2426_s18 }
 0x4b2   : > { %v2718_v44 = vpop.f32.mrf.mxu0 }
 0x4ba   : > { %v854_v45 = vpop.xlane.xlu2 %853  ;;  %v942_v46 = vpop.f32.mrf.mxu0 }
 0x4bb   : > { %v855_v47 = vsub.f32 %v851_v24, %v854_v45 }
 0x4bd   : > { %v856_v48 = vmul.f32 1.442695, %v855_v47 }
 0x4bf   : > { %2290 = vpow2.f32 %v856_v48 }
 0x4c2   : > { %v945_v50 = vpop.permute.xlu2 %944 }
 0x4c3   : > { %v947_v51 = vmul.f32 %v945_v50, %v2605_v36  ;;  %v974_v52 = vmul.f32 %v945_v50, %v2607_v37 }
 0x4c5   : > { %v2291_v53 = vpop.eup %2290  ;;  %v980_v54 = vsub.f32 %v974_v52, %v978_v28  ;;  %v956_v56 = vsub.f32 %v947_v51, %v954_v31 }
 0x4c6   : > { %v858_v55 = vsel %vm720_vm7, %v2291_v53, 0.0 }
 0x4c7   : > { %859 = vadd.xlane.f32.xlu1 %v858_v55  ;;  %v981_v57 = vpack.c.bf16 %v980_v54, %v980_v54  ;;  %v957_v59 = vmul.f32 0.17677669, %v956_v56 }
 0x4c9   : > { %1019 = vrot.lane.b32.xlu0 %v981_v57, %s2364_s28  ;;  %v958_v61 = vpack.c.bf16 %v957_v59, %v957_v59 }
 0x4ca   : > { %v1138_v12 = vpop.permute.xlu2 %1137 }
 0x4cb   : > { %v1140_v4 = vsub.f32 %v1134_v62, %v1138_v12 }
 0x4cd   : > { %v1141_v13 = vpack.c.bf16 %v1140_v4, %v1140_v4 }
 0x4d1   : > { %1016 = vrot.lane.b32.xlu0 %v958_v61, %s2364_s28 }
 0x4d2   : > { %v1146_v2 = vpop.permute.xlu2 %1145 }
 0x4d3   : > { %v1148_v5 = vadd.f32 %v1146_v2, %v1142_v63 }
 0x4d5   : > { %v1149_v9 = vpack.c.bf16 %v1148_v5, %v1148_v5 }
 0x4d7   : > { %1154 = vrot.lane.b32.xlu2 %v1149_v9, %s2357_s21  ;;  %v2199_v9 = vld [vmem:[%s2999_s3 + $0x20] sm:$0xff] }
 0x4d8   : > { %1097 = vmatpush.bf16.msrb.mxu0 %v2199_v9  ;;  %v2221_v9 = vld [vmem:[%s3003_s7 + $0x8c] sm:$0xf0] }
 0x4d9   : > { %1179 = vrot.lane.b32.xlu0 %v1141_v13, %s2358_s22 }
 0x4da   : > { %v866_v37 = vpop.permute.xlu2 %865 }
 0x4db   : > { %v871_v16 = vsel %vm737_vm5, %v866_v37, 0 }
 0x4dc   : > { %880 = vmatpush.bf16.msrb.mxu2 %v871_v16 }
 0x4df   : > { %1151 = vrot.lane.b32.xlu2 %v1133_v17, %s2357_s21 }
 0x4e1   : > { %1176 = vrot.lane.b32.xlu0 %v1118_v18, %s2358_s22 }
 0x4e2   : > { %v995_v36 = vpop.permute.xlu2 %994 }
 0x4e3   : > { %v1000_v19 = vsel %vm680_vm4, %v995_v36, 0  ;;  %v2202_v36 = vld [vmem:[%s2999_s3 + $0x38] sm:$0xff] }
 0x4e4   : > { %1009 = vmatpush.bf16.xpose.msrb.mxu1 %v1000_v19  ;;  %1256 = vmatpush.bf16.msra.mxu0 %v2202_v36  ;;  %v2201_v19 = vld [vmem:[%s2999_s3 + $0x30] sm:$0xff]  ;;  %v2051_v36 = vld [vmem:[%s3003_s7 + $0x98] sm:$0xf0] }
 0x4e8   : > { %1257 = vmatpush.bf16.msra.mxu0 %v2201_v19 }
 0x4ea   : > { %v992_v20 = vpop.permute.xlu2 %991 }
 0x4eb   : > { %1951 = vmatmul.msk.bf16.vlgmr.msrb.gmra.mxu1 %vm680_vm4, %v992_v20 }
 0x531   : > { %v1155_v22 = vpop.permute.xlu2 %1154 }
 0x532   : > { %v1160_v23 = vsel %vm680_vm4, %v1155_v22, 0 }
 0x533   : > { %1169 = vmatpush.bf16.xpose.msra.mxu1 %v1160_v23 }
 0x539   : > { %v1152_v24 = vpop.permute.xlu2 %1151 }
 0x53a   : > { %v860_v25 = vpop.xlane.xlu1 %859  ;;  %1963 = vmatmul.msk.bf16.vlgmr.msra.gmra.mxu1 %vm680_vm4, %v1152_v24 }
 0x53b   : > { %2292 = vrcp.f32 %v860_v25  ;;  %v1020_v26 = vpop.permute.xlu0 %1019 }
 0x53c   : > { %v1025_v27 = vsel %vm680_vm4, %v1020_v26, 0 }
 0x53d   : > { %1034 = vmatpush.bf16.xpose.msra.mxu2 %v1025_v27  ;;  %v2089_v27 = vld [vmem:[%s3003_s7 + $0xe0] sm:$0xf] }
 0x541   : > { %v2293_v28 = vpop.eup %2292 }
 0x542   : > { %v862_v29 = vmul.f32 %v2293_v28, %v2291_v53  ;;  %v2233_v28 = vld [vmem:[%s3003_s7 + $0xec] sm:$0xf0] }
 0x543   : > { %v1017_v30 = vpop.permute.xlu0 %1016 }
 0x544   : > { %v863_v31 = vpack.c.bf16 %v862_v29, %v862_v29  ;;  %v2231_v29 = vld [vmem:[%s3003_s7 + $0xe4] sm:$0xf] }
 0x546   : > { %1932 = vmatmul.msk.bf16.vlgmr.msrb.gmra.mxu2 %vm720_vm7, %v863_v31  ;;  %v2091_v31 = vld [vmem:[%s3003_s7 + $0xf0] sm:$0xf0] }
 0x54b   : > { %v1180_v32 = vpop.permute.xlu0 %1179 }
 0x54c   : > { %v1185_v33 = vsel %vm680_vm4, %v1180_v32, 0  ;;  %v2097_v32 = vld [vmem:[%s3003_s7 + $0xe8] sm:$0xf] }
 0x54d   : > { %1194 = vmatpush.bf16.xpose.msrb.mxu2 %v1185_v33  ;;  %v2234_v33 = vld [vmem:[%s3003_s7 + $0xf4] sm:$0xf0] }
 0x553   : > { %v1177_v34 = vpop.permute.xlu0 %1176 }
 0x556   : > { %1952 = vmatmul.msk.bf16.vlgmr.msra.gmra.mxu2 %vm680_vm4, %v1017_v30  ;;  %v2090_v30 = vor.u32 %v2233_v28, %v2089_v27  ;;  %v2218_v27 = vld [vmem:[%s3003_s7 + $0x74] sm:$0xf0] }
 0x558   : > { %1479 = vmatpush.bf16.msrb.mxu1 %v2090_v30  ;;  %v2216_v30 = vld [vmem:[%s3003_s7 + $0x6c] sm:$0xf] }
 0x566   : > { %1964 = vmatmul.msk.bf16.vlgmr.msrb.gmra.mxu2 %vm680_vm4, %v1177_v34  ;;  %v2094_v34 = vor.u32 %v2231_v29, %v2091_v31  ;;  %v2035_v31 = vld [vmem:[%s3003_s7 + $0x78] sm:$0xf0] }
 0x568   : > { %v1011_v35 = vpop.f32.mrf.mxu1  ;;  %1492 = vmatpush.bf16.msra.mxu2 %v2094_v34  ;;  %v2213_v34 = vld [vmem:[%s3003_s7 + $0x4c] sm:$0xf0] }
 0x570   : > { %v1013_v11 = vpop.f32.mrf.mxu1 }
 0x571   : > { %v2232_v11 = vld [vmem:[%s3003_s7 + $0xec] sm:$0xf] }
 0x572   : > { %v2102_v39 = vor.u32 %v2232_v11, %v2099_v38  ;;  %v2011_v38 = vld [vmem:[%s3003_s7 + $0x50] sm:$0xf0] }
 0x5b7   : > { %v1171_v40 = vpop.f32.mrf.mxu1 }
 0x5bf   : > { %v1173_v43 = vpop.f32.mrf.mxu1 }
 0x5c9   : > { %v882_v45 = vpop.f32.mrf.mxu2 }
 0x5ca   : > { %v886_v46 = vpack.c.bf16 %v882_v45, %v882_v45 }
 0x5cc   : > { %1941 = vmatmul.msk.bf16.vlgmr.msra.gmra.mxu3 %vm899_vm8, %v886_v46 }
 0x5d1   : > { %v884_v47 = vpop.f32.mrf.mxu2 }
 0x5d9   : > { %v1036_v48 = vpop.f32.mrf.mxu2 }
 0x5da   : > { %v1037_v49 = vadd.f32 %v1036_v48, %v1011_v35  ;;  %v2098_v35 = vor.u32 %v2234_v33, %v2097_v32  ;;  %v2038_v32 = vor.u32 %v2216_v30, %v2035_v31  ;;  %v2009_v33 = vld [vmem:[%s3003_s7 + $0x40] sm:$0xf]  ;;  %v2246_v30 = vld [vmem:[#allocation2 + $0x58] sm:$0xff]  ;;  %v2236_v31 = vld [vmem:[#allocation2 + $0x8] sm:$0xff] }
 0x5db   : > { %v2010_v11 = vor.u32 %v2213_v34, %v2009_v33  ;;  %v2235_v34 = vld [vmem:[#allocation2] sm:$0xff] }
 0x5dc   : > { %v1040_v50 = vsel %vm615_vm6, %v1037_v49, -1e+30 }
 0x5dd   : > { %v1041_v51 = vsel %vm720_vm7, %v1040_v50, -inf }
 0x5de   : > { %1042 = vmax.xlane.f32.xlu0 %v1041_v51 }
 0x5e1   : > { %v1038_v52 = vpop.f32.mrf.mxu2 }
 0x5e2   : > { %v2073_v52 = vld [vmem:[%s3003_s7 + $0xc0] sm:$0xf] }
 0x5e9   : > { %v1196_v53 = vpop.f32.mrf.mxu2 }
 0x5ea   : > { %v1197_v54 = vadd.f32 %v1196_v53, %v1171_v40  ;;  %v2229_v53 = vld [vmem:[%s3003_s7 + $0xcc] sm:$0xf0] }
 0x5ec   : > { %v1200_v55 = vsel %vm615_vm6, %v1197_v54, -1e+30  ;;  %v2074_v54 = vor.u32 %v2229_v53, %v2073_v52  ;;  %v2207_v52 = vld [vmem:[%s3003_s7 + $0x24] sm:$0xf] }
 0x5ed   : > { %v1201_v56 = vsel %vm720_vm7, %v1200_v55, -inf }
 0x5ee   : > { %1202 = vmax.xlane.f32.xlu1 %v1201_v56  ;;  %v2230_v56 = vld [vmem:[%s3003_s7 + $0xd4] sm:$0xf0]  ;;  %1480 = vmatpush.bf16.msrb.mxu1 %v2074_v54  ;;  %v2001_v54 = vld [vmem:[%s3003_s7 + $0x28] sm:$0xf] }
 0x5f1   : > { %v1198_v57 = vpop.f32.mrf.mxu2 }
 0x5f2   : > { %1213 = vrot.lane.b32.xlu0 %v2639_v6, %s2358_s22 }
 0x607   : > { %1053 = vrot.lane.b32.xlu1 %v2639_v6, %s2364_s28 }
 0x64f   : > { %v2762_v58 = vpop.f32.mrf.mxu3 }
 0x650   : > { %v941_v45 = vadd.f32 %v2718_v44, %v2762_v58  ;;  %v2227_v44 = vld [vmem:[%s3003_s7 + $0xc4] sm:$0xf] }
 0x651   : > { %v1043_v12 = vpop.xlane.xlu0 %1042 }
 0x652   : > { %v1044_v59 = vsub.f32 %v1040_v50, %v1043_v12  ;;  %v2228_v12 = vld [vmem:[%s3003_s7 + $0xcc] sm:$0xf] }
 0x654   : > { %v1045_v60 = vmul.f32 1.442695, %v1044_v59  ;;  %v2083_v59 = vld [vmem:[%s3003_s7 + $0xd8] sm:$0xf0] }
 0x656   : > { %2294 = vpow2.f32 %v1045_v60  ;;  %v2086_v60 = vor.u32 %v2228_v12, %v2083_v59  ;;  %v1977_v12 = vld [vmem:[%s3003_s7] sm:$0xf] }
 0x657   : > { %v914_v61 = vpop.f32.mrf.mxu3 }
 0x658   : > { %v2057_v61 = vld [vmem:[%s3003_s7 + $0xa0] sm:$0xf] }
 0x65c   : > { %v2295_v62 = vpop.eup %2294 }
 0x65d   : > { %v1047_v41 = vsel %vm720_vm7, %v2295_v62, 0.0 }
 0x65e   : > { %1048 = vadd.xlane.f32.xlu2 %v1047_v41  ;;  %v2223_v41 = vld [vmem:[%s3003_s7 + $0xa4] sm:$0xf] }
 0x661   : > { %v1203_v42 = vpop.xlane.xlu1 %1202 }
 0x662   : > { %v1204_v63 = vsub.f32 %v1200_v55, %v1203_v42  ;;  %v2081_v55 = vld [vmem:[%s3003_s7 + $0xc8] sm:$0xf] }
 0x663   : > { %v2082_v58 = vor.u32 %v2230_v56, %v2081_v55 }
 0x664   : > { %v1205_v1 = vmul.f32 1.442695, %v1204_v63  ;;  %v1214_v6 = vpop.permute.xlu0 %1213  ;;  %v2059_v63 = vld [vmem:[%s3003_s7 + $0xb0] sm:$0xf0] }
 0x665   : > { %v1219_v7 = vsel %vm737_vm5, %v1214_v6, 0 }
 0x666   : > { %2296 = vpow2.f32 %v1205_v1  ;;  %v2065_v1 = vld [vmem:[%s3003_s7 + $0xa8] sm:$0xf] }
 0x66c   : > { %v2297_v2 = vpop.eup %2296 }
 0x66d   : > { %v1207_v3 = vsel %vm720_vm7, %v2297_v2, 0.0 }
 0x66e   : > { %1208 = vadd.xlane.f32.xlu1 %v1207_v3  ;;  %v2062_v3 = vor.u32 %v2223_v41, %v2059_v63  ;;  %v1985_v63 = vld [vmem:[%s3003_s7 + $0x8] sm:$0xf] }
 0x679   : > { %v1054_v4 = vpop.permute.xlu1 %1053 }
 0x67a   : > { %v1059_v5 = vsel %vm737_vm5, %v1054_v4, 0  ;;  %v2224_v4 = vld [vmem:[%s3003_s7 + $0xac] sm:$0xf] }
 0x67b   : > { %1068 = vmatpush.bf16.msrb.mxu3 %v1059_v5  ;;  %v2067_v5 = vld [vmem:[%s3003_s7 + $0xb8] sm:$0xf0] }
 0x67f   : > { %1228 = vmatpush.bf16.msra.mxu3 %v1219_v7  ;;  %v2070_v7 = vor.u32 %v2224_v4, %v2067_v5 }
 0x6d1   : > { %v1049_v10 = vpop.xlane.xlu2 %1048 }
 0x6d2   : > { %2298 = vrcp.f32 %v1049_v10  ;;  %v2219_v10 = vld [vmem:[%s3003_s7 + $0x84] sm:$0xf] }
 0x6d8   : > { %v2299_v13 = vpop.eup %2298 }
 0x6d9   : > { %v1051_v14 = vmul.f32 %v2299_v13, %v2295_v62  ;;  %v2225_v62 = vld [vmem:[%s3003_s7 + $0xac] sm:$0xf0]  ;;  %v2042_v13 = vor.u32 %v2221_v9, %v2041_v8 }
 0x6da   : > { %v2058_v42 = vor.u32 %v2225_v62, %v2057_v61  ;;  %v2203_v61 = vld [vmem:[%s3003_s7 + $0x4] sm:$0xf]  ;;  %v1979_v62 = vld [vmem:[%s3003_s7 + $0x10] sm:$0xf0] }
 0x6db   : > { %v1052_v37 = vpack.c.bf16 %v1051_v14, %v1051_v14  ;;  %v2043_v14 = vld [vmem:[%s3003_s7 + $0x90] sm:$0xf0] }
 0x6dc   : > { %1481 = vmatpush.bf16.msrb.mxu1 %v2058_v42  ;;  %v1982_v42 = vor.u32 %v2203_v61, %v1979_v62 }
 0x6dd   : > { %1953 = vmatmul.msk.bf16.vlgmr.msrb.gmra.mxu3 %vm720_vm7, %v1052_v37  ;;  %v2049_v37 = vld [vmem:[%s3003_s7 + $0x88] sm:$0xf] }
 0x6de   : > { %1505 = vmatpush.bf16.msrb.mxu3 %v2098_v35  ;;  %v2211_v35 = vld [vmem:[%s3003_s7 + $0x44] sm:$0xf] }
 0x6e0   : > { %1482 = vmatpush.bf16.msrb.mxu1 %v2042_v13 }
 0x6e1   : > { %v1209_v15 = vpop.xlane.xlu1 %1208 }
 0x6e2   : > { %2300 = vrcp.f32 %v1209_v15  ;;  %1506 = vmatpush.bf16.msrb.mxu3 %v2082_v58  ;;  %v2222_v15 = vld [vmem:[%s3003_s7 + $0x94] sm:$0xf0]  ;;  %v2003_v58 = vld [vmem:[%s3003_s7 + $0x38] sm:$0xf0] }
 0x6e8   : > { %v2301_v16 = vpop.eup %2300 }
 0x6e9   : > { %v1211_v17 = vmul.f32 %v2301_v16, %v2297_v2  ;;  %v2226_v2 = vld [vmem:[%s3003_s7 + $0xb4] sm:$0xf0]  ;;  %v2046_v16 = vor.u32 %v2219_v10, %v2043_v14 }
 0x6ea   : > { %v2066_v6 = vor.u32 %v2226_v2, %v2065_v1  ;;  %v2206_v1 = vld [vmem:[%s3003_s7 + $0x14] sm:$0xf0]  ;;  %v2204_v2 = vld [vmem:[%s3003_s7 + $0xc] sm:$0xf] }
 0x6eb   : > { %v1212_v18 = vpack.c.bf16 %v1211_v17, %v1211_v17  ;;  %v2050_v17 = vor.u32 %v2222_v15, %v2049_v37 }
 0x6ec   : > { %1507 = vmatpush.bf16.msrb.mxu3 %v2066_v6  ;;  %v1987_v6 = vld [vmem:[%s3003_s7 + $0x18] sm:$0xf0] }
 0x6ed   : > { %1965 = vmatmul.msk.bf16.vlgmr.msra.gmra.mxu3 %vm720_vm7, %v1212_v18  ;;  %v2220_v18 = vld [vmem:[%s3003_s7 + $0x8c] sm:$0xf]  ;;  %v1990_v4 = vor.u32 %v2204_v2, %v1987_v6 }
 0x6ee   : > { %v2054_v19 = vor.u32 %v2220_v18, %v2051_v36 }
 0x6f0   : > { %1508 = vmatpush.bf16.msrb.mxu3 %v2050_v17 }
 0x760   : > { %v1070_v20 = vpop.f32.mrf.mxu3 }
 0x761   : > { %v1074_v22 = vpack.c.bf16 %v1070_v20, %v1070_v20  ;;  %v2025_v20 = vld [vmem:[%s3003_s7 + $0x60] sm:$0xf] }
 0x763   : > { %1962 = vmatmul.msk.bf16.vlgmr.msrb.gmra.mxu0 %vm899_vm8, %v1074_v22  ;;  %v2217_v22 = vld [vmem:[%s3003_s7 + $0x6c] sm:$0xf0] }
 0x764   : > { %1518 = vmatpush.bf16.msrb.mxu0 %v2102_v39  ;;  %v2017_v39 = vld [vmem:[%s3003_s7 + $0x48] sm:$0xf] }
 0x768   : > { %v1072_v23 = vpop.f32.mrf.mxu3  ;;  %1519 = vmatpush.bf16.msrb.mxu0 %v2086_v60  ;;  %v2205_v60 = vld [vmem:[%s3003_s7 + $0xc] sm:$0xf0] }
 0x769   : > { %v2215_v23 = vld [vmem:[%s3003_s7 + $0x64] sm:$0xf]  ;;  %v1978_v41 = vor.u32 %v2205_v60, %v1977_v12 }
 0x76c   : > { %1520 = vmatpush.bf16.msrb.mxu0 %v2070_v7 }
 0x770   : > { %v1230_v24 = vpop.f32.mrf.mxu3  ;;  %1521 = vmatpush.bf16.msrb.mxu0 %v2054_v19  ;;  %v2242_v19 = vld [vmem:[#allocation2 + $0x38] sm:$0xff] }
 0x771   : > { %v1234_v25 = vpack.c.bf16 %v1230_v24, %v1230_v24  ;;  %v2026_v24 = vor.u32 %v2217_v22, %v2025_v20  ;;  %v2241_v20 = vld [vmem:[#allocation2 + $0x30] sm:$0xff]  ;;  %v2250_v22 = vld [vmem:[#allocation2 + $0x78] sm:$0xff] }
 0x773   : > { %1974 = vmatmul.msk.bf16.vlgmr.msra.gmra.mxu0 %vm899_vm8, %v1234_v25  ;;  %v2027_v25 = vld [vmem:[%s3003_s7 + $0x70] sm:$0xf0]  ;;  %1483 = vmatpush.bf16.msrb.mxu1 %v2026_v24 }
 0x774   : > { %v2030_v28 = vor.u32 %v2215_v23, %v2027_v25  ;;  %1522 = vmatpush.bf16.msrb.mxu0 %v2038_v32  ;;  %v2240_v23 = vld [vmem:[#allocation2 + $0x28] sm:$0xff]  ;;  %v2249_v24 = vld [vmem:[#allocation2 + $0x70] sm:$0xff]  ;;  %v2239_v25 = vld [vmem:[#allocation2 + $0x20] sm:$0xff] }
 0x775   : > { %v2245_v32 = vld [vmem:[#allocation2 + $0x50] sm:$0xff] }
 0x777   : > { %1484 = vmatpush.bf16.msrb.mxu1 %v2010_v11 }
 0x778   : > { %v1232_v26 = vpop.f32.mrf.mxu3 }
 0x779   : > { %v2033_v26 = vld [vmem:[%s3003_s7 + $0x68] sm:$0xf] }
 0x77a   : > { %v2034_v29 = vor.u32 %v2218_v27, %v2033_v26  ;;  %v2248_v26 = vld [vmem:[#allocation2 + $0x68] sm:$0xff]  ;;  %v2238_v27 = vld [vmem:[#allocation2 + $0x18] sm:$0xff] }
 0x77c   : > { %1509 = vmatpush.bf16.msrb.mxu3 %v2034_v29  ;;  %v2237_v29 = vld [vmem:[#allocation2 + $0x10] sm:$0xff] }
 0x7e0   : > { %v1099_v40 = vpop.f32.mrf.mxu0 }
 0x7e1   : > { %v1103_v46 = vadd.f32 %v1099_v40, %v941_v45  ;;  %v2214_v40 = vld [vmem:[%s3003_s7 + $0x54] sm:$0xf0] }
 0x7e2   : > { %v2018_v45 = vor.u32 %v2214_v40, %v2017_v39  ;;  %v2243_v40 = vld [vmem:[#allocation2 + $0x40] sm:$0xff] }
 0x7e4   : > { %1510 = vmatpush.bf16.msrb.mxu3 %v2018_v45 }
 0x7e8   : > { %v1101_v43 = vpop.f32.mrf.mxu0 }
 0x7e9   : > { %v2014_v43 = vor.u32 %v2211_v35, %v2011_v38  ;;  %v2244_v38 = vld [vmem:[#allocation2 + $0x48] sm:$0xff] }
 0x7f0   : > { %v1259_v47 = vpop.f32.mrf.mxu0 }
 0x7f1   : > { %v1263_v48 = vadd.f32 %v1259_v47, %v1103_v46  ;;  %v2212_v46 = vld [vmem:[%s3003_s7 + $0x4c] sm:$0xf]  ;;  %v2019_v47 = vld [vmem:[%s3003_s7 + $0x58] sm:$0xf0] }
 0x7f3   : > { %v2811_v49 = vadd.f32 %v1263_v48, %v2432_v0  ;;  %v2075_v0 = vld [vmem:[%s3003_s7 + $0xd0] sm:$0xf0]  ;;  %v2022_v48 = vor.u32 %v2212_v46, %v2019_v47 }
 0x7f4   : > { %v2078_v57 = vor.u32 %v2227_v44, %v2075_v0  ;;  %v1995_v44 = vld [vmem:[%s3003_s7 + $0x30] sm:$0xf0]  ;;  %v2210_v0 = vld [vmem:[%s3003_s7 + $0x34] sm:$0xf0] }
 0x7f5   : > { %v1265_v50 = vmul.f32 %v2811_v49, %v2811_v49  ;;  %1523 = vmatpush.bf16.msrb.mxu0 %v2022_v48  ;;  %v1998_v55 = vor.u32 %v2207_v52, %v1995_v44  ;;  %v2002_v56 = vor.u32 %v2210_v0, %v2001_v54 }
 0x7f6   : > { %1493 = vmatpush.bf16.msra.mxu2 %v2078_v57  ;;  %v2208_v57 = vld [vmem:[%s3003_s7 + $0x2c] sm:$0xf] }
 0x7f7   : > { %1266 = vadd.xlane.f32.xlu2 %v1265_v50  ;;  %v1993_v50 = vld [vmem:[%s3003_s7 + $0x20] sm:$0xf]  ;;  %v2006_v59 = vor.u32 %v2208_v57, %v2003_v58  ;;  %1511 = vmatpush.bf16.msrb.mxu3 %v2002_v56 }
 0x7f8   : > { %v1261_v51 = vpop.f32.mrf.mxu0 }
 0x7f9   : > { %v2209_v51 = vld [vmem:[%s3003_s7 + $0x2c] sm:$0xf0]  ;;  %1524 = vmatpush.bf16.msrb.mxu0 %v2006_v59 }
 0x7fa   : > { %1494 = vmatpush.bf16.msra.mxu2 %v2062_v3  ;;  %v1994_v53 = vor.u32 %v2209_v51, %v1993_v50  ;;  %v1986_v3 = vor.u32 %v2206_v1, %v1985_v63 }
 0x7fc   : > { %1485 = vmatpush.bf16.msrb.mxu1 %v1994_v53  ;;  %1512 = vmatpush.bf16.msrb.mxu3 %v1986_v3 }
 0x7fd   : > { %1525 = vmatpush.bf16.msrb.mxu0 %v1990_v4 }
 0x7fe   : > { %1495 = vmatpush.bf16.msra.mxu2 %v2046_v16  ;;  %v2281_v16 = vld [vmem:[%s3002_s6] ss:$0 sm:$0xff] }
 0x800   : > { %1486 = vmatpush.bf16.msrb.mxu1 %v1978_v41 }
 0x802   : > { %1496 = vmatpush.bf16.msra.mxu2 %v2030_v28  ;;  %v2247_v28 = vld [vmem:[#allocation2 + $0x60] sm:$0xff] }
 0x804   : > { %1703 = vmatpush.bf16.msra.mxu1 %v2242_v19 }
 0x806   : > { %1497 = vmatpush.bf16.msra.mxu2 %v2014_v43 }
 0x808   : > { %1704 = vmatpush.bf16.msra.mxu1 %v2241_v20 }
 0x80a   : > { %1498 = vmatpush.bf16.msra.mxu2 %v1998_v55 }
 0x80c   : > { %1705 = vmatpush.bf16.msra.mxu1 %v2240_v23 }
 0x80e   : > { %1499 = vmatpush.bf16.msra.mxu2 %v1982_v42 }
 0x810   : > { %1706 = vmatpush.bf16.msra.mxu1 %v2239_v25 }
 0x812   : > { %1716 = vmatpush.bf16.msrb.mxu2 %v2250_v22 }
 0x814   : > { %1707 = vmatpush.bf16.msra.mxu1 %v2238_v27 }
 0x816   : > { %1717 = vmatpush.bf16.msrb.mxu2 %v2249_v24 }
 0x818   : > { %1708 = vmatpush.bf16.msra.mxu1 %v2237_v29 }
 0x81a   : > { %1718 = vmatpush.bf16.msrb.mxu2 %v2248_v26 }
 0x81c   : > { %1709 = vmatpush.bf16.msra.mxu1 %v2236_v31 }
 0x81e   : > { %1719 = vmatpush.bf16.msrb.mxu2 %v2247_v28 }
 0x820   : > { %1710 = vmatpush.bf16.msra.mxu1 %v2235_v34 }
 0x822   : > { %1720 = vmatpush.bf16.msrb.mxu2 %v2246_v30 }
 0x826   : > { %1721 = vmatpush.bf16.msrb.mxu2 %v2245_v32 }
 0x82a   : > { %1722 = vmatpush.bf16.msrb.mxu2 %v2244_v38 }
 0x82e   : > { %1723 = vmatpush.bf16.msrb.mxu2 %v2243_v40 }
 0x86a   : > { %v1267_v5 = vpop.xlane.xlu2 %1266 }
 0x86b   : > { %v1268_v7 = vmul.f32 %v1267_v5, %v2598_v21 }
 0x86d   : > { %v1269_v8 = vadd.f32 1e-06, %v1268_v7 }
 0x86f   : > { %2302 = vrsqrt.f32 %v1269_v8  ;;  %vm1276_vm10 = vweird.f32 %v1269_v8 }
 0x875   : > { %v2303_v9 = vpop.eup %2302 }
 0x876   : > { %v1271_v10 = vmul.f32 %v2303_v9, %v1269_v8  ;;  %vm1277_vm9 = vweird.f32 %v2303_v9 }
 0x877   : > { %vm1278_vm11 = vmor %vm1276_vm10, %vm1277_vm9 }
 0x878   : > { %v1272_v13 = vmul.f32 %v2303_v9, %v1271_v10 }
 0x87a   : > { %v1273_v14 = vmul.f32 0.5, %v1272_v13 }
 0x87c   : > { %v1274_v37 = vsub.f32 1.5, %v1273_v14 }
 0x87e   : > { %v1275_v15 = vmul.f32 %v2303_v9, %v1274_v37 }
 0x880   : > { %v1279_v17 = vsel %vm1278_vm11, %v2303_v9, %v1275_v15 }
 0x881   : > { %v1280_v18 = vmul.f32 %v1279_v17, %v2811_v49 }
 0x883   : > { %v1285_v36 = vmul.f32 %v2281_v16, %v1280_v18 }
 0x885   : > { %v1286_v21 = vpack.c.bf16 %v1285_v36, %v1285_v36 }
 0x887   : > { %1487 = vmatmul.bf16.vlgmr.msrb.gmra.mxu1 %v1286_v21  ;;  %1500 = vmatmul.bf16.vlgmr.msra.gmra.mxu2 %v1286_v21 }
 0x888   : > { %1513 = vmatmul.bf16.vlgmr.msrb.gmra.mxu3 %v1286_v21  ;;  %1526 = vmatmul.bf16.vlgmr.msrb.gmra.mxu0 %v1286_v21 }
 0x904   : > { %v1488_v33 = vpop.f32.mrf.mxu1 }
 0x905   : > { %v2103_v35 = vmul.f32 -1.442695, %v1488_v33  ;;  %v1527_v11 = vpop.f32.mrf.mxu0 }
 0x907   : > { %2304 = vpow2.f32 %v2103_v35 }
 0x90a   : > { %v1501_v39 = vpop.f32.mrf.mxu2 }
 0x90b   : > { %v2104_v43 = vmul.f32 -1.442695, %v1501_v39  ;;  %v1514_v45 = vpop.f32.mrf.mxu3 }
 0x90c   : > { %v1490_v46 = vpop.f32.mrf.mxu1 }
 0x90d   : > { %v2305_v47 = vpop.eup %2304  ;;  %2306 = vpow2.f32 %v2104_v43  ;;  %v1529_v48 = vpop.f32.mrf.mxu0 }
 0x90e   : > { %v1537_v50 = vadd.f32 1.0, %v2305_v47 }
 0x910   : > { %2308 = vrcp.f32 %v1537_v50  ;;  %v1550_v56 = vand.u32 2147483648, %v1537_v50  ;;  %v1548_v58 = vand.u32 2147483647, %v1537_v50  ;;  %vm1544_vm13 = vweird.f32 %v1537_v50 }
 0x912   : > { %v1503_v51 = vpop.f32.mrf.mxu2  ;;  %v1551_v61 = vor.u32 1.1754944e-38, %v1550_v56  ;;  %vm1549_vm15 = vcmp.eq.f32.partialorder %v1548_v58, 8.507059e+37 }
 0x913   : > { %v2307_v52 = vpop.eup %2306  ;;  %v1516_v53 = vpop.f32.mrf.mxu3 }
 0x914   : > { %v1538_v44 = vadd.f32 1.0, %v2307_v52 }
 0x916   : > { %v2309_v54 = vpop.eup %2308  ;;  %2310 = vrcp.f32 %v1538_v44  ;;  %v1565_v63 = vand.u32 2147483648, %v1538_v44  ;;  %v1563_v3 = vand.u32 2147483647, %v1538_v44  ;;  %vm1559_vm1 = vweird.f32 %v1538_v44 }
 0x917   : > { %v1540_v0 = vmul.f32 %v2309_v54, %v1537_v50  ;;  %vm1545_vm12 = vweird.f32 %v2309_v54 }
 0x918   : > { %vm1546_vm14 = vmor %vm1544_vm13, %vm1545_vm12  ;;  %v1566_v5 = vor.u32 1.1754944e-38, %v1565_v63  ;;  %vm1564_vm3 = vcmp.eq.f32.partialorder %v1563_v3, 8.507059e+37 }
 0x919   : > { %v1541_v55 = vsub.f32 1.0, %v1540_v0 }
 0x91b   : > { %v1542_v57 = vmul.f32 %v2309_v54, %v1541_v55 }
 0x91c   : > { %v2311_v12 = vpop.eup %2310 }
 0x91d   : > { %v1543_v59 = vadd.f32 %v2309_v54, %v1542_v57  ;;  %v1555_v60 = vmul.f32 %v2311_v12, %v1538_v44  ;;  %vm1560_vm0 = vweird.f32 %v2311_v12 }
 0x91e   : > { %vm1561_vm2 = vmor %vm1559_vm1, %vm1560_vm0 }
 0x91f   : > { %v1547_v62 = vsel %vm1546_vm14, %v2309_v54, %v1543_v59  ;;  %v1556_v41 = vsub.f32 1.0, %v1555_v60 }
 0x920   : > { %v1552_v42 = vsel %vm1549_vm15, %v1551_v61, %v1547_v62 }
 0x921   : > { %v1569_v1 = vmul.f32 %v1552_v42, %v1488_v33  ;;  %v1557_v2 = vmul.f32 %v2311_v12, %v1556_v41 }
 0x923   : > { %v1558_v6 = vadd.f32 %v2311_v12, %v1557_v2  ;;  %v1571_v4 = vmul.f32 %v1569_v1, %v1514_v45 }
 0x925   : > { %v1562_v7 = vsel %vm1561_vm2, %v2311_v12, %v1558_v6  ;;  %v1573_v8 = vpack.c.bf16 %v1571_v4, %v1571_v4 }
 0x926   : > { %v1567_v9 = vsel %vm1564_vm3, %v1566_v5, %v1562_v7 }
 0x927   : > { %v1570_v10 = vmul.f32 %v1567_v9, %v1501_v39  ;;  %1711 = vmatmul.bf16.vlgmr.msra.gmra.mxu1 %v1573_v8 }
 0x929   : > { %v1572_v13 = vmul.f32 %v1570_v10, %v1527_v11 }
 0x92b   : > { %v1574_v14 = vpack.c.bf16 %v1572_v13, %v1572_v13 }
 0x92d   : > { %1724 = vmatmul.bf16.vlgmr.msrb.gmra.mxu2 %v1574_v14 }
 0x9a4   : > { %v1712_v37 = vpop.f32.mrf.mxu1 }
 0x9ac   : > { %v1714_v15 = vpop.f32.mrf.mxu1 }
 0x9b0   : > { %v1725_v16 = vpop.f32.mrf.mxu2 }
 0x9b1   : > { %v1726_v17 = vadd.f32 %v1725_v16, %v1712_v37 }
 0x9b3   : > { %v1729_v18 = vadd.f32 %v1726_v17, %v2811_v49 }
 0x9b5   : > { %1730 = vst [vmem:[%s378_s25] sm:$0xff] %v1729_v18 }
 0x9b8   : > { %v1727_v36 = vpop.f32.mrf.mxu2 }
 0x9b9 PF: > { %s20_s30 = sadd.s32 1, %s2352_s30  }
 0x9ba   : > { %p17_p7 = scmp.ge.s32.totalorder %s20_s30, 4  }
 0x9bc   :  { %19 = sbr.rel (!%p17_p7) target bundleno = 1 (0x1), region = 97 }
 0x9c1   :  { %1750 = vsyncpa [#allocation3], 1 }
 0x9c2   :  { %1752 = vsyncpa [#allocation3 + $0x1], 1 }

// kernel: llava_forward.12
= control target key start
LH: loop header
LB: loop body
LE: loop exit
PB: predicated region body
PF: predicated region fallthrough
CT: control target
= control target key end

     0   :  { %14 = vsyncpa [#allocation3], 0  ;;  %s3062_s0 = inlined_call_operand.vmem [shape: f32[2,8,128], index: 0, kind: input, shape index: {}]   ;;  %s3063_s1 = inlined_call_operand.vmem [shape: f32[1,128], index: 1, kind: input, shape index: {}]   ;;  %s3064_s2 = inlined_call_operand.vmem [shape: bf16[128,384], index: 2, kind: input, shape index: {}]   ;;  %s3065_s3 = inlined_call_operand.hbm [shape: bf16[128,128], index: 3, kind: input, shape index: {}]   ;;  %s3066_s4 = inlined_call_operand.vmem [shape: f32[2,8,16], index: 4, kind: input, shape index: {}]   ;;  %s3067_s5 = inlined_call_operand.vmem [shape: f32[2,8,16], index: 5, kind: input, shape index: {}]   ;;  %s3068_s6 = inlined_call_operand.vmem [shape: f32[1,128], index: 6, kind: input, shape index: {}]   ;;  %s3069_s7 = inlined_call_operand.vmem [shape: bf16[128,512], index: 7, kind: input, shape index: {}]   ;;  %s3070_s8 = inlined_call_operand.hbm [shape: bf16[256,128], index: 8, kind: input, shape index: {}]   ;;  %s3071_s9 = inlined_call_operand.vmem [shape: f32[2,8,128], index: 9, kind: output, shape index: {}]  }
   0x1   :  { %15 = vsyncpa [#allocation5], 0  ;;  %s2489_s30 = smov 0  }
   0x2 LB: > { %s273_s12 = sshll.u32 %s3065_s3, 4  ;;  %s1847_s13 = sadd.s32 4294967295, %s2425_s30   ;;  %s2425_s30 = sphi %s2489_s30, %s21_s30   ;;  %s274_s12 = int_to_ptr.hbm [resolvable:$true] %s273_s12 }
   0x3   : > { %p1849_p0 = scmp.ge.s32.totalorder %s2425_s30, 1  ;;  %p256_p1 = scmp.lt.s32.totalorder %s2425_s30, 3 }
   0x4   : > { %p2295_p2 = scmp.eq.s32.totalorder %s1847_s13, 0  ;;  %s2427_s15 = smov [#allocation2]  }
   0x5   : > { %p2500_p3 = pnand %p1849_p0, %p256_p1  ;;  %s275_s16 = sshll.u32 %s2427_s15, 4  ;;  %s276_s16 = int_to_ptr.vmem [resolvable:$true] %s275_s16 }
   0x6   : > { %s293_s19 = sshll.u32 %s3070_s8, 4  ;;  %s2428_s20 = smov [#allocation4]   ;;  %s294_s19 = int_to_ptr.hbm [resolvable:$true] %s293_s19 }
   0x7   : > { %p2288_p4 = pneg %p2500_p3  ;;  %s295_s21 = sshll.u32 %s2428_s20, 4  ;;  %s296_s21 = int_to_ptr.vmem [resolvable:$true] %s295_s21 }
   0x8   : > { %s2429_s22 = smov 64   ;;  %s2430_s23 = smov 4  }
   0x9   : > { %p2289_p5 = pnand %p2295_p2, %p2288_p4  ;;  %332 = sbr.rel (%p2500_p3) target bundleno = 2494 (0x9be), region = 56 }
   0xb   : > { %2291 = dma.hbm_to_vmem [thread:$0]  (!%p2289_p5), %s274_s12, 1024, %s276_s16, [#allocation3], %s2429_s22, %s2429_s22, %s2430_s23  }
   0xc   : > { %2294 = dma.hbm_to_vmem [thread:$0]  (!%p2289_p5), %s294_s19, 2048, %s296_s21, [#allocation5], %s2429_s22, %s2429_s22, %s2430_s23  }
   0xe   : > { %2416 = dma.done.wait (%p2295_p2), [#allocation3], 1024  }
   0xf   : > { %2418 = vsyncadd (%p2295_p2), [#allocation3], 4294966272 }
  0x10   : > { %2420 = dma.done.wait (%p2295_p2), [#allocation5], 2048  }
  0x11   : > { %2422 = vsyncadd (%p2295_p2), [#allocation5], 4294965248  ;;  %p380_p6 = scmp.lt.s32.totalorder %s1847_s13, 1  ;;  %v1946_v2 = vld [vmem:[%s3064_s2 + $0xa8] sm:$0xf]  ;;  %s2432_s28 = smov 32  }
  0x12   : > { %v2222_v3 = vld [vmem:[%s3064_s2 + $0xb0] sm:$0xf0]  ;;  %v2221_v4 = vld [vmem:[%s3064_s2 + $0xac] sm:$0xf]  ;;  %v1948_v6 = vld [vmem:[%s3064_s2 + $0xb4] sm:$0xf0] }
  0x13   : > { %s3074_s13 = smov (!%p380_p6, %s1847_s13), 1  ;;  %v1947_v5 = vor.u32 %v2222_v3, %v1946_v2  ;;  %v1954_v7 = vld [vmem:[%s3064_s2 + $0xb0] sm:$0xf]  ;;  %v2223_v8 = vld [vmem:[%s3064_s2 + $0xb8] sm:$0xf0]  ;;  %v1951_v9 = vor.u32 %v2221_v4, %v1948_v6  ;;  %v2433_v29 = vmov 128.0  }
  0x14   : > { %s2516_s24 = sshll.u32 %s3074_s13, 3  ;;  %v1955_v10 = vor.u32 %v2223_v8, %v1954_v7  ;;  %v1934_v13 = vld [vmem:[%s3064_s2 + $0x90] sm:$0xf]  ;;  %v2219_v14 = vld [vmem:[%s3064_s2 + $0x98] sm:$0xf0]  ;;  %2321 = vrcp.f32 %v2433_v29  ;;  %s2434_s10 = smov 112  }
  0x15   : > { %s383_s27 = scalar_lea.vmem %s3062_s0, %s2516_s24  ;;  %587 = vmatpush.bf16.msra.mxu0 %v1947_v5  ;;  %600 = vmatpush.bf16.msra.mxu1 %v1951_v9  ;;  %s387_s22 = scalar_lea.vmem %s3066_s4, %s2516_s24  ;;  %v2218_v15 = vld [vmem:[%s3064_s2 + $0x94] sm:$0xf]  ;;  %v1935_v16 = vor.u32 %v2219_v14, %v1934_v13  ;;  %v1936_v17 = vld [vmem:[%s3064_s2 + $0x9c] sm:$0xf0]  ;;  %v1942_v18 = vld [vmem:[%s3064_s2 + $0x98] sm:$0xf] }
  0x16   : > { %v2522_v0 = vld [vmem:[%s383_s27] sm:$0xff]  ;;  %613 = vmatpush.bf16.msra.mxu2 %v1955_v10  ;;  %s391_s26 = scalar_lea.vmem %s3067_s5, %s2516_s24  ;;  %s2431_s27 = smov 16   ;;  %v1939_v20 = vor.u32 %v2218_v15, %v1936_v17  ;;  %v1922_v22 = vld [vmem:[%s3064_s2 + $0x78] sm:$0xf]  ;;  %v2215_v24 = vld [vmem:[%s3064_s2 + $0x7c] sm:$0xf] }
  0x17   : > { %v398_v1 = vmul.f32 %v2522_v0, %v2522_v0  ;;  %v2552_v11 = vld [vmem:[%s387_s22] sm:$0xff]  ;;  %v1924_v26 = vld [vmem:[%s3064_s2 + $0x84] sm:$0xf0]  ;;  %v2217_v28 = vld [vmem:[%s3064_s2 + $0x88] sm:$0xf0]  ;;  %s2435_s11 = smov 48  }
  0x18   : > { %v2554_v12 = vld [vmem:[%s391_s26] sm:$0xff]  ;;  %v1927_v30 = vor.u32 %v2215_v24, %v1924_v26  ;;  %v2213_v33 = vld [vmem:[%s3064_s2 + $0x68] sm:$0xf0]  ;;  %v1912_v36 = vld [vmem:[%s3064_s2 + $0x6c] sm:$0xf0]  ;;  %vm697_vm4 = vcmask 130048  }
  0x19   : > { %399 = vadd.xlane.f32.xlu0 %v398_v1  ;;  %651 = vrot.lane.b32.xlu2 %v2554_v12, %s2431_s27  ;;  %v2220_v19 = vld [vmem:[%s3064_s2 + $0xa0] sm:$0xf0]  ;;  %v1930_v27 = vld [vmem:[%s3064_s2 + $0x80] sm:$0xf]  ;;  %v1918_v37 = vld [vmem:[%s3064_s2 + $0x68] sm:$0xf] }
  0x1a   : > { %v1943_v21 = vor.u32 %v2220_v19, %v1942_v18  ;;  %588 = vmatpush.bf16.msra.mxu0 %v1935_v16  ;;  %601 = vmatpush.bf16.msra.mxu1 %v1939_v20  ;;  %v2216_v23 = vld [vmem:[%s3064_s2 + $0x80] sm:$0xf0]  ;;  %v1931_v31 = vor.u32 %v2217_v28, %v1930_v27  ;;  %v1910_v32 = vld [vmem:[%s3064_s2 + $0x60] sm:$0xf]  ;;  %v2214_v38 = vld [vmem:[%s3064_s2 + $0x70] sm:$0xf0]  ;;  %v2322_v41 = vpop.eup %2321 }
  0x1b   : > { %v1923_v25 = vor.u32 %v2216_v23, %v1922_v22  ;;  %v2212_v34 = vld [vmem:[%s3064_s2 + $0x64] sm:$0xf]  ;;  %v1911_v35 = vor.u32 %v2213_v33, %v1910_v32  ;;  %v1919_v40 = vor.u32 %v2214_v38, %v1918_v37  ;;  %v1898_v42 = vld [vmem:[%s3064_s2 + $0x48] sm:$0xf]  ;;  %v2210_v43 = vld [vmem:[%s3064_s2 + $0x50] sm:$0xf0]  ;;  %vm406_vm0 = vweird.f32 %v2322_v41 }
  0x1c   : > { %614 = vmatpush.bf16.msra.mxu2 %v1943_v21  ;;  %v1915_v39 = vor.u32 %v2212_v34, %v1912_v36  ;;  %v2209_v44 = vld [vmem:[%s3064_s2 + $0x4c] sm:$0xf]  ;;  %v1899_v45 = vor.u32 %v2210_v43, %v1898_v42  ;;  %v1900_v46 = vld [vmem:[%s3064_s2 + $0x54] sm:$0xf0]  ;;  %v1906_v47 = vld [vmem:[%s3064_s2 + $0x50] sm:$0xf] }
  0x1d   : > { %v2211_v48 = vld [vmem:[%s3064_s2 + $0x58] sm:$0xf0]  ;;  %v1903_v49 = vor.u32 %v2209_v44, %v1900_v46  ;;  %v402_v51 = vmul.f32 128.0, %v2322_v41  ;;  %v1886_v52 = vld [vmem:[%s3064_s2 + $0x30] sm:$0xf]  ;;  %vm754_vm5 = vcmask 1043456  }
  0x1e   : > { %589 = vmatpush.bf16.msra.mxu0 %v1923_v25  ;;  %602 = vmatpush.bf16.msra.mxu1 %v1927_v30  ;;  %v1907_v50 = vor.u32 %v2211_v48, %v1906_v47  ;;  %v2207_v53 = vld [vmem:[%s3064_s2 + $0x38] sm:$0xf0]  ;;  %v2206_v54 = vld [vmem:[%s3064_s2 + $0x34] sm:$0xf]  ;;  %v1888_v56 = vld [vmem:[%s3064_s2 + $0x3c] sm:$0xf0] }
  0x1f   : > { %v1887_v55 = vor.u32 %v2207_v53, %v1886_v52  ;;  %v1894_v57 = vld [vmem:[%s3064_s2 + $0x38] sm:$0xf]  ;;  %v2208_v58 = vld [vmem:[%s3064_s2 + $0x40] sm:$0xf0]  ;;  %v1891_v59 = vor.u32 %v2206_v54, %v1888_v56  ;;  %v403_v61 = vsub.f32 1.0, %v402_v51  ;;  %s2436_s12 = smov 96  }
  0x20   : > { %615 = vmatpush.bf16.msra.mxu2 %v1931_v31  ;;  %v1895_v60 = vor.u32 %v2208_v58, %v1894_v57  ;;  %v1874_v62 = vld [vmem:[%s3064_s2 + $0x18] sm:$0xf]  ;;  %v2204_v63 = vld [vmem:[%s3064_s2 + $0x20] sm:$0xf0]  ;;  %v2203_v1 = vld [vmem:[%s3064_s2 + $0x1c] sm:$0xf] }
  0x21   : > { %v1875_v2 = vor.u32 %v2204_v63, %v1874_v62  ;;  %v1876_v3 = vld [vmem:[%s3064_s2 + $0x24] sm:$0xf0]  ;;  %v1882_v4 = vld [vmem:[%s3064_s2 + $0x20] sm:$0xf]  ;;  %v2205_v5 = vld [vmem:[%s3064_s2 + $0x28] sm:$0xf0]  ;;  %v404_v13 = vmul.f32 %v2322_v41, %v403_v61 }
  0x22   : > { %590 = vmatpush.bf16.msra.mxu0 %v1911_v35  ;;  %603 = vmatpush.bf16.msra.mxu1 %v1915_v39  ;;  %v1879_v6 = vor.u32 %v2203_v1, %v1876_v3  ;;  %v1883_v7 = vor.u32 %v2205_v5, %v1882_v4  ;;  %v1862_v8 = vld [vmem:[%s3064_s2] sm:$0xf]  ;;  %v2201_v9 = vld [vmem:[%s3064_s2 + $0x8] sm:$0xf0]  ;;  %v2200_v10 = vld [vmem:[%s3064_s2 + $0x4] sm:$0xf] }
  0x23   : > { %v1863_v14 = vor.u32 %v2201_v9, %v1862_v8  ;;  %v1864_v15 = vld [vmem:[%s3064_s2 + $0xc] sm:$0xf0]  ;;  %v1870_v16 = vld [vmem:[%s3064_s2 + $0x8] sm:$0xf]  ;;  %v2202_v17 = vld [vmem:[%s3064_s2 + $0x10] sm:$0xf0]  ;;  %v405_v20 = vadd.f32 %v2322_v41, %v404_v13 }
  0x24   : > { %616 = vmatpush.bf16.msra.mxu2 %v1919_v40  ;;  %v1867_v18 = vor.u32 %v2200_v10, %v1864_v15  ;;  %v1871_v19 = vor.u32 %v2202_v17, %v1870_v16  ;;  %v2319_v31 = vld [vmem:[%s3063_s1] ss:$0 sm:$0xff]  ;;  %s2437_s13 = smov 80   ;;  %s2438_s14 = smov 64   ;;  %vm737_vm7 = vcmask 64512   ;;  %vm916_vm8 = vcmask 261120  }
  0x25   : > { %v2688_v21 = vsel %vm406_vm0, %v2322_v41, %v405_v20 }
  0x26   : > { %591 = vmatpush.bf16.msra.mxu0 %v1899_v45  ;;  %604 = vmatpush.bf16.msra.mxu1 %v1903_v49 }
  0x28   : > { %617 = vmatpush.bf16.msra.mxu2 %v1907_v50 }
  0x2a   : > { %592 = vmatpush.bf16.msra.mxu0 %v1887_v55  ;;  %605 = vmatpush.bf16.msra.mxu1 %v1891_v59 }
  0x2c   : > { %618 = vmatpush.bf16.msra.mxu2 %v1895_v60 }
  0x2d   : > { %663 = vrot.lane.b32.xlu0 %v2552_v11, %s2431_s27 }
  0x2e   : > { %593 = vmatpush.bf16.msra.mxu0 %v1875_v2  ;;  %606 = vmatpush.bf16.msra.mxu1 %v1879_v6 }
  0x30   : > { %619 = vmatpush.bf16.msra.mxu2 %v1883_v7 }
  0x32   : > { %594 = vmatpush.bf16.msra.mxu0 %v1863_v14  ;;  %607 = vmatpush.bf16.msra.mxu1 %v1867_v18 }
  0x34   : > { %620 = vmatpush.bf16.msra.mxu2 %v1871_v19 }
  0x35   : > { %791 = vrot.lane.b32.xlu0 %v2554_v12, %s2432_s28 }
  0x73   : > { %v652_v50 = vpop.permute.xlu2 %651 }
  0x8c   : > { %v400_v22 = vpop.xlane.xlu0 %399 }
  0x8d   : > { %v408_v23 = vmul.f32 %v2688_v21, %v400_v22 }
  0x8f   : > { %v409_v24 = vadd.f32 1e-06, %v408_v23 }
  0x91   : > { %2323 = vrsqrt.f32 %v409_v24  ;;  %vm416_vm2 = vweird.f32 %v409_v24 }
  0x97   : > { %v2324_v25 = vpop.eup %2323 }
  0x98   : > { %v411_v26 = vmul.f32 %v2324_v25, %v409_v24  ;;  %vm417_vm1 = vweird.f32 %v2324_v25 }
  0x99   : > { %vm418_vm3 = vmor %vm416_vm2, %vm417_vm1 }
  0x9a   : > { %v412_v27 = vmul.f32 %v2324_v25, %v411_v26 }
  0x9c   : > { %v413_v28 = vmul.f32 0.5, %v412_v27 }
  0x9e   : > { %v414_v29 = vsub.f32 1.5, %v413_v28 }
  0x9f   : > { %v664_v44 = vpop.permute.xlu0 %663 }
  0xa0   : > { %v415_v30 = vmul.f32 %v2324_v25, %v414_v29 }
  0xa2   : > { %v419_v32 = vsel %vm418_vm3, %v2324_v25, %v415_v30 }
  0xa3   : > { %v420_v33 = vmul.f32 %v419_v32, %v2522_v0 }
  0xa5   : > { %v425_v34 = vmul.f32 %v2319_v31, %v420_v33 }
  0xa7   : > { %v426_v35 = vpack.c.bf16 %v425_v34, %v425_v34  ;;  %v792_v57 = vpop.permute.xlu0 %791 }
  0xa9   : > { %595 = vmatmul.bf16.vlgmr.msra.gmra.mxu0 %v426_v35  ;;  %608 = vmatmul.bf16.vlgmr.msra.gmra.mxu1 %v426_v35 }
  0xaa   : > { %621 = vmatmul.bf16.vlgmr.msra.gmra.mxu2 %v426_v35 }
 0x126   : > { %v2695_v36 = vpop.f32.mrf.mxu0  ;;  %v2697_v37 = vpop.f32.mrf.mxu1 }
 0x127   : > { %v684_v38 = vmul.f32 %v2554_v12, %v2697_v37  ;;  %v667_v42 = vmul.f32 %v2554_v12, %v2695_v36  ;;  %v683_v45 = vmul.f32 %v664_v44, %v2697_v37  ;;  %v666_v49 = vmul.f32 %v664_v44, %v2695_v36 }
 0x128   : > { %v676_v54 = vmul.f32 %v652_v50, %v2697_v37  ;;  %v654_v56 = vmul.f32 %v652_v50, %v2695_v36  ;;  %v811_v58 = vmul.f32 %v792_v57, %v2697_v37  ;;  %v675_v61 = vmul.f32 %v2552_v11, %v2697_v37 }
 0x129   : > { %686 = vrot.lane.b32.xlu1 %v684_v38, %s2431_s27  ;;  %v794_v7 = vmul.f32 %v792_v57, %v2695_v36  ;;  %v649_v10 = vmul.f32 %v2552_v11, %v2695_v36 }
 0x12d   : > { %v622_v39 = vpop.f32.mrf.mxu2 }
 0x12e   : > { %v598_v40 = vpop.f32.mrf.mxu0  ;;  %v611_v41 = vpop.f32.mrf.mxu1  ;;  %v2729_v6 = vpack.c.bf16 %v622_v39, %v622_v39 }
 0x12f   : > { %v628_v40 = vlaneseq }
 0x130   : > { %v756_v9 = vsel %vm754_vm5, %v2729_v6, 0 }
 0x131   : > { %669 = vrot.lane.b32.xlu1 %v667_v42, %s2431_s27  ;;  %v2747_v41 = vshrl.u32 %v628_v40, 7  ;;  %v2749_v42 = vand.u32 127, %v628_v40 }
 0x133   : > { %vm632_vm6 = vcmp.le.s32.totalorder %v2749_v42, %v2747_v41 }
 0x135   : > { %v624_v43 = vpop.f32.mrf.mxu2 }
 0x19b   : > { %v687_v46 = vpop.permute.xlu1 %686 }
 0x19c   : > { %v689_v47 = vadd.f32 %v687_v46, %v683_v45 }
 0x19e   : > { %v690_v48 = vpack.c.bf16 %v689_v47, %v689_v47 }
 0x1a0   : > { %695 = vrot.lane.b32.xlu2 %v690_v48, %s2434_s10 }
 0x1a3   : > { %v670_v51 = vpop.permute.xlu1 %669 }
 0x1a4   : > { %v672_v52 = vadd.f32 %v670_v51, %v666_v49 }
 0x1a6   : > { %v673_v53 = vmul.f32 0.17677669, %v672_v52 }
 0x1a8   : > { %v674_v55 = vpack.c.bf16 %v673_v53, %v673_v53  ;;  %678 = vrot.lane.b32.xlu2 %v676_v54, %s2434_s10 }
 0x1aa   : > { %692 = vrot.lane.b32.xlu1 %v674_v55, %s2434_s10 }
 0x1b0   : > { %776 = vrot.lane.b32.xlu2 %v2554_v12, %s2435_s11 }
 0x1b2   : > { %656 = vrot.lane.b32.xlu1 %v654_v56, %s2434_s10 }
 0x1b8   : > { %772 = vrot.lane.b32.xlu2 %v2552_v11, %s2432_s28 }
 0x1c0   : > { %787 = vrot.lane.b32.xlu2 %v2552_v11, %s2435_s11 }
 0x1c8   : > { %813 = vrot.lane.b32.xlu2 %v811_v58, %s2431_s27 }
 0x1fa   : > { %v696_v59 = vpop.permute.xlu2 %695 }
 0x1fb   : > { %v702_v60 = vsel %vm697_vm4, %v696_v59, 0 }
 0x1fc   : > { %711 = vmatpush.bf16.xpose.msra.mxu3 %v702_v60 }
 0x202   : > { %v679_v62 = vpop.permute.xlu2 %678 }
 0x203   : > { %v681_v63 = vsub.f32 %v675_v61, %v679_v62 }
 0x205   : > { %v682_v1 = vpack.c.bf16 %v681_v63, %v681_v63 }
 0x207   : > { %v721_v2 = vsel %vm697_vm4, %v682_v1, 0 }
 0x208   : > { %730 = vmatpush.bf16.xpose.msrb.mxu3 %v721_v2 }
 0x20a   : > { %v777_v3 = vpop.permute.xlu2 %776 }
 0x20b   : > { %v803_v4 = vmul.f32 %v777_v3, %v2697_v37  ;;  %v779_v5 = vmul.f32 %v777_v3, %v2695_v36 }
 0x20d   : > { %805 = vrot.lane.b32.xlu0 %v803_v4, %s2434_s10 }
 0x212   : > { %v773_v17 = vpop.permute.xlu2 %772 }
 0x213   : > { %v802_v19 = vmul.f32 %v773_v17, %v2697_v37  ;;  %v775_v26 = vmul.f32 %v773_v17, %v2695_v36  ;;  %v2224_v17 = vld [vmem:[#allocation2] sm:$0xff] }
 0x215   : > { %781 = vrot.lane.b32.xlu0 %v779_v5, %s2434_s10 }
 0x21a   : > { %v788_v18 = vpop.permute.xlu2 %787 }
 0x21b   : > { %v810_v25 = vmul.f32 %v788_v18, %v2697_v37  ;;  %v790_v31 = vmul.f32 %v788_v18, %v2695_v36 }
 0x21c   : > { %v693_v8 = vpop.permute.xlu1 %692 }
 0x21d   : > { %1956 = vmatmul.msk.bf16.vlgmr.msra.gmra.mxu3 %vm697_vm4, %v693_v8  ;;  %796 = vrot.lane.b32.xlu0 %v794_v7, %s2431_s27 }
 0x21e   : > { %765 = vmatpush.bf16.msra.mxu3 %v756_v9 }
 0x222   : > { %v814_v24 = vpop.permute.xlu2 %813 }
 0x223   : > { %v816_v27 = vadd.f32 %v814_v24, %v810_v25 }
 0x224   : > { %v657_v13 = vpop.permute.xlu1 %656 }
 0x225   : > { %v659_v14 = vsub.f32 %v649_v10, %v657_v13  ;;  %v817_v30 = vpack.c.bf16 %v816_v27, %v816_v27  ;;  %v2225_v13 = vld [vmem:[#allocation2 + $0x8] sm:$0xff] }
 0x227   : > { %v660_v15 = vmul.f32 0.17677669, %v659_v14 }
 0x229   : > { %v661_v16 = vpack.c.bf16 %v660_v15, %v660_v15 }
 0x22d   : > { %1957 = vmatmul.msk.bf16.vlgmr.msrb.gmra.mxu3 %vm697_vm4, %v661_v16 }
 0x27f   : > { %v806_v20 = vpop.permute.xlu0 %805 }
 0x280   : > { %v808_v22 = vsub.f32 %v802_v19, %v806_v20 }
 0x282   : > { %v809_v23 = vpack.c.bf16 %v808_v22, %v808_v22 }
 0x284   : > { %847 = vrot.lane.b32.xlu0 %v809_v23, %s2436_s12 }
 0x287   : > { %v782_v28 = vpop.permute.xlu0 %781 }
 0x288   : > { %v784_v29 = vsub.f32 %v775_v26, %v782_v28 }
 0x28a   : > { %v785_v48 = vmul.f32 0.17677669, %v784_v29 }
 0x28c   : > { %822 = vrot.lane.b32.xlu0 %v817_v30, %s2437_s13  ;;  %v786_v49 = vpack.c.bf16 %v785_v48, %v785_v48 }
 0x28f   : > { %v797_v32 = vpop.permute.xlu0 %796 }
 0x290   : > { %v799_v33 = vadd.f32 %v797_v32, %v790_v31 }
 0x292   : > { %v800_v34 = vmul.f32 0.17677669, %v799_v33 }
 0x294   : > { %v801_v35 = vpack.c.bf16 %v800_v34, %v800_v34 }
 0x296   : > { %819 = vrot.lane.b32.xlu0 %v801_v35, %s2437_s13 }
 0x29e   : > { %965 = vrot.lane.b32.xlu0 %v2554_v12, %s2437_s13 }
 0x2a0   : > { %v713_v38 = vpop.f32.mrf.mxu3 }
 0x2a6   : > { %980 = vrot.lane.b32.xlu0 %v2554_v12, %s2438_s14 }
 0x2a8   : > { %v715_v39 = vpop.f32.mrf.mxu3 }
 0x2ae   : > { %1140 = vrot.lane.b32.xlu0 %v2554_v12, %s2436_s12 }
 0x2b0   : > { %v732_v43 = vpop.f32.mrf.mxu3 }
 0x2b1   : > { %v733_v44 = vadd.f32 %v732_v43, %v713_v38 }
 0x2b3   : > { %v736_v45 = vsel %vm632_vm6, %v733_v44, -1e+30 }
 0x2b4   : > { %v738_v46 = vsel %vm737_vm7, %v736_v45, -inf }
 0x2b5   : > { %739 = vmax.xlane.f32.xlu1 %v738_v46 }
 0x2b6   : > { %976 = vrot.lane.b32.xlu0 %v2552_v11, %s2437_s13 }
 0x2b8   : > { %v734_v47 = vpop.f32.mrf.mxu3 }
 0x2ce   : > { %844 = vrot.lane.b32.xlu1 %v786_v49, %s2436_s12 }
 0x2d6   : > { %1125 = vrot.lane.b32.xlu1 %v2554_v12, %s2434_s10 }
 0x2f6   : > { %v848_v50 = vpop.permute.xlu0 %847 }
 0x2f7   : > { %v853_v51 = vsel %vm697_vm4, %v848_v50, 0 }
 0x2f8   : > { %862 = vmatpush.bf16.xpose.msrb.mxu3 %v853_v51 }
 0x2fe   : > { %v823_v52 = vpop.permute.xlu0 %822 }
 0x2ff   : > { %v828_v53 = vsel %vm697_vm4, %v823_v52, 0 }
 0x300   : > { %837 = vmatpush.bf16.xpose.msrb.mxu0 %v828_v53 }
 0x308   : > { %v820_v54 = vpop.permute.xlu0 %819  ;;  %954 = vmatpush.bf16.msra.mxu0 %v2225_v13 }
 0x309   : > { %1959 = vmatmul.msk.bf16.vlgmr.msrb.gmra.mxu0 %vm697_vm4, %v820_v54 }
 0x30c   : > { %955 = vmatpush.bf16.msra.mxu0 %v2224_v17 }
 0x310   : > { %v966_v55 = vpop.permute.xlu0 %965 }
 0x311   : > { %v992_v56 = vmul.f32 %v966_v55, %v2697_v37  ;;  %v968_v58 = vmul.f32 %v966_v55, %v2695_v36 }
 0x313   : > { %994 = vrot.lane.b32.xlu1 %v992_v56, %s2434_s10 }
 0x318   : > { %v981_v57 = vpop.permute.xlu0 %980 }
 0x319   : > { %v1000_v12 = vmul.f32 %v981_v57, %v2697_v37  ;;  %v983_v59 = vmul.f32 %v981_v57, %v2695_v36 }
 0x31b   : > { %970 = vrot.lane.b32.xlu1 %v968_v58, %s2434_s10  ;;  %1002 = vrot.lane.b32.xlu0 %v1000_v12, %s2431_s27 }
 0x320   : > { %v1141_v5 = vpop.permute.xlu0 %1140 }
 0x321   : > { %v1143_v7 = vmul.f32 %v1141_v5, %v2695_v36  ;;  %v1160_v29 = vmul.f32 %v1141_v5, %v2697_v37 }
 0x323   : > { %1121 = vrot.lane.b32.xlu0 %v2552_v11, %s2436_s12  ;;  %985 = vrot.lane.b32.xlu1 %v983_v59, %s2431_s27 }
 0x328   : > { %v740_v60 = vpop.xlane.xlu1 %739  ;;  %v977_v30 = vpop.permute.xlu0 %976 }
 0x329   : > { %v741_v61 = vsub.f32 %v736_v45, %v740_v60  ;;  %v999_v33 = vmul.f32 %v977_v30, %v2697_v37 }
 0x32b   : > { %v742_v62 = vmul.f32 1.442695, %v741_v61  ;;  %1136 = vrot.lane.b32.xlu1 %v2552_v11, %s2434_s10 }
 0x32d   : > { %2325 = vpow2.f32 %v742_v62 }
 0x333   : > { %v2326_v63 = vpop.eup %2325 }
 0x334   : > { %v744_v1 = vsel %vm737_vm7, %v2326_v63, 0.0 }
 0x335   : > { %745 = vadd.xlane.f32.xlu2 %v744_v1 }
 0x340   : > { %v845_v2 = vpop.permute.xlu1 %844 }
 0x348   : > { %v1126_v3 = vpop.permute.xlu1 %1125 }
 0x349   : > { %v1128_v4 = vmul.f32 %v1126_v3, %v2695_v36  ;;  %v1152_v27 = vmul.f32 %v1126_v3, %v2697_v37 }
 0x34b   : > { %1130 = vrot.lane.b32.xlu0 %v1128_v4, %s2434_s10 }
 0x353   : > { %1145 = vrot.lane.b32.xlu0 %v1143_v7, %s2431_s27 }
 0x385   : > { %v995_v28 = vpop.permute.xlu1 %994 }
 0x386   : > { %v839_v8 = vpop.f32.mrf.mxu0 }
 0x38d   : > { %v971_v31 = vpop.permute.xlu1 %970  ;;  %v1003_v32 = vpop.permute.xlu0 %1002 }
 0x38e   : > { %v841_v9 = vpop.f32.mrf.mxu0  ;;  %v1005_v34 = vadd.f32 %v1003_v32, %v999_v33 }
 0x390   : > { %v1006_v38 = vpack.c.bf16 %v1005_v34, %v1005_v34 }
 0x395   : > { %v986_v35 = vpop.permute.xlu1 %985  ;;  %v1122_v49 = vpop.permute.xlu0 %1121 }
 0x396   : > { %v1151_v62 = vmul.f32 %v1122_v49, %v2697_v37  ;;  %v1124_v7 = vmul.f32 %v1122_v49, %v2695_v36 }
 0x39d   : > { %v1137_v60 = vpop.permute.xlu1 %1136 }
 0x39e   : > { %v1139_v3 = vmul.f32 %v1137_v60, %v2695_v36 }
 0x3a8   : > { %v746_v10 = vpop.xlane.xlu2 %745 }
 0x3a9   : > { %2327 = vrcp.f32 %v746_v10 }
 0x3af   : > { %v2328_v14 = vpop.eup %2327 }
 0x3b0   : > { %v748_v15 = vmul.f32 %v2328_v14, %v2326_v63  ;;  %v1159_v63 = vmul.f32 %v1137_v60, %v2697_v37 }
 0x3b2   : > { %v749_v16 = vpack.c.bf16 %v748_v15, %v748_v15 }
 0x3b4   : > { %1958 = vmatmul.msk.bf16.vlgmr.msra.gmra.mxu3 %vm737_vm7, %v749_v16 }
 0x3bd   : > { %v1131_v58 = vpop.permute.xlu0 %1130 }
 0x3be   : > { %v1133_v10 = vsub.f32 %v1124_v7, %v1131_v58 }
 0x3c0   : > { %v1134_v15 = vmul.f32 0.17677669, %v1133_v10 }
 0x3c4   : > { %1960 = vmatmul.msk.bf16.vlgmr.msrb.gmra.mxu3 %vm697_vm4, %v845_v2 }
 0x3c5   : > { %v1146_v1 = vpop.permute.xlu0 %1145 }
 0x437   : > { %v767_v18 = vpop.f32.mrf.mxu3 }
 0x438   : > { %v771_v19 = vpack.c.bf16 %v767_v18, %v767_v18  ;;  %v1135_v18 = vpack.c.bf16 %v1134_v15, %v1134_v15 }
 0x43a   : > { %1979 = vmatmul.msk.bf16.vlgmr.msra.gmra.mxu0 %vm916_vm8, %v771_v19 }
 0x43f   : > { %v769_v20 = vpop.f32.mrf.mxu3 }
 0x447   : > { %v864_v22 = vpop.f32.mrf.mxu3 }
 0x448   : > { %v865_v23 = vadd.f32 %v864_v22, %v839_v8  ;;  %v1148_v8 = vadd.f32 %v1146_v1, %v1139_v3 }
 0x44a   : > { %v868_v24 = vsel %vm632_vm6, %v865_v23, -1e+30  ;;  %v1149_v14 = vmul.f32 0.17677669, %v1148_v8  ;;  %v2229_v8 = vld [vmem:[#allocation2 + $0x28] sm:$0xff] }
 0x44b   : > { %v869_v25 = vsel %vm737_vm7, %v868_v24, -inf  ;;  %1113 = vmatpush.bf16.msrb.mxu0 %v2229_v8  ;;  %v2070_v8 = vld [vmem:[%s3069_s7 + $0x80] sm:$0xf] }
 0x44c   : > { %870 = vmax.xlane.f32.xlu2 %v869_v25  ;;  %v1150_v17 = vpack.c.bf16 %v1149_v14, %v1149_v14 }
 0x44f   : > { %v866_v26 = vpop.f32.mrf.mxu3 }
 0x464   : > { %961 = vrot.lane.b32.xlu2 %v2552_v11, %s2438_s14  ;;  %v979_v11 = vmul.f32 %v977_v30, %v2695_v36 }
 0x466   : > { %v988_v39 = vadd.f32 %v986_v35, %v979_v11 }
 0x468   : > { %v989_v40 = vmul.f32 0.17677669, %v988_v39  ;;  %v2226_v39 = vld [vmem:[#allocation2 + $0x10] sm:$0xff] }
 0x46a   : > { %v990_v43 = vpack.c.bf16 %v989_v40, %v989_v40 }
 0x46c   : > { %1154 = vrot.lane.b32.xlu2 %v1152_v27, %s2434_s10 }
 0x474   : > { %1162 = vrot.lane.b32.xlu2 %v1160_v29, %s2431_s27 }
 0x47c   : > { %882 = vrot.lane.b32.xlu2 %v2729_v6, %s2436_s12 }
 0x484   : > { %1011 = vrot.lane.b32.xlu2 %v1006_v38, %s2435_s11  ;;  %v2227_v38 = vld [vmem:[#allocation2 + $0x18] sm:$0xff] }
 0x485   : > { %926 = vmatpush.bf16.msra.mxu3 %v2227_v38  ;;  %v2128_v38 = vld [vmem:[%s3069_s7 + $0xf8] sm:$0xf0] }
 0x489   : > { %927 = vmatpush.bf16.msra.mxu3 %v2226_v39 }
 0x48c   : > { %1008 = vrot.lane.b32.xlu2 %v990_v43, %s2435_s11 }
 0x4b7   : > { %v2802_v44 = vpop.f32.mrf.mxu0 }
 0x4bf   : > { %v871_v45 = vpop.xlane.xlu2 %870  ;;  %v959_v46 = vpop.f32.mrf.mxu0 }
 0x4c0   : > { %v872_v47 = vsub.f32 %v868_v24, %v871_v45 }
 0x4c2   : > { %v873_v48 = vmul.f32 1.442695, %v872_v47 }
 0x4c4   : > { %2329 = vpow2.f32 %v873_v48 }
 0x4c7   : > { %v962_v50 = vpop.permute.xlu2 %961 }
 0x4c8   : > { %v964_v51 = vmul.f32 %v962_v50, %v2695_v36  ;;  %v991_v52 = vmul.f32 %v962_v50, %v2697_v37 }
 0x4ca   : > { %v2330_v53 = vpop.eup %2329  ;;  %v997_v54 = vsub.f32 %v991_v52, %v995_v28  ;;  %v973_v56 = vsub.f32 %v964_v51, %v971_v31 }
 0x4cb   : > { %v875_v55 = vsel %vm737_vm7, %v2330_v53, 0.0 }
 0x4cc   : > { %876 = vadd.xlane.f32.xlu1 %v875_v55  ;;  %v998_v57 = vpack.c.bf16 %v997_v54, %v997_v54  ;;  %v974_v59 = vmul.f32 0.17677669, %v973_v56 }
 0x4ce   : > { %1036 = vrot.lane.b32.xlu0 %v998_v57, %s2438_s14  ;;  %v975_v61 = vpack.c.bf16 %v974_v59, %v974_v59 }
 0x4cf   : > { %v1155_v12 = vpop.permute.xlu2 %1154 }
 0x4d0   : > { %v1157_v4 = vsub.f32 %v1151_v62, %v1155_v12 }
 0x4d2   : > { %v1158_v13 = vpack.c.bf16 %v1157_v4, %v1157_v4 }
 0x4d6   : > { %1033 = vrot.lane.b32.xlu0 %v975_v61, %s2438_s14 }
 0x4d7   : > { %v1163_v2 = vpop.permute.xlu2 %1162 }
 0x4d8   : > { %v1165_v5 = vadd.f32 %v1163_v2, %v1159_v63 }
 0x4da   : > { %v1166_v9 = vpack.c.bf16 %v1165_v5, %v1165_v5 }
 0x4dc   : > { %1171 = vrot.lane.b32.xlu2 %v1166_v9, %s2431_s27  ;;  %v2228_v9 = vld [vmem:[#allocation2 + $0x20] sm:$0xff] }
 0x4dd   : > { %1114 = vmatpush.bf16.msrb.mxu0 %v2228_v9  ;;  %v2250_v9 = vld [vmem:[%s3069_s7 + $0x8c] sm:$0xf0] }
 0x4de   : > { %1196 = vrot.lane.b32.xlu0 %v1158_v13, %s2432_s28 }
 0x4df   : > { %v883_v37 = vpop.permute.xlu2 %882 }
 0x4e0   : > { %v888_v16 = vsel %vm754_vm5, %v883_v37, 0 }
 0x4e1   : > { %897 = vmatpush.bf16.msrb.mxu2 %v888_v16 }
 0x4e4   : > { %1168 = vrot.lane.b32.xlu2 %v1150_v17, %s2431_s27 }
 0x4e6   : > { %1193 = vrot.lane.b32.xlu0 %v1135_v18, %s2432_s28 }
 0x4e7   : > { %v1012_v36 = vpop.permute.xlu2 %1011 }
 0x4e8   : > { %v1017_v19 = vsel %vm697_vm4, %v1012_v36, 0  ;;  %v2231_v36 = vld [vmem:[#allocation2 + $0x38] sm:$0xff] }
 0x4e9   : > { %1026 = vmatpush.bf16.xpose.msrb.mxu1 %v1017_v19  ;;  %1273 = vmatpush.bf16.msra.mxu0 %v2231_v36  ;;  %v2230_v19 = vld [vmem:[#allocation2 + $0x30] sm:$0xff]  ;;  %v2080_v36 = vld [vmem:[%s3069_s7 + $0x98] sm:$0xf0] }
 0x4ed   : > { %1274 = vmatpush.bf16.msra.mxu0 %v2230_v19 }
 0x4ef   : > { %v1009_v20 = vpop.permute.xlu2 %1008 }
 0x4f0   : > { %1980 = vmatmul.msk.bf16.vlgmr.msrb.gmra.mxu1 %vm697_vm4, %v1009_v20 }
 0x536   : > { %v1172_v22 = vpop.permute.xlu2 %1171 }
 0x537   : > { %v1177_v23 = vsel %vm697_vm4, %v1172_v22, 0 }
 0x538   : > { %1186 = vmatpush.bf16.xpose.msra.mxu1 %v1177_v23 }
 0x53e   : > { %v1169_v24 = vpop.permute.xlu2 %1168 }
 0x53f   : > { %v877_v25 = vpop.xlane.xlu1 %876  ;;  %1992 = vmatmul.msk.bf16.vlgmr.msra.gmra.mxu1 %vm697_vm4, %v1169_v24 }
 0x540   : > { %2331 = vrcp.f32 %v877_v25  ;;  %v1037_v26 = vpop.permute.xlu0 %1036 }
 0x541   : > { %v1042_v27 = vsel %vm697_vm4, %v1037_v26, 0 }
 0x542   : > { %1051 = vmatpush.bf16.xpose.msra.mxu2 %v1042_v27  ;;  %v2118_v27 = vld [vmem:[%s3069_s7 + $0xe0] sm:$0xf] }
 0x546   : > { %v2332_v28 = vpop.eup %2331 }
 0x547   : > { %v879_v29 = vmul.f32 %v2332_v28, %v2330_v53  ;;  %v2262_v28 = vld [vmem:[%s3069_s7 + $0xec] sm:$0xf0] }
 0x548   : > { %v1034_v30 = vpop.permute.xlu0 %1033 }
 0x549   : > { %v880_v31 = vpack.c.bf16 %v879_v29, %v879_v29  ;;  %v2260_v29 = vld [vmem:[%s3069_s7 + $0xe4] sm:$0xf] }
 0x54b   : > { %1961 = vmatmul.msk.bf16.vlgmr.msrb.gmra.mxu2 %vm737_vm7, %v880_v31  ;;  %v2120_v31 = vld [vmem:[%s3069_s7 + $0xf0] sm:$0xf0] }
 0x550   : > { %v1197_v32 = vpop.permute.xlu0 %1196 }
 0x551   : > { %v1202_v33 = vsel %vm697_vm4, %v1197_v32, 0  ;;  %v2126_v32 = vld [vmem:[%s3069_s7 + $0xe8] sm:$0xf] }
 0x552   : > { %1211 = vmatpush.bf16.xpose.msrb.mxu2 %v1202_v33  ;;  %v2263_v33 = vld [vmem:[%s3069_s7 + $0xf4] sm:$0xf0] }
 0x558   : > { %v1194_v34 = vpop.permute.xlu0 %1193 }
 0x55b   : > { %1981 = vmatmul.msk.bf16.vlgmr.msra.gmra.mxu2 %vm697_vm4, %v1034_v30  ;;  %v2119_v30 = vor.u32 %v2262_v28, %v2118_v27  ;;  %v2247_v27 = vld [vmem:[%s3069_s7 + $0x74] sm:$0xf0] }
 0x55d   : > { %1496 = vmatpush.bf16.msrb.mxu1 %v2119_v30  ;;  %v2245_v30 = vld [vmem:[%s3069_s7 + $0x6c] sm:$0xf] }
 0x56b   : > { %1993 = vmatmul.msk.bf16.vlgmr.msrb.gmra.mxu2 %vm697_vm4, %v1194_v34  ;;  %v2123_v34 = vor.u32 %v2260_v29, %v2120_v31  ;;  %v2064_v31 = vld [vmem:[%s3069_s7 + $0x78] sm:$0xf0] }
 0x56d   : > { %v1028_v35 = vpop.f32.mrf.mxu1  ;;  %1509 = vmatpush.bf16.msra.mxu2 %v2123_v34  ;;  %v2242_v34 = vld [vmem:[%s3069_s7 + $0x4c] sm:$0xf0] }
 0x575   : > { %v1030_v11 = vpop.f32.mrf.mxu1 }
 0x576   : > { %v2261_v11 = vld [vmem:[%s3069_s7 + $0xec] sm:$0xf] }
 0x577   : > { %v2131_v39 = vor.u32 %v2261_v11, %v2128_v38  ;;  %v2040_v38 = vld [vmem:[%s3069_s7 + $0x50] sm:$0xf0] }
 0x5bc   : > { %v1188_v40 = vpop.f32.mrf.mxu1 }
 0x5c4   : > { %v1190_v43 = vpop.f32.mrf.mxu1 }
 0x5ce   : > { %v899_v45 = vpop.f32.mrf.mxu2 }
 0x5cf   : > { %v903_v46 = vpack.c.bf16 %v899_v45, %v899_v45 }
 0x5d1   : > { %1970 = vmatmul.msk.bf16.vlgmr.msra.gmra.mxu3 %vm916_vm8, %v903_v46 }
 0x5d6   : > { %v901_v47 = vpop.f32.mrf.mxu2 }
 0x5de   : > { %v1053_v48 = vpop.f32.mrf.mxu2 }
 0x5df   : > { %v1054_v49 = vadd.f32 %v1053_v48, %v1028_v35  ;;  %v2127_v35 = vor.u32 %v2263_v33, %v2126_v32  ;;  %v2067_v32 = vor.u32 %v2245_v30, %v2064_v31  ;;  %v2038_v33 = vld [vmem:[%s3069_s7 + $0x40] sm:$0xf]  ;;  %v2275_v30 = vld [vmem:[#allocation4 + $0x58] sm:$0xff]  ;;  %v2265_v31 = vld [vmem:[#allocation4 + $0x8] sm:$0xff] }
 0x5e0   : > { %v2039_v11 = vor.u32 %v2242_v34, %v2038_v33  ;;  %v2264_v34 = vld [vmem:[#allocation4] sm:$0xff] }
 0x5e1   : > { %v1057_v50 = vsel %vm632_vm6, %v1054_v49, -1e+30 }
 0x5e2   : > { %v1058_v51 = vsel %vm737_vm7, %v1057_v50, -inf }
 0x5e3   : > { %1059 = vmax.xlane.f32.xlu0 %v1058_v51 }
 0x5e6   : > { %v1055_v52 = vpop.f32.mrf.mxu2 }
 0x5e7   : > { %v2102_v52 = vld [vmem:[%s3069_s7 + $0xc0] sm:$0xf] }
 0x5ee   : > { %v1213_v53 = vpop.f32.mrf.mxu2 }
 0x5ef   : > { %v1214_v54 = vadd.f32 %v1213_v53, %v1188_v40  ;;  %v2258_v53 = vld [vmem:[%s3069_s7 + $0xcc] sm:$0xf0] }
 0x5f1   : > { %v1217_v55 = vsel %vm632_vm6, %v1214_v54, -1e+30  ;;  %v2103_v54 = vor.u32 %v2258_v53, %v2102_v52  ;;  %v2236_v52 = vld [vmem:[%s3069_s7 + $0x24] sm:$0xf] }
 0x5f2   : > { %v1218_v56 = vsel %vm737_vm7, %v1217_v55, -inf }
 0x5f3   : > { %1219 = vmax.xlane.f32.xlu1 %v1218_v56  ;;  %v2259_v56 = vld [vmem:[%s3069_s7 + $0xd4] sm:$0xf0]  ;;  %1497 = vmatpush.bf16.msrb.mxu1 %v2103_v54  ;;  %v2030_v54 = vld [vmem:[%s3069_s7 + $0x28] sm:$0xf] }
 0x5f6   : > { %v1215_v57 = vpop.f32.mrf.mxu2 }
 0x5f7   : > { %1230 = vrot.lane.b32.xlu0 %v2729_v6, %s2432_s28 }
 0x60c   : > { %1070 = vrot.lane.b32.xlu1 %v2729_v6, %s2438_s14  ;;  %s395_s14 = scalar_lea.vmem %s3071_s9, %s2516_s24 }
 0x654   : > { %v2840_v58 = vpop.f32.mrf.mxu3 }
 0x655   : > { %v958_v45 = vadd.f32 %v2802_v44, %v2840_v58  ;;  %v2256_v44 = vld [vmem:[%s3069_s7 + $0xc4] sm:$0xf] }
 0x656   : > { %v1060_v12 = vpop.xlane.xlu0 %1059 }
 0x657   : > { %v1061_v59 = vsub.f32 %v1057_v50, %v1060_v12  ;;  %v2257_v12 = vld [vmem:[%s3069_s7 + $0xcc] sm:$0xf] }
 0x659   : > { %v1062_v60 = vmul.f32 1.442695, %v1061_v59  ;;  %v2112_v59 = vld [vmem:[%s3069_s7 + $0xd8] sm:$0xf0] }
 0x65b   : > { %2333 = vpow2.f32 %v1062_v60  ;;  %v2115_v60 = vor.u32 %v2257_v12, %v2112_v59  ;;  %v2006_v12 = vld [vmem:[%s3069_s7] sm:$0xf] }
 0x65c   : > { %v931_v61 = vpop.f32.mrf.mxu3 }
 0x65d   : > { %v2086_v61 = vld [vmem:[%s3069_s7 + $0xa0] sm:$0xf] }
 0x661   : > { %v2334_v62 = vpop.eup %2333 }
 0x662   : > { %v1064_v41 = vsel %vm737_vm7, %v2334_v62, 0.0 }
 0x663   : > { %1065 = vadd.xlane.f32.xlu2 %v1064_v41  ;;  %v2252_v41 = vld [vmem:[%s3069_s7 + $0xa4] sm:$0xf] }
 0x666   : > { %v1220_v42 = vpop.xlane.xlu1 %1219 }
 0x667   : > { %v1221_v63 = vsub.f32 %v1217_v55, %v1220_v42  ;;  %v2110_v55 = vld [vmem:[%s3069_s7 + $0xc8] sm:$0xf] }
 0x668   : > { %v2111_v58 = vor.u32 %v2259_v56, %v2110_v55 }
 0x669   : > { %v1222_v1 = vmul.f32 1.442695, %v1221_v63  ;;  %v1231_v6 = vpop.permute.xlu0 %1230  ;;  %v2088_v63 = vld [vmem:[%s3069_s7 + $0xb0] sm:$0xf0] }
 0x66a   : > { %v1236_v7 = vsel %vm754_vm5, %v1231_v6, 0 }
 0x66b   : > { %2335 = vpow2.f32 %v1222_v1  ;;  %v2094_v1 = vld [vmem:[%s3069_s7 + $0xa8] sm:$0xf] }
 0x671   : > { %v2336_v2 = vpop.eup %2335 }
 0x672   : > { %v1224_v3 = vsel %vm737_vm7, %v2336_v2, 0.0 }
 0x673   : > { %1225 = vadd.xlane.f32.xlu1 %v1224_v3  ;;  %v2091_v3 = vor.u32 %v2252_v41, %v2088_v63  ;;  %v2014_v63 = vld [vmem:[%s3069_s7 + $0x8] sm:$0xf] }
 0x67e   : > { %v1071_v4 = vpop.permute.xlu1 %1070 }
 0x67f   : > { %v1076_v5 = vsel %vm754_vm5, %v1071_v4, 0  ;;  %v2253_v4 = vld [vmem:[%s3069_s7 + $0xac] sm:$0xf] }
 0x680   : > { %1085 = vmatpush.bf16.msrb.mxu3 %v1076_v5  ;;  %v2096_v5 = vld [vmem:[%s3069_s7 + $0xb8] sm:$0xf0] }
 0x684   : > { %1245 = vmatpush.bf16.msra.mxu3 %v1236_v7  ;;  %v2099_v7 = vor.u32 %v2253_v4, %v2096_v5 }
 0x6d6   : > { %v1066_v10 = vpop.xlane.xlu2 %1065 }
 0x6d7   : > { %2337 = vrcp.f32 %v1066_v10  ;;  %v2248_v10 = vld [vmem:[%s3069_s7 + $0x84] sm:$0xf] }
 0x6dd   : > { %v2338_v13 = vpop.eup %2337 }
 0x6de   : > { %v1068_v14 = vmul.f32 %v2338_v13, %v2334_v62  ;;  %v2254_v62 = vld [vmem:[%s3069_s7 + $0xac] sm:$0xf0]  ;;  %v2071_v13 = vor.u32 %v2250_v9, %v2070_v8 }
 0x6df   : > { %v2087_v42 = vor.u32 %v2254_v62, %v2086_v61  ;;  %v2232_v61 = vld [vmem:[%s3069_s7 + $0x4] sm:$0xf]  ;;  %v2008_v62 = vld [vmem:[%s3069_s7 + $0x10] sm:$0xf0] }
 0x6e0   : > { %v1069_v37 = vpack.c.bf16 %v1068_v14, %v1068_v14  ;;  %v2072_v14 = vld [vmem:[%s3069_s7 + $0x90] sm:$0xf0] }
 0x6e1   : > { %1498 = vmatpush.bf16.msrb.mxu1 %v2087_v42  ;;  %v2011_v42 = vor.u32 %v2232_v61, %v2008_v62 }
 0x6e2   : > { %1982 = vmatmul.msk.bf16.vlgmr.msrb.gmra.mxu3 %vm737_vm7, %v1069_v37  ;;  %v2078_v37 = vld [vmem:[%s3069_s7 + $0x88] sm:$0xf] }
 0x6e3   : > { %1522 = vmatpush.bf16.msrb.mxu3 %v2127_v35  ;;  %v2240_v35 = vld [vmem:[%s3069_s7 + $0x44] sm:$0xf] }
 0x6e5   : > { %1499 = vmatpush.bf16.msrb.mxu1 %v2071_v13 }
 0x6e6   : > { %v1226_v15 = vpop.xlane.xlu1 %1225 }
 0x6e7   : > { %2339 = vrcp.f32 %v1226_v15  ;;  %1523 = vmatpush.bf16.msrb.mxu3 %v2111_v58  ;;  %v2251_v15 = vld [vmem:[%s3069_s7 + $0x94] sm:$0xf0]  ;;  %v2032_v58 = vld [vmem:[%s3069_s7 + $0x38] sm:$0xf0] }
 0x6ed   : > { %v2340_v16 = vpop.eup %2339 }
 0x6ee   : > { %v1228_v17 = vmul.f32 %v2340_v16, %v2336_v2  ;;  %v2255_v2 = vld [vmem:[%s3069_s7 + $0xb4] sm:$0xf0]  ;;  %v2075_v16 = vor.u32 %v2248_v10, %v2072_v14 }
 0x6ef   : > { %v2095_v6 = vor.u32 %v2255_v2, %v2094_v1  ;;  %v2235_v1 = vld [vmem:[%s3069_s7 + $0x14] sm:$0xf0]  ;;  %v2233_v2 = vld [vmem:[%s3069_s7 + $0xc] sm:$0xf] }
 0x6f0   : > { %v1229_v18 = vpack.c.bf16 %v1228_v17, %v1228_v17  ;;  %v2079_v17 = vor.u32 %v2251_v15, %v2078_v37 }
 0x6f1   : > { %1524 = vmatpush.bf16.msrb.mxu3 %v2095_v6  ;;  %v2016_v6 = vld [vmem:[%s3069_s7 + $0x18] sm:$0xf0] }
 0x6f2   : > { %1994 = vmatmul.msk.bf16.vlgmr.msra.gmra.mxu3 %vm737_vm7, %v1229_v18  ;;  %v2249_v18 = vld [vmem:[%s3069_s7 + $0x8c] sm:$0xf]  ;;  %v2019_v4 = vor.u32 %v2233_v2, %v2016_v6 }
 0x6f3   : > { %v2083_v19 = vor.u32 %v2249_v18, %v2080_v36 }
 0x6f5   : > { %1525 = vmatpush.bf16.msrb.mxu3 %v2079_v17 }
 0x765   : > { %v1087_v20 = vpop.f32.mrf.mxu3 }
 0x766   : > { %v1091_v22 = vpack.c.bf16 %v1087_v20, %v1087_v20  ;;  %v2054_v20 = vld [vmem:[%s3069_s7 + $0x60] sm:$0xf] }
 0x768   : > { %1991 = vmatmul.msk.bf16.vlgmr.msrb.gmra.mxu0 %vm916_vm8, %v1091_v22  ;;  %v2246_v22 = vld [vmem:[%s3069_s7 + $0x6c] sm:$0xf0] }
 0x769   : > { %1535 = vmatpush.bf16.msrb.mxu0 %v2131_v39  ;;  %v2046_v39 = vld [vmem:[%s3069_s7 + $0x48] sm:$0xf] }
 0x76d   : > { %v1089_v23 = vpop.f32.mrf.mxu3  ;;  %1536 = vmatpush.bf16.msrb.mxu0 %v2115_v60  ;;  %v2234_v60 = vld [vmem:[%s3069_s7 + $0xc] sm:$0xf0] }
 0x76e   : > { %v2244_v23 = vld [vmem:[%s3069_s7 + $0x64] sm:$0xf]  ;;  %v2007_v41 = vor.u32 %v2234_v60, %v2006_v12 }
 0x771   : > { %1537 = vmatpush.bf16.msrb.mxu0 %v2099_v7 }
 0x775   : > { %v1247_v24 = vpop.f32.mrf.mxu3  ;;  %1538 = vmatpush.bf16.msrb.mxu0 %v2083_v19  ;;  %v2271_v19 = vld [vmem:[#allocation4 + $0x38] sm:$0xff] }
 0x776   : > { %v1251_v25 = vpack.c.bf16 %v1247_v24, %v1247_v24  ;;  %v2055_v24 = vor.u32 %v2246_v22, %v2054_v20  ;;  %v2270_v20 = vld [vmem:[#allocation4 + $0x30] sm:$0xff]  ;;  %v2279_v22 = vld [vmem:[#allocation4 + $0x78] sm:$0xff] }
 0x778   : > { %2003 = vmatmul.msk.bf16.vlgmr.msra.gmra.mxu0 %vm916_vm8, %v1251_v25  ;;  %v2056_v25 = vld [vmem:[%s3069_s7 + $0x70] sm:$0xf0]  ;;  %1500 = vmatpush.bf16.msrb.mxu1 %v2055_v24 }
 0x779   : > { %v2059_v28 = vor.u32 %v2244_v23, %v2056_v25  ;;  %1539 = vmatpush.bf16.msrb.mxu0 %v2067_v32  ;;  %v2269_v23 = vld [vmem:[#allocation4 + $0x28] sm:$0xff]  ;;  %v2278_v24 = vld [vmem:[#allocation4 + $0x70] sm:$0xff]  ;;  %v2268_v25 = vld [vmem:[#allocation4 + $0x20] sm:$0xff] }
 0x77a   : > { %v2274_v32 = vld [vmem:[#allocation4 + $0x50] sm:$0xff] }
 0x77c   : > { %1501 = vmatpush.bf16.msrb.mxu1 %v2039_v11 }
 0x77d   : > { %v1249_v26 = vpop.f32.mrf.mxu3 }
 0x77e   : > { %v2062_v26 = vld [vmem:[%s3069_s7 + $0x68] sm:$0xf] }
 0x77f   : > { %v2063_v29 = vor.u32 %v2247_v27, %v2062_v26  ;;  %v2277_v26 = vld [vmem:[#allocation4 + $0x68] sm:$0xff]  ;;  %v2267_v27 = vld [vmem:[#allocation4 + $0x18] sm:$0xff] }
 0x781   : > { %1526 = vmatpush.bf16.msrb.mxu3 %v2063_v29  ;;  %v2266_v29 = vld [vmem:[#allocation4 + $0x10] sm:$0xff] }
 0x7e5   : > { %v1116_v40 = vpop.f32.mrf.mxu0 }
 0x7e6   : > { %v1120_v46 = vadd.f32 %v1116_v40, %v958_v45  ;;  %v2243_v40 = vld [vmem:[%s3069_s7 + $0x54] sm:$0xf0] }
 0x7e7   : > { %v2047_v45 = vor.u32 %v2243_v40, %v2046_v39  ;;  %v2272_v40 = vld [vmem:[#allocation4 + $0x40] sm:$0xff] }
 0x7e9   : > { %1527 = vmatpush.bf16.msrb.mxu3 %v2047_v45 }
 0x7ed   : > { %v1118_v43 = vpop.f32.mrf.mxu0 }
 0x7ee   : > { %v2043_v43 = vor.u32 %v2240_v35, %v2040_v38  ;;  %v2273_v38 = vld [vmem:[#allocation4 + $0x48] sm:$0xff] }
 0x7f5   : > { %v1276_v47 = vpop.f32.mrf.mxu0 }
 0x7f6   : > { %v1280_v48 = vadd.f32 %v1276_v47, %v1120_v46  ;;  %v2241_v46 = vld [vmem:[%s3069_s7 + $0x4c] sm:$0xf]  ;;  %v2048_v47 = vld [vmem:[%s3069_s7 + $0x58] sm:$0xf0] }
 0x7f8   : > { %v2877_v49 = vadd.f32 %v1280_v48, %v2522_v0  ;;  %v2104_v0 = vld [vmem:[%s3069_s7 + $0xd0] sm:$0xf0]  ;;  %v2051_v48 = vor.u32 %v2241_v46, %v2048_v47 }
 0x7f9   : > { %v2107_v57 = vor.u32 %v2256_v44, %v2104_v0  ;;  %v2024_v44 = vld [vmem:[%s3069_s7 + $0x30] sm:$0xf0]  ;;  %v2239_v0 = vld [vmem:[%s3069_s7 + $0x34] sm:$0xf0] }
 0x7fa   : > { %v1282_v50 = vmul.f32 %v2877_v49, %v2877_v49  ;;  %1540 = vmatpush.bf16.msrb.mxu0 %v2051_v48  ;;  %v2027_v55 = vor.u32 %v2236_v52, %v2024_v44  ;;  %v2031_v56 = vor.u32 %v2239_v0, %v2030_v54 }
 0x7fb   : > { %1510 = vmatpush.bf16.msra.mxu2 %v2107_v57  ;;  %v2237_v57 = vld [vmem:[%s3069_s7 + $0x2c] sm:$0xf] }
 0x7fc   : > { %1283 = vadd.xlane.f32.xlu2 %v1282_v50  ;;  %v2022_v50 = vld [vmem:[%s3069_s7 + $0x20] sm:$0xf]  ;;  %v2035_v59 = vor.u32 %v2237_v57, %v2032_v58  ;;  %1528 = vmatpush.bf16.msrb.mxu3 %v2031_v56 }
 0x7fd   : > { %v1278_v51 = vpop.f32.mrf.mxu0 }
 0x7fe   : > { %v2238_v51 = vld [vmem:[%s3069_s7 + $0x2c] sm:$0xf0]  ;;  %1541 = vmatpush.bf16.msrb.mxu0 %v2035_v59 }
 0x7ff   : > { %1511 = vmatpush.bf16.msra.mxu2 %v2091_v3  ;;  %v2023_v53 = vor.u32 %v2238_v51, %v2022_v50  ;;  %v2015_v3 = vor.u32 %v2235_v1, %v2014_v63 }
 0x801   : > { %1502 = vmatpush.bf16.msrb.mxu1 %v2023_v53  ;;  %1529 = vmatpush.bf16.msrb.mxu3 %v2015_v3 }
 0x802   : > { %1542 = vmatpush.bf16.msrb.mxu0 %v2019_v4 }
 0x803   : > { %1512 = vmatpush.bf16.msra.mxu2 %v2075_v16  ;;  %v2320_v16 = vld [vmem:[%s3068_s6] ss:$0 sm:$0xff] }
 0x805   : > { %1503 = vmatpush.bf16.msrb.mxu1 %v2007_v41 }
 0x807   : > { %1513 = vmatpush.bf16.msra.mxu2 %v2059_v28  ;;  %v2276_v28 = vld [vmem:[#allocation4 + $0x60] sm:$0xff] }
 0x809   : > { %1720 = vmatpush.bf16.msra.mxu1 %v2271_v19 }
 0x80b   : > { %1514 = vmatpush.bf16.msra.mxu2 %v2043_v43 }
 0x80d   : > { %1721 = vmatpush.bf16.msra.mxu1 %v2270_v20 }
 0x80f   : > { %1515 = vmatpush.bf16.msra.mxu2 %v2027_v55 }
 0x811   : > { %1722 = vmatpush.bf16.msra.mxu1 %v2269_v23 }
 0x813   : > { %1516 = vmatpush.bf16.msra.mxu2 %v2011_v42 }
 0x815   : > { %1723 = vmatpush.bf16.msra.mxu1 %v2268_v25 }
 0x817   : > { %1733 = vmatpush.bf16.msrb.mxu2 %v2279_v22 }
 0x819   : > { %1724 = vmatpush.bf16.msra.mxu1 %v2267_v27 }
 0x81b   : > { %1734 = vmatpush.bf16.msrb.mxu2 %v2278_v24 }
 0x81d   : > { %1725 = vmatpush.bf16.msra.mxu1 %v2266_v29 }
 0x81f   : > { %1735 = vmatpush.bf16.msrb.mxu2 %v2277_v26 }
 0x821   : > { %1726 = vmatpush.bf16.msra.mxu1 %v2265_v31 }
 0x823   : > { %1736 = vmatpush.bf16.msrb.mxu2 %v2276_v28 }
 0x825   : > { %1727 = vmatpush.bf16.msra.mxu1 %v2264_v34 }
 0x827   : > { %1737 = vmatpush.bf16.msrb.mxu2 %v2275_v30 }
 0x82b   : > { %1738 = vmatpush.bf16.msrb.mxu2 %v2274_v32 }
 0x82f   : > { %1739 = vmatpush.bf16.msrb.mxu2 %v2273_v38 }
 0x833   : > { %1740 = vmatpush.bf16.msrb.mxu2 %v2272_v40 }
 0x86f   : > { %v1284_v5 = vpop.xlane.xlu2 %1283 }
 0x870   : > { %v1285_v7 = vmul.f32 %v1284_v5, %v2688_v21 }
 0x872   : > { %v1286_v8 = vadd.f32 1e-06, %v1285_v7 }
 0x874   : > { %2341 = vrsqrt.f32 %v1286_v8  ;;  %vm1293_vm10 = vweird.f32 %v1286_v8 }
 0x87a   : > { %v2342_v9 = vpop.eup %2341 }
 0x87b   : > { %v1288_v10 = vmul.f32 %v2342_v9, %v1286_v8  ;;  %vm1294_vm9 = vweird.f32 %v2342_v9 }
 0x87c   : > { %vm1295_vm11 = vmor %vm1293_vm10, %vm1294_vm9 }
 0x87d   : > { %v1289_v13 = vmul.f32 %v2342_v9, %v1288_v10 }
 0x87f   : > { %v1290_v14 = vmul.f32 0.5, %v1289_v13 }
 0x881   : > { %v1291_v37 = vsub.f32 1.5, %v1290_v14 }
 0x883   : > { %v1292_v15 = vmul.f32 %v2342_v9, %v1291_v37 }
 0x885   : > { %v1296_v17 = vsel %vm1295_vm11, %v2342_v9, %v1292_v15 }
 0x886   : > { %v1297_v18 = vmul.f32 %v1296_v17, %v2877_v49 }
 0x888   : > { %v1302_v36 = vmul.f32 %v2320_v16, %v1297_v18 }
 0x88a   : > { %v1303_v21 = vpack.c.bf16 %v1302_v36, %v1302_v36 }
 0x88c   : > { %1504 = vmatmul.bf16.vlgmr.msrb.gmra.mxu1 %v1303_v21  ;;  %1517 = vmatmul.bf16.vlgmr.msra.gmra.mxu2 %v1303_v21 }
 0x88d   : > { %1530 = vmatmul.bf16.vlgmr.msrb.gmra.mxu3 %v1303_v21  ;;  %1543 = vmatmul.bf16.vlgmr.msrb.gmra.mxu0 %v1303_v21 }
 0x909   : > { %v1505_v33 = vpop.f32.mrf.mxu1 }
 0x90a   : > { %v2132_v35 = vmul.f32 -1.442695, %v1505_v33  ;;  %v1544_v11 = vpop.f32.mrf.mxu0 }
 0x90c   : > { %2343 = vpow2.f32 %v2132_v35 }
 0x90f   : > { %v1518_v39 = vpop.f32.mrf.mxu2 }
 0x910   : > { %v2133_v43 = vmul.f32 -1.442695, %v1518_v39  ;;  %v1531_v45 = vpop.f32.mrf.mxu3 }
 0x911   : > { %v1507_v46 = vpop.f32.mrf.mxu1 }
 0x912   : > { %v2344_v47 = vpop.eup %2343  ;;  %2345 = vpow2.f32 %v2133_v43  ;;  %v1546_v48 = vpop.f32.mrf.mxu0 }
 0x913   : > { %v1554_v50 = vadd.f32 1.0, %v2344_v47 }
 0x915   : > { %2347 = vrcp.f32 %v1554_v50  ;;  %v1567_v56 = vand.u32 2147483648, %v1554_v50  ;;  %v1565_v58 = vand.u32 2147483647, %v1554_v50  ;;  %vm1561_vm13 = vweird.f32 %v1554_v50 }
 0x917   : > { %v1520_v51 = vpop.f32.mrf.mxu2  ;;  %v1568_v61 = vor.u32 1.1754944e-38, %v1567_v56  ;;  %vm1566_vm15 = vcmp.eq.f32.partialorder %v1565_v58, 8.507059e+37 }
 0x918   : > { %v2346_v52 = vpop.eup %2345  ;;  %v1533_v53 = vpop.f32.mrf.mxu3 }
 0x919   : > { %v1555_v44 = vadd.f32 1.0, %v2346_v52 }
 0x91b   : > { %v2348_v54 = vpop.eup %2347  ;;  %2349 = vrcp.f32 %v1555_v44  ;;  %v1582_v63 = vand.u32 2147483648, %v1555_v44  ;;  %v1580_v3 = vand.u32 2147483647, %v1555_v44  ;;  %vm1576_vm1 = vweird.f32 %v1555_v44 }
 0x91c   : > { %v1557_v0 = vmul.f32 %v2348_v54, %v1554_v50  ;;  %vm1562_vm12 = vweird.f32 %v2348_v54 }
 0x91d   : > { %vm1563_vm14 = vmor %vm1561_vm13, %vm1562_vm12  ;;  %v1583_v5 = vor.u32 1.1754944e-38, %v1582_v63  ;;  %vm1581_vm3 = vcmp.eq.f32.partialorder %v1580_v3, 8.507059e+37 }
 0x91e   : > { %v1558_v55 = vsub.f32 1.0, %v1557_v0 }
 0x920   : > { %v1559_v57 = vmul.f32 %v2348_v54, %v1558_v55 }
 0x921   : > { %v2350_v12 = vpop.eup %2349 }
 0x922   : > { %v1560_v59 = vadd.f32 %v2348_v54, %v1559_v57  ;;  %v1572_v60 = vmul.f32 %v2350_v12, %v1555_v44  ;;  %vm1577_vm0 = vweird.f32 %v2350_v12 }
 0x923   : > { %vm1578_vm2 = vmor %vm1576_vm1, %vm1577_vm0 }
 0x924   : > { %v1564_v62 = vsel %vm1563_vm14, %v2348_v54, %v1560_v59  ;;  %v1573_v41 = vsub.f32 1.0, %v1572_v60 }
 0x925   : > { %v1569_v42 = vsel %vm1566_vm15, %v1568_v61, %v1564_v62 }
 0x926   : > { %v1586_v1 = vmul.f32 %v1569_v42, %v1505_v33  ;;  %v1574_v2 = vmul.f32 %v2350_v12, %v1573_v41 }
 0x928   : > { %v1575_v6 = vadd.f32 %v2350_v12, %v1574_v2  ;;  %v1588_v4 = vmul.f32 %v1586_v1, %v1531_v45 }
 0x92a   : > { %v1579_v7 = vsel %vm1578_vm2, %v2350_v12, %v1575_v6  ;;  %v1590_v8 = vpack.c.bf16 %v1588_v4, %v1588_v4 }
 0x92b   : > { %v1584_v9 = vsel %vm1581_vm3, %v1583_v5, %v1579_v7 }
 0x92c   : > { %v1587_v10 = vmul.f32 %v1584_v9, %v1518_v39  ;;  %1728 = vmatmul.bf16.vlgmr.msra.gmra.mxu1 %v1590_v8 }
 0x92e   : > { %v1589_v13 = vmul.f32 %v1587_v10, %v1544_v11 }
 0x930   : > { %v1591_v14 = vpack.c.bf16 %v1589_v13, %v1589_v13 }
 0x932   : > { %1741 = vmatmul.bf16.vlgmr.msrb.gmra.mxu2 %v1591_v14 }
 0x9a9   : > { %v1729_v37 = vpop.f32.mrf.mxu1 }
 0x9b1   : > { %v1731_v15 = vpop.f32.mrf.mxu1 }
 0x9b5   : > { %v1742_v16 = vpop.f32.mrf.mxu2 }
 0x9b6   : > { %v1743_v17 = vadd.f32 %v1742_v16, %v1729_v37 }
 0x9b8   : > { %v1746_v18 = vadd.f32 %v1743_v17, %v2877_v49 }
 0x9ba   : > { %1747 = vst [vmem:[%s395_s14] sm:$0xff] %v1746_v18 }
 0x9bd   : > { %v1744_v36 = vpop.f32.mrf.mxu2 }
 0x9be PF: > { %s21_s30 = sadd.s32 1, %s2425_s30  }
 0x9bf   : > { %p18_p7 = scmp.ge.s32.totalorder %s21_s30, 4  }
 0x9c1   :  { %20 = sbr.rel (!%p18_p7) target bundleno = 2 (0x2), region = 101 }
 0x9c6   :  { %1767 = vsyncpa [#allocation3], 1 }
 0x9c7   :  { %1769 = vsyncpa [#allocation3 + $0x1], 1 }
 0x9c8   :  { %1770 = vsyncpa [#allocation5], 1 }

</bundles_post_ra>
